<compile_context>
chip_gen: v6e
topology: v6e:2x2x1
jax: 0.10.0
libtpu: 0.0.40
codegen_flags: <defaults>
</compile_context>

<pallas_src>
import math

import jax
import jax.numpy as jnp
from jax.experimental import pallas as pl
from jax.experimental.pallas import tpu as pltpu

# ----------------------------- configuration ------------------------------
N_DIM = 3
N_CLASSES = 2
N_STEPS = 200
TIME_EMB_DIM = 128   # module default is 512; 128 keeps the demo small (1 lane-tile)
BATCH = 128          # demo batch; wrapper handles any batch size

assert TIME_EMB_DIM == 128, "packing layout below assumes time_emb_dim == 128"

# Per-layer (fan_in, fan_out) of every nn.Linear used in forward().
LIN_SHAPES = {
    "t1":   (TIME_EMB_DIM, TIME_EMB_DIM),
    "t2":   (TIME_EMB_DIM, TIME_EMB_DIM),
    "d1":   (N_DIM, 128),
    "d2":   (128, 256),
    "bn":   (256, 256),
    "u1":   (256 + 256, 256),
    "rp":   (256, 128),
    "u2":   (128 + 128, 128),
    "u3":   (128 + 128, 64),
    "tp1":  (TIME_EMB_DIM, N_DIM),
    "tp2":  (TIME_EMB_DIM, 128),
    "tpb":  (TIME_EMB_DIM, 256),
    "tpu1": (TIME_EMB_DIM, 256),
    "tpu2": (TIME_EMB_DIM, 128),
    "tpu3": (TIME_EMB_DIM, 128),
    "cp1":  (TIME_EMB_DIM, N_DIM),
    "cp2":  (TIME_EMB_DIM, 128),
    "cpb":  (TIME_EMB_DIM, 256),
    "cpu1": (TIME_EMB_DIM, 256),
    "cpu2": (TIME_EMB_DIM, 128),
    "cpu3": (TIME_EMB_DIM, 128),
    "f":    (64, N_DIM),
}
LN_SHAPES = {"1": 128, "2": 256, "bn": 256, "u1": 256, "u2": 128, "u3": 64}


# --------------------------- packed-parameter layout ------------------------
def _offsets(segs):
    table, off = {}, 0
    for name, w in segs:
        table[name] = (off, w)
        off += w
    return table, off


# Fused time/class projection output columns (all 128-lane aligned).
PROJ_SEGS = [("P1", 128), ("P2", 128), ("PB", 256),
             ("PU1", 256), ("PU2", 128), ("PU3", 128)]
PROJ_OFF, PROJ_TOTAL = _offsets(PROJ_SEGS)          # 1024
_PROJ_TO_LAYER = {"P1": "1", "P2": "2", "PB": "b",
                  "PU1": "u1", "PU2": "u2", "PU3": "u3"}

# Weight slab with 128 rows (bf16): layers whose contraction depth is 128.
WP128_SEGS = [("Wt1", 128), ("Wt2", 128), ("Wd2", 256), ("Wf", 128)]
WP128_OFF, WP128_TOTAL = _offsets(WP128_SEGS)       # 640

# Weight slab with 256 rows (bf16): every K=256 contraction (incl. the fused proj,
# the fused up2/up3 concat-dots, and the two up1 split dots).
WP256_SEGS = [("Wproj", PROJ_TOTAL), ("Wbn", 256), ("Wu1a", 256), ("Wu1b", 256),
              ("Wrp", 128), ("Wu2", 128), ("Wu3", 128)]
WP256_OFF, WP256_TOTAL = _offsets(WP256_SEGS)       # 2176

# Row-vector slab (f32): biases, LN gamma/beta, Wd1 rows. 128-lane aligned segments.
VEC_SEGS = [("b_proj", PROJ_TOTAL),
            ("bt1", 128), ("bt2", 128), ("bd1", 128), ("bd2", 256), ("bbn", 256),
            ("bu1", 256), ("brp", 128), ("bu2", 128), ("bu3", 128), ("bf", 128),
            ("g1", 128), ("g2", 256), ("gbn", 256), ("gu1", 256), ("gu2", 128),
            ("gu3", 128),
            ("be1", 128), ("be2", 256), ("bebn", 256), ("beu1", 256), ("beu2", 128),
            ("beu3", 128),
            ("wd1r0", 128), ("wd1r1", 128), ("wd1r2", 128)]
VEC_OFF, VEC_TOTAL = _offsets(VEC_SEGS)             # 5376

_MACS_PER_ROW = (128 * 128 + 128 * 128 + 256 * 1024 + 128 * 256 + 256 * 256
                 + 256 * 256 + 256 * 256 + 256 * 128 + 256 * 128 + 256 * 128
                 + 128 * 128)                        # 638976


# ------------------------------ Pallas kernel ------------------------------
def unet_kernel(x_ref, tsin_ref, yemb_ref, wp128_ref, wp256_ref, vec_ref, out_ref):
    f32 = jnp.float32
    bf16 = jnp.bfloat16

    def vrow(name):
        off, w = VEC_OFF[name]
        return vec_ref[:, off:off + w]                 # [1, w] f32

    def w128(name):
        off, w = WP128_OFF[name]
        return wp128_ref[:, off:off + w]               # [128, w] bf16

    def w256(name):
        off, w = WP256_OFF[name]
        return wp256_ref[:, off:off + w]               # [256, w] bf16

    def mm(a, w):                                      # bf16 MXU, f32 accumulate
        return jnp.dot(a.astype(bf16), w, preferred_element_type=f32)

    def silu(v):
        return v * jax.nn.sigmoid(v)

    def ln(v, gname, bname):
        mu = jnp.mean(v, axis=-1, keepdims=True)
        d = v - mu                                     # reused: variance + numerator
        var = jnp.mean(d * d, axis=-1, keepdims=True)
        return d * jax.lax.rsqrt(var + 1e-5) * vrow(gname) + vrow(bname)

    x = x_ref[...]          # [B, 3]   f32
    tsin = tsin_ref[...]    # [B, 128] bf16
    yemb = yemb_ref[...]    # [B, 128] bf16

    # --- time_mlp: Linear -> SiLU -> Linear ---
    t_emb = mm(silu(mm(tsin, w128("Wt1")) + vrow("bt1")), w128("Wt2")) + vrow("bt2")

    # --- all 12 time/class projections fused into ONE K=256 contraction ---
    cat_ty = jnp.concatenate([t_emb.astype(bf16), yemb], axis=-1)      # [B, 256]
    proj = mm(cat_ty, w256("Wproj")) + vrow("b_proj")                  # [B, 1024] f32

    def pseg(name):
        off, w = PROJ_OFF[name]
        return proj[:, off:off + w]

    # --- down1: K=3 contraction on the VPU (3 broadcast FMAs, no MXU push) ---
    p1 = pseg("P1")                                     # only cols 0:3 meaningful
    h1p = (vrow("bd1")
           + (x[:, 0:1] + p1[:, 0:1]) * vrow("wd1r0")
           + (x[:, 1:2] + p1[:, 1:2]) * vrow("wd1r1")
           + (x[:, 2:3] + p1[:, 2:3]) * vrow("wd1r2"))
    h1 = ln(silu(h1p), "g1", "be1")                     # [B,128] f32
    h1_bf = h1.astype(bf16)                             # reused by up2 and up3

    # --- down2 / bottleneck ---
    h2 = ln(silu(mm(h1 + pseg("P2"), w128("Wd2")) + vrow("bd2")), "g2", "be2")    # [B,256]
    hb = ln(silu(mm(h2 + pseg("PB"), w256("Wbn")) + vrow("bbn")), "gbn", "bebn")  # [B,256]

    # --- up1: concat of width 512 -> two K=256 split-weight dots ---
    hu1 = ln(silu(mm(hb + pseg("PU1"), w256("Wu1a")) + mm(h2, w256("Wu1b"))
                  + vrow("bu1")), "gu1", "beu1")        # [B,256]

    # --- reduce_proj ---
    hr = mm(hu1, w256("Wrp")) + vrow("brp")             # [B,128]

    # --- up2: single fused K=256 dot (lane-concat of the two halves) ---
    cat_u2 = jnp.concatenate([(hr + pseg("PU2")).astype(bf16), h1_bf], axis=-1)
    hu2 = ln(silu(mm(cat_u2, w256("Wu2")) + vrow("bu2")), "gu2", "beu2")   # [B,128]

    # --- up3: fused K=256 dot; 64-wide layer kept in a 128-lane container ---
    cat_u3 = jnp.concatenate([(hu2 + pseg("PU3")).astype(bf16), h1_bf], axis=-1)
    u3s = silu(mm(cat_u3, w256("Wu3")) + vrow("bu3"))   # cols 64: are silu(0)=0
    u3v = u3s[:, :64]                                   # LN statistics over real 64 dims
    mu = jnp.mean(u3v, axis=-1, keepdims=True)
    d = u3v - mu
    var = jnp.mean(d * d, axis=-1, keepdims=True)
    hu3 = (u3s - mu) * jax.lax.rsqrt(var + 1e-5) * vrow("gu3") + vrow("beu3")
    # gamma/beta are zero-padded beyond col 64, so hu3 cols 64: are exactly 0.

    # --- final: lane-dense bf16 [B,128] store; only cols 0:3 are meaningful ---
    out_ref[...] = (mm(hu3, w128("Wf")) + vrow("bf")).astype(out_ref.dtype)


# ------------------------------ host wrapper -------------------------------
def _choose_tile_b(b):
    if b >= 1024:
        return 512
    if b >= 256:
        return 256
    if b > 64:
        return 64          # >=2 grid steps so both v7x TensorCores get work
    return max(8, ((b + 7) // 8) * 8)


def _pad_rows_to(a, rows, dtype):
    a = a.astype(dtype)
    if a.shape[0] == rows:
        return a
    return jnp.zeros((rows,) + a.shape[1:], dtype).at[:a.shape[0]].set(a)


def conditional_ddpm_forward(x, t, y, packed, emb_table, null_emb):
    """x: [B, n_dim] f32, t: [B] f32 timesteps, y: [B] i32 labels (-1 = null)."""
    wp128, wp256, vec = packed
    b = x.shape[0]

    # --- glue: normalized sinusoidal positional embedding of t ---
    half = TIME_EMB_DIM // 2
    scale = math.log(10000.0) / (half - 1)
    freqs = jnp.exp(jnp.arange(half, dtype=jnp.float32) * -scale)
    args = t[:, None] * freqs[None, :]
    tsin = jnp.concatenate([jnp.sin(args), jnp.cos(args)], axis=-1)
    tsin = tsin / jnp.linalg.norm(tsin, axis=-1, keepdims=True)

    # --- glue: class embedding with null embedding for y == -1 ---
    mask = (y == -1)
    y_safe = jnp.where(mask, 0, y)
    yemb = jnp.where(mask[:, None], null_emb, emb_table[y_safe])

    # --- batch tiling; x stays narrow [bp,3] f32, tsin/yemb go in as bf16 ---
    tile_b = _choose_tile_b(b)
    bp = ((b + tile_b - 1) // tile_b) * tile_b
    xpad = _pad_rows_to(x, bp, jnp.float32)
    tsinp = _pad_rows_to(tsin, bp, jnp.bfloat16)
    yembp = _pad_rows_to(yemb, bp, jnp.bfloat16)

    cost = pl.CostEstimate(
        flops=int(2 * bp * _MACS_PER_ROW),
        transcendentals=int(bp * 1300),
        bytes_accessed=int(wp128.size * 2 + wp256.size * 2 + vec.size * 4
                           + bp * (N_DIM * 4 + 3 * TIME_EMB_DIM * 2)),
    )

    grid = (bp // tile_b,)
    out = pl.pallas_call(
        unet_kernel,
        out_shape=jax.ShapeDtypeStruct((bp, 128), jnp.bfloat16),
        grid=grid,
        in_specs=[
            pl.BlockSpec((tile_b, N_DIM), lambda i: (i, 0)),
            pl.BlockSpec((tile_b, TIME_EMB_DIM), lambda i: (i, 0)),
            pl.BlockSpec((tile_b, TIME_EMB_DIM), lambda i: (i, 0)),
            pl.BlockSpec((TIME_EMB_DIM, WP128_TOTAL), lambda i: (0, 0)),
            pl.BlockSpec((256, WP256_TOTAL), lambda i: (0, 0)),
            pl.BlockSpec((1, VEC_TOTAL), lambda i: (0, 0)),
        ],
        out_specs=pl.BlockSpec((tile_b, 128), lambda i: (i, 0)),
        compiler_params=pltpu.CompilerParams(dimension_semantics=("parallel",)),
        cost_estimate=cost,
    )(xpad, tsinp, yembp, wp128, wp256, vec)
    return out[:b, :N_DIM].astype(jnp.float32), tsin, yemb


# --------------------------- parameter construction -------------------------
def make_params(key):
    """Raw per-layer parameters (torch-equivalent), used for the JAX reference."""
    params = {}
    keys = jax.random.split(key, 2 * len(LIN_SHAPES) + 2)
    ki = 0
    for name, (fi, fo) in LIN_SHAPES.items():
        params["W" + name] = (jax.random.normal(keys[ki], (fi, fo), jnp.float32)
                              / math.sqrt(fi))
        params["b" + name] = (jax.random.normal(keys[ki + 1], (1, fo), jnp.float32)
                              * 0.01)
        ki += 2
    for name, d in LN_SHAPES.items():
        params["g" + name] = jnp.ones((1, d), jnp.float32)
        params["be" + name] = jnp.zeros((1, d), jnp.float32)
    emb_table = jax.random.normal(keys[ki], (N_CLASSES, TIME_EMB_DIM), jnp.float32)
    null_emb = jnp.zeros((1, TIME_EMB_DIM), jnp.float32)   # torch init: zeros
    return params, emb_table, null_emb


def _pad_cols(a, width):
    return jnp.pad(a, ((0, 0), (0, width - a.shape[1])))


def _pad_rows(a, rows):
    return jnp.pad(a, ((0, rows - a.shape[0]), (0, 0)))


def _fused_proj(raw, prefix):
    """Concatenate the 6 {time,class}-projection weights along the output dim."""
    W = jnp.zeros((TIME_EMB_DIM, PROJ_TOTAL), jnp.float32)
    b = jnp.zeros((1, PROJ_TOTAL), jnp.float32)
    for seg, _w in PROJ_SEGS:
        off, _ = PROJ_OFF[seg]
        lw = raw["W" + prefix + _PROJ_TO_LAYER[seg]]
        lb = raw["b" + prefix + _PROJ_TO_LAYER[seg]]
        W = W.at[:, off:off + lw.shape[1]].set(lw)
        b = b.at[:, off:off + lb.shape[1]].set(lb)
    return W, b


def pack_params(raw):
    """Pack all layer parameters into 3 kernel inputs (2 bf16 slabs + 1 f32 row)."""
    Wtp, btp = _fused_proj(raw, "tp")
    Wcp, bcp = _fused_proj(raw, "cp")
    Wproj = jnp.concatenate([Wtp, Wcp], axis=0)          # [256, 1024]

    wp128_blocks = {
        "Wt1": raw["Wt1"],
        "Wt2": raw["Wt2"],
        "Wd2": raw["Wd2"],
        "Wf":  _pad_cols(_pad_rows(raw["Wf"], 128), 128),
    }
    wp128 = jnp.concatenate([wp128_blocks[n] for n, _ in WP128_SEGS],
                            axis=1).astype(jnp.bfloat16)
    assert wp128.shape == (TIME_EMB_DIM, WP128_TOTAL)

    wp256_blocks = {
        "Wproj": Wproj,
        "Wbn":  raw["Wbn"],
        "Wu1a": raw["Wu1"][:256, :],
        "Wu1b": raw["Wu1"][256:, :],
        "Wrp":  raw["Wrp"],
        "Wu2":  raw["Wu2"],
        "Wu3":  _pad_cols(raw["Wu3"], 128),
    }
    wp256 = jnp.concatenate([wp256_blocks[n] for n, _ in WP256_SEGS],
                            axis=1).astype(jnp.bfloat16)
    assert wp256.shape == (256, WP256_TOTAL)

    # Zero-padding invariants the up3/final path relies on (review concern).
    assert bool(jnp.all(wp256_blocks["Wu3"][:, 64:] == 0))
    assert bool(jnp.all(wp128_blocks["Wf"][64:, :] == 0))
    assert bool(jnp.all(wp128_blocks["Wf"][:, N_DIM:] == 0))

    vecbuf = jnp.zeros((1, VEC_TOTAL), jnp.float32)

    def put(buf, name, arr):
        off, w = VEC_OFF[name]
        assert arr.shape[1] <= w
        return buf.at[:, off:off + arr.shape[1]].set(arr)

    vecbuf = put(vecbuf, "b_proj", btp + bcp)
    for n in ["bt1", "bt2", "bd1", "bd2", "bbn", "bu1", "brp", "bu2", "bu3", "bf"]:
        vecbuf = put(vecbuf, n, raw[n])
    for n in ["g1", "g2", "gbn", "gu1", "gu2", "gu3",
              "be1", "be2", "bebn", "beu1", "beu2", "beu3"]:
        vecbuf = put(vecbuf, n, raw[n])
    vecbuf = put(vecbuf, "wd1r0", raw["Wd1"][0:1, :])
    vecbuf = put(vecbuf, "wd1r1", raw["Wd1"][1:2, :])
    vecbuf = put(vecbuf, "wd1r2", raw["Wd1"][2:3, :])

    # LN gamma/beta and bias for the 64-wide up3 layer must be zero beyond col 64,
    # and the final bias beyond col 3 (they are: put() only fills the real prefix).
    g_off, _ = VEC_OFF["gu3"]
    assert bool(jnp.all(vecbuf[:, g_off + 64:g_off + 128] == 0))
    return wp128, wp256, vecbuf


# --------------------------- pure-JAX reference -----------------------------
def reference_forward(x, tsin, yemb, p):
    """Mirrors the torch module structure; matmul operands in bf16 (f32 accumulate)
    to match the kernel's precision; down1's K=3 contraction stays f32 (as in the
    kernel's VPU path)."""
    bf16 = jnp.bfloat16

    def lin(v, w, b):
        return jnp.dot(v.astype(bf16), w.astype(bf16),
                       preferred_element_type=jnp.float32) + b

    def lin32(v, w, b):
        return jnp.dot(v, w, preferred_element_type=jnp.float32) + b

    def silu(v):
        return v * jax.nn.sigmoid(v)

    def ln(v, g, b):
        mu = jnp.mean(v, axis=-1, keepdims=True)
        var = jnp.mean(jnp.square(v - mu), axis=-1, keepdims=True)
        return (v - mu) * jax.lax.rsqrt(var + 1e-5) * g + b

    t_emb = lin(silu(lin(tsin, p["Wt1"], p["bt1"])), p["Wt2"], p["bt2"])

    def tp(n):
        return lin(t_emb, p["Wtp" + n], p["btp" + n])

    def cp(n):
        return lin(yemb, p["Wcp" + n], p["bcp" + n])

    h1 = ln(silu(lin32(x + tp("1") + cp("1"), p["Wd1"], p["bd1"])), p["g1"], p["be1"])
    h2 = ln(silu(lin(h1 + tp("2") + cp("2"), p["Wd2"], p["bd2"])), p["g2"], p["be2"])
    h = ln(silu(lin(h2 + tp("b") + cp("b"), p["Wbn"], p["bbn"])), p["gbn"], p["bebn"])
    h = ln(silu(lin(jnp.concatenate([h + tp("u1") + cp("u1"), h2], axis=-1),
                    p["Wu1"], p["bu1"])), p["gu1"], p["beu1"])
    h = lin(h, p["Wrp"], p["brp"])
    h = ln(silu(lin(jnp.concatenate([h + tp("u2") + cp("u2"), h1], axis=-1),
                    p["Wu2"], p["bu2"])), p["gu2"], p["beu2"])
    h = ln(silu(lin(jnp.concatenate([h + tp("u3") + cp("u3"), h1], axis=-1),
                    p["Wu3"], p["bu3"])), p["gu3"], p["beu3"])
    return lin(h, p["Wf"], p["bf"])


# ----------------------------------- main -----------------------------------
if __name__ == "__main__":
    key = jax.random.PRNGKey(0)
    kp, kx, kt, ky = jax.random.split(key, 4)

    raw_params, emb_table, null_emb = make_params(kp)
    packed = pack_params(raw_params)

    x = jax.random.normal(kx, (BATCH, N_DIM), jnp.float32)
    t = jax.random.randint(kt, (BATCH,), 0, N_STEPS).astype(jnp.float32)
    y = jax.random.randint(ky, (BATCH,), -1, N_CLASSES)   # includes -1 (null class)

    out, tsin, yemb = conditional_ddpm_forward(x, t, y, packed, emb_table, null_emb)
    out = jax.block_until_ready(out)
    assert out.shape == (BATCH, N_DIM)

    ref = reference_forward(x, tsin, yemb, raw_params)
    max_err = float(jnp.max(jnp.abs(out - ref)))
    assert jnp.allclose(out, ref, atol=1e-2, rtol=1e-2), (
        f"mismatch vs JAX reference (max abs err {max_err})")

    print("KERNEL_OK")
</pallas_src>

<mosaic_0001>
module attributes {stable_mosaic.version = 11 : i64} {
  func.func @unet_kernel(%arg0: i32, %arg1: memref<64x3xf32, #tpu.memory_space<vmem>>, %arg2: memref<64x128xbf16, #tpu.memory_space<vmem>>, %arg3: memref<64x128xbf16, #tpu.memory_space<vmem>>, %arg4: memref<128x640xbf16, #tpu.memory_space<vmem>>, %arg5: memref<256x2176xbf16, #tpu.memory_space<vmem>>, %arg6: memref<1x5376xf32, #tpu.memory_space<vmem>>, %arg7: memref<64x128xbf16, #tpu.memory_space<vmem>>) attributes {dimension_semantics = [#tpu.dimension_semantics<parallel>], iteration_bounds = array<i64: 2>, scalar_prefetch = 0 : i64, scratch_operands = 0 : i64, tpu.core_type = #tpu.core_type<tc>, window_params = [{transform_indices = @transform_0, window_bounds = array<i64: 64, 3>}, {transform_indices = @transform_1, window_bounds = array<i64: 64, 128>}, {transform_indices = @transform_2, window_bounds = array<i64: 64, 128>}, {pipeline_mode = #tpu.pipeline_mode<synchronous>, transform_indices = @transform_3, window_bounds = array<i64: 128, 640>}, {pipeline_mode = #tpu.pipeline_mode<synchronous>, transform_indices = @transform_4, window_bounds = array<i64: 256, 2176>}, {pipeline_mode = #tpu.pipeline_mode<synchronous>, transform_indices = @transform_5, window_bounds = array<i64: 1, 5376>}, {transform_indices = @transform_6, window_bounds = array<i64: 64, 128>}]} {
    %c0 = arith.constant 0 : index
    %c0_0 = arith.constant 0 : index
    %0 = vector.load %arg1[%c0, %c0_0] : memref<64x3xf32, #tpu.memory_space<vmem>>, vector<64x3xf32>
    %c0_1 = arith.constant 0 : index
    %c0_2 = arith.constant 0 : index
    %1 = vector.load %arg2[%c0_1, %c0_2] : memref<64x128xbf16, #tpu.memory_space<vmem>>, vector<64x128xbf16>
    %c0_3 = arith.constant 0 : index
    %c0_4 = arith.constant 0 : index
    %2 = vector.load %arg3[%c0_3, %c0_4] : memref<64x128xbf16, #tpu.memory_space<vmem>>, vector<64x128xbf16>
    %c0_5 = arith.constant 0 : index
    %c0_6 = arith.constant 0 : index
    %3 = vector.load %arg4[%c0_5, %c0_6] : memref<128x640xbf16, #tpu.memory_space<vmem>>, vector<128x128xbf16>
    %cst = arith.constant dense<0.000000e+00> : vector<64x128xf32>
    %4 = tpu.matmul %1, %3, %cst {dimension_numbers = #tpu.dot_dimension_numbers<[1], [0], [0], [1], [0, 0, 1, 1], [], []>} : vector<64x128xbf16>, vector<128x128xbf16>, vector<64x128xf32> -> vector<64x128xf32>
    %c0_7 = arith.constant 0 : index
    %c1024 = arith.constant 1024 : index
    %5 = vector.load %arg6[%c0_7, %c1024] : memref<1x5376xf32, #tpu.memory_space<vmem>>, vector<1x128xf32>
    %6 = vector.broadcast %5 : vector<1x128xf32> to vector<64x128xf32>
    %7 = arith.addf %4, %6 : vector<64x128xf32>
    %8 = arith.negf %7 : vector<64x128xf32>
    %9 = math.exp %8 : vector<64x128xf32>
    %cst_8 = arith.constant 1.000000e+00 : f32
    %10 = vector.broadcast %cst_8 : f32 to vector<64x128xf32>
    %11 = arith.addf %10, %9 : vector<64x128xf32>
    %12 = arith.divf %10, %11 : vector<64x128xf32>
    %13 = arith.mulf %7, %12 : vector<64x128xf32>
    %c0_9 = arith.constant 0 : index
    %c128 = arith.constant 128 : index
    %14 = vector.load %arg4[%c0_9, %c128] : memref<128x640xbf16, #tpu.memory_space<vmem>>, vector<128x128xbf16>
    %15 = arith.truncf %13 : vector<64x128xf32> to vector<64x128xbf16>
    %cst_10 = arith.constant dense<0.000000e+00> : vector<64x128xf32>
    %16 = tpu.matmul %15, %14, %cst_10 {dimension_numbers = #tpu.dot_dimension_numbers<[1], [0], [0], [1], [0, 0, 1, 1], [], []>} : vector<64x128xbf16>, vector<128x128xbf16>, vector<64x128xf32> -> vector<64x128xf32>
    %c0_11 = arith.constant 0 : index
    %c1152 = arith.constant 1152 : index
    %17 = vector.load %arg6[%c0_11, %c1152] : memref<1x5376xf32, #tpu.memory_space<vmem>>, vector<1x128xf32>
    %18 = vector.broadcast %17 : vector<1x128xf32> to vector<64x128xf32>
    %19 = arith.addf %16, %18 : vector<64x128xf32>
    %20 = arith.truncf %19 : vector<64x128xf32> to vector<64x128xbf16>
    %21 = tpu.concatenate %20, %2 in 1 : vector<64x128xbf16>, vector<64x128xbf16> -> vector<64x256xbf16>
    %c0_12 = arith.constant 0 : index
    %c0_13 = arith.constant 0 : index
    %22 = vector.load %arg5[%c0_12, %c0_13] : memref<256x2176xbf16, #tpu.memory_space<vmem>>, vector<256x1024xbf16>
    %cst_14 = arith.constant dense<0.000000e+00> : vector<64x1024xf32>
    %23 = tpu.matmul %21, %22, %cst_14 {dimension_numbers = #tpu.dot_dimension_numbers<[1], [0], [0], [1], [0, 0, 1, 1], [], []>} : vector<64x256xbf16>, vector<256x1024xbf16>, vector<64x1024xf32> -> vector<64x1024xf32>
    %c0_15 = arith.constant 0 : index
    %c0_16 = arith.constant 0 : index
    %24 = vector.load %arg6[%c0_15, %c0_16] : memref<1x5376xf32, #tpu.memory_space<vmem>>, vector<1x1024xf32>
    %25 = vector.broadcast %24 : vector<1x1024xf32> to vector<64x1024xf32>
    %26 = arith.addf %23, %25 : vector<64x1024xf32>
    %27 = vector.extract_strided_slice %26 {offsets = [0, 0], sizes = [64, 128], strides = [1, 1]} : vector<64x1024xf32> to vector<64x128xf32>
    %c0_17 = arith.constant 0 : index
    %c1280 = arith.constant 1280 : index
    %28 = vector.load %arg6[%c0_17, %c1280] : memref<1x5376xf32, #tpu.memory_space<vmem>>, vector<1x128xf32>
    %29 = vector.extract_strided_slice %0 {offsets = [0, 0], sizes = [64, 1], strides = [1, 1]} : vector<64x3xf32> to vector<64x1xf32>
    %30 = vector.extract_strided_slice %27 {offsets = [0, 0], sizes = [64, 1], strides = [1, 1]} : vector<64x128xf32> to vector<64x1xf32>
    %31 = arith.addf %29, %30 : vector<64x1xf32>
    %c0_18 = arith.constant 0 : index
    %c4992 = arith.constant 4992 : index
    %32 = vector.load %arg6[%c0_18, %c4992] : memref<1x5376xf32, #tpu.memory_space<vmem>>, vector<1x128xf32>
    %33 = vector.broadcast %31 : vector<64x1xf32> to vector<64x128xf32>
    %34 = vector.broadcast %32 : vector<1x128xf32> to vector<64x128xf32>
    %35 = arith.mulf %33, %34 : vector<64x128xf32>
    %36 = vector.broadcast %28 : vector<1x128xf32> to vector<64x128xf32>
    %37 = arith.addf %36, %35 : vector<64x128xf32>
    %38 = vector.extract_strided_slice %0 {offsets = [0, 1], sizes = [64, 1], strides = [1, 1]} : vector<64x3xf32> to vector<64x1xf32>
    %39 = vector.extract_strided_slice %27 {offsets = [0, 1], sizes = [64, 1], strides = [1, 1]} : vector<64x128xf32> to vector<64x1xf32>
    %40 = arith.addf %38, %39 : vector<64x1xf32>
    %c0_19 = arith.constant 0 : index
    %c5120 = arith.constant 5120 : index
    %41 = vector.load %arg6[%c0_19, %c5120] : memref<1x5376xf32, #tpu.memory_space<vmem>>, vector<1x128xf32>
    %42 = vector.broadcast %40 : vector<64x1xf32> to vector<64x128xf32>
    %43 = vector.broadcast %41 : vector<1x128xf32> to vector<64x128xf32>
    %44 = arith.mulf %42, %43 : vector<64x128xf32>
    %45 = arith.addf %37, %44 : vector<64x128xf32>
    %46 = vector.extract_strided_slice %0 {offsets = [0, 2], sizes = [64, 1], strides = [1, 1]} : vector<64x3xf32> to vector<64x1xf32>
    %47 = vector.extract_strided_slice %27 {offsets = [0, 2], sizes = [64, 1], strides = [1, 1]} : vector<64x128xf32> to vector<64x1xf32>
    %48 = arith.addf %46, %47 : vector<64x1xf32>
    %c0_20 = arith.constant 0 : index
    %c5248 = arith.constant 5248 : index
    %49 = vector.load %arg6[%c0_20, %c5248] : memref<1x5376xf32, #tpu.memory_space<vmem>>, vector<1x128xf32>
    %50 = vector.broadcast %48 : vector<64x1xf32> to vector<64x128xf32>
    %51 = vector.broadcast %49 : vector<1x128xf32> to vector<64x128xf32>
    %52 = arith.mulf %50, %51 : vector<64x128xf32>
    %53 = arith.addf %45, %52 : vector<64x128xf32>
    %54 = arith.negf %53 : vector<64x128xf32>
    %55 = math.exp %54 : vector<64x128xf32>
    %cst_21 = arith.constant 1.000000e+00 : f32
    %56 = vector.broadcast %cst_21 : f32 to vector<64x128xf32>
    %57 = arith.addf %56, %55 : vector<64x128xf32>
    %58 = arith.divf %56, %57 : vector<64x128xf32>
    %59 = arith.mulf %53, %58 : vector<64x128xf32>
    %cst_22 = arith.constant dense<0.000000e+00> : vector<64xf32>
    %60 = vector.multi_reduction <add>, %59, %cst_22 [1] : vector<64x128xf32> to vector<64xf32>
    %61 = vector.shape_cast %60 : vector<64xf32> to vector<64x1xf32>
    %cst_23 = arith.constant 1.280000e+02 : f32
    %62 = vector.broadcast %cst_23 : f32 to vector<64x1xf32>
    %63 = arith.divf %61, %62 : vector<64x1xf32>
    %64 = vector.broadcast %63 : vector<64x1xf32> to vector<64x128xf32>
    %65 = arith.subf %59, %64 : vector<64x128xf32>
    %66 = arith.mulf %65, %65 : vector<64x128xf32>
    %cst_24 = arith.constant dense<0.000000e+00> : vector<64xf32>
    %67 = vector.multi_reduction <add>, %66, %cst_24 [1] : vector<64x128xf32> to vector<64xf32>
    %68 = vector.shape_cast %67 : vector<64xf32> to vector<64x1xf32>
    %cst_25 = arith.constant 1.280000e+02 : f32
    %69 = vector.broadcast %cst_25 : f32 to vector<64x1xf32>
    %70 = arith.divf %68, %69 : vector<64x1xf32>
    %cst_26 = arith.constant 9.99999974E-6 : f32
    %71 = vector.broadcast %cst_26 : f32 to vector<64x1xf32>
    %72 = arith.addf %70, %71 : vector<64x1xf32>
    %73 = math.rsqrt %72 : vector<64x1xf32>
    %74 = vector.broadcast %73 : vector<64x1xf32> to vector<64x128xf32>
    %75 = arith.mulf %65, %74 : vector<64x128xf32>
    %c0_27 = arith.constant 0 : index
    %c2688 = arith.constant 2688 : index
    %76 = vector.load %arg6[%c0_27, %c2688] : memref<1x5376xf32, #tpu.memory_space<vmem>>, vector<1x128xf32>
    %77 = vector.broadcast %76 : vector<1x128xf32> to vector<64x128xf32>
    %78 = arith.mulf %75, %77 : vector<64x128xf32>
    %c0_28 = arith.constant 0 : index
    %c3840 = arith.constant 3840 : index
    %79 = vector.load %arg6[%c0_28, %c3840] : memref<1x5376xf32, #tpu.memory_space<vmem>>, vector<1x128xf32>
    %80 = vector.broadcast %79 : vector<1x128xf32> to vector<64x128xf32>
    %81 = arith.addf %78, %80 : vector<64x128xf32>
    %82 = arith.truncf %81 : vector<64x128xf32> to vector<64x128xbf16>
    %83 = vector.extract_strided_slice %26 {offsets = [0, 128], sizes = [64, 128], strides = [1, 1]} : vector<64x1024xf32> to vector<64x128xf32>
    %84 = arith.addf %81, %83 : vector<64x128xf32>
    %c0_29 = arith.constant 0 : index
    %c256 = arith.constant 256 : index
    %85 = vector.load %arg4[%c0_29, %c256] : memref<128x640xbf16, #tpu.memory_space<vmem>>, vector<128x256xbf16>
    %86 = arith.truncf %84 : vector<64x128xf32> to vector<64x128xbf16>
    %cst_30 = arith.constant dense<0.000000e+00> : vector<64x256xf32>
    %87 = tpu.matmul %86, %85, %cst_30 {dimension_numbers = #tpu.dot_dimension_numbers<[1], [0], [0], [1], [0, 0, 1, 1], [], []>} : vector<64x128xbf16>, vector<128x256xbf16>, vector<64x256xf32> -> vector<64x256xf32>
    %c0_31 = arith.constant 0 : index
    %c1408 = arith.constant 1408 : index
    %88 = vector.load %arg6[%c0_31, %c1408] : memref<1x5376xf32, #tpu.memory_space<vmem>>, vector<1x256xf32>
    %89 = vector.broadcast %88 : vector<1x256xf32> to vector<64x256xf32>
    %90 = arith.addf %87, %89 : vector<64x256xf32>
    %91 = arith.negf %90 : vector<64x256xf32>
    %92 = math.exp %91 : vector<64x256xf32>
    %cst_32 = arith.constant 1.000000e+00 : f32
    %93 = vector.broadcast %cst_32 : f32 to vector<64x256xf32>
    %94 = arith.addf %93, %92 : vector<64x256xf32>
    %95 = arith.divf %93, %94 : vector<64x256xf32>
    %96 = arith.mulf %90, %95 : vector<64x256xf32>
    %cst_33 = arith.constant dense<0.000000e+00> : vector<64xf32>
    %97 = vector.multi_reduction <add>, %96, %cst_33 [1] : vector<64x256xf32> to vector<64xf32>
    %98 = vector.shape_cast %97 : vector<64xf32> to vector<64x1xf32>
    %cst_34 = arith.constant 2.560000e+02 : f32
    %99 = vector.broadcast %cst_34 : f32 to vector<64x1xf32>
    %100 = arith.divf %98, %99 : vector<64x1xf32>
    %101 = vector.broadcast %100 : vector<64x1xf32> to vector<64x256xf32>
    %102 = arith.subf %96, %101 : vector<64x256xf32>
    %103 = arith.mulf %102, %102 : vector<64x256xf32>
    %cst_35 = arith.constant dense<0.000000e+00> : vector<64xf32>
    %104 = vector.multi_reduction <add>, %103, %cst_35 [1] : vector<64x256xf32> to vector<64xf32>
    %105 = vector.shape_cast %104 : vector<64xf32> to vector<64x1xf32>
    %cst_36 = arith.constant 2.560000e+02 : f32
    %106 = vector.broadcast %cst_36 : f32 to vector<64x1xf32>
    %107 = arith.divf %105, %106 : vector<64x1xf32>
    %cst_37 = arith.constant 9.99999974E-6 : f32
    %108 = vector.broadcast %cst_37 : f32 to vector<64x1xf32>
    %109 = arith.addf %107, %108 : vector<64x1xf32>
    %110 = math.rsqrt %109 : vector<64x1xf32>
    %111 = vector.broadcast %110 : vector<64x1xf32> to vector<64x256xf32>
    %112 = arith.mulf %102, %111 : vector<64x256xf32>
    %c0_38 = arith.constant 0 : index
    %c2816 = arith.constant 2816 : index
    %113 = vector.load %arg6[%c0_38, %c2816] : memref<1x5376xf32, #tpu.memory_space<vmem>>, vector<1x256xf32>
    %114 = vector.broadcast %113 : vector<1x256xf32> to vector<64x256xf32>
    %115 = arith.mulf %112, %114 : vector<64x256xf32>
    %c0_39 = arith.constant 0 : index
    %c3968 = arith.constant 3968 : index
    %116 = vector.load %arg6[%c0_39, %c3968] : memref<1x5376xf32, #tpu.memory_space<vmem>>, vector<1x256xf32>
    %117 = vector.broadcast %116 : vector<1x256xf32> to vector<64x256xf32>
    %118 = arith.addf %115, %117 : vector<64x256xf32>
    %119 = vector.extract_strided_slice %26 {offsets = [0, 256], sizes = [64, 256], strides = [1, 1]} : vector<64x1024xf32> to vector<64x256xf32>
    %120 = arith.addf %118, %119 : vector<64x256xf32>
    %c0_40 = arith.constant 0 : index
    %c1024_41 = arith.constant 1024 : index
    %121 = vector.load %arg5[%c0_40, %c1024_41] : memref<256x2176xbf16, #tpu.memory_space<vmem>>, vector<256x256xbf16>
    %122 = arith.truncf %120 : vector<64x256xf32> to vector<64x256xbf16>
    %cst_42 = arith.constant dense<0.000000e+00> : vector<64x256xf32>
    %123 = tpu.matmul %122, %121, %cst_42 {dimension_numbers = #tpu.dot_dimension_numbers<[1], [0], [0], [1], [0, 0, 1, 1], [], []>} : vector<64x256xbf16>, vector<256x256xbf16>, vector<64x256xf32> -> vector<64x256xf32>
    %c0_43 = arith.constant 0 : index
    %c1664 = arith.constant 1664 : index
    %124 = vector.load %arg6[%c0_43, %c1664] : memref<1x5376xf32, #tpu.memory_space<vmem>>, vector<1x256xf32>
    %125 = vector.broadcast %124 : vector<1x256xf32> to vector<64x256xf32>
    %126 = arith.addf %123, %125 : vector<64x256xf32>
    %127 = arith.negf %126 : vector<64x256xf32>
    %128 = math.exp %127 : vector<64x256xf32>
    %cst_44 = arith.constant 1.000000e+00 : f32
    %129 = vector.broadcast %cst_44 : f32 to vector<64x256xf32>
    %130 = arith.addf %129, %128 : vector<64x256xf32>
    %131 = arith.divf %129, %130 : vector<64x256xf32>
    %132 = arith.mulf %126, %131 : vector<64x256xf32>
    %cst_45 = arith.constant dense<0.000000e+00> : vector<64xf32>
    %133 = vector.multi_reduction <add>, %132, %cst_45 [1] : vector<64x256xf32> to vector<64xf32>
    %134 = vector.shape_cast %133 : vector<64xf32> to vector<64x1xf32>
    %cst_46 = arith.constant 2.560000e+02 : f32
    %135 = vector.broadcast %cst_46 : f32 to vector<64x1xf32>
    %136 = arith.divf %134, %135 : vector<64x1xf32>
    %137 = vector.broadcast %136 : vector<64x1xf32> to vector<64x256xf32>
    %138 = arith.subf %132, %137 : vector<64x256xf32>
    %139 = arith.mulf %138, %138 : vector<64x256xf32>
    %cst_47 = arith.constant dense<0.000000e+00> : vector<64xf32>
    %140 = vector.multi_reduction <add>, %139, %cst_47 [1] : vector<64x256xf32> to vector<64xf32>
    %141 = vector.shape_cast %140 : vector<64xf32> to vector<64x1xf32>
    %cst_48 = arith.constant 2.560000e+02 : f32
    %142 = vector.broadcast %cst_48 : f32 to vector<64x1xf32>
    %143 = arith.divf %141, %142 : vector<64x1xf32>
    %cst_49 = arith.constant 9.99999974E-6 : f32
    %144 = vector.broadcast %cst_49 : f32 to vector<64x1xf32>
    %145 = arith.addf %143, %144 : vector<64x1xf32>
    %146 = math.rsqrt %145 : vector<64x1xf32>
    %147 = vector.broadcast %146 : vector<64x1xf32> to vector<64x256xf32>
    %148 = arith.mulf %138, %147 : vector<64x256xf32>
    %c0_50 = arith.constant 0 : index
    %c3072 = arith.constant 3072 : index
    %149 = vector.load %arg6[%c0_50, %c3072] : memref<1x5376xf32, #tpu.memory_space<vmem>>, vector<1x256xf32>
    %150 = vector.broadcast %149 : vector<1x256xf32> to vector<64x256xf32>
    %151 = arith.mulf %148, %150 : vector<64x256xf32>
    %c0_51 = arith.constant 0 : index
    %c4224 = arith.constant 4224 : index
    %152 = vector.load %arg6[%c0_51, %c4224] : memref<1x5376xf32, #tpu.memory_space<vmem>>, vector<1x256xf32>
    %153 = vector.broadcast %152 : vector<1x256xf32> to vector<64x256xf32>
    %154 = arith.addf %151, %153 : vector<64x256xf32>
    %155 = vector.extract_strided_slice %26 {offsets = [0, 512], sizes = [64, 256], strides = [1, 1]} : vector<64x1024xf32> to vector<64x256xf32>
    %156 = arith.addf %154, %155 : vector<64x256xf32>
    %c0_52 = arith.constant 0 : index
    %c1280_53 = arith.constant 1280 : index
    %157 = vector.load %arg5[%c0_52, %c1280_53] : memref<256x2176xbf16, #tpu.memory_space<vmem>>, vector<256x256xbf16>
    %158 = arith.truncf %156 : vector<64x256xf32> to vector<64x256xbf16>
    %cst_54 = arith.constant dense<0.000000e+00> : vector<64x256xf32>
    %159 = tpu.matmul %158, %157, %cst_54 {dimension_numbers = #tpu.dot_dimension_numbers<[1], [0], [0], [1], [0, 0, 1, 1], [], []>} : vector<64x256xbf16>, vector<256x256xbf16>, vector<64x256xf32> -> vector<64x256xf32>
    %c0_55 = arith.constant 0 : index
    %c1536 = arith.constant 1536 : index
    %160 = vector.load %arg5[%c0_55, %c1536] : memref<256x2176xbf16, #tpu.memory_space<vmem>>, vector<256x256xbf16>
    %161 = arith.truncf %118 : vector<64x256xf32> to vector<64x256xbf16>
    %cst_56 = arith.constant dense<0.000000e+00> : vector<64x256xf32>
    %162 = tpu.matmul %161, %160, %cst_56 {dimension_numbers = #tpu.dot_dimension_numbers<[1], [0], [0], [1], [0, 0, 1, 1], [], []>} : vector<64x256xbf16>, vector<256x256xbf16>, vector<64x256xf32> -> vector<64x256xf32>
    %163 = arith.addf %159, %162 : vector<64x256xf32>
    %c0_57 = arith.constant 0 : index
    %c1920 = arith.constant 1920 : index
    %164 = vector.load %arg6[%c0_57, %c1920] : memref<1x5376xf32, #tpu.memory_space<vmem>>, vector<1x256xf32>
    %165 = vector.broadcast %164 : vector<1x256xf32> to vector<64x256xf32>
    %166 = arith.addf %163, %165 : vector<64x256xf32>
    %167 = arith.negf %166 : vector<64x256xf32>
    %168 = math.exp %167 : vector<64x256xf32>
    %cst_58 = arith.constant 1.000000e+00 : f32
    %169 = vector.broadcast %cst_58 : f32 to vector<64x256xf32>
    %170 = arith.addf %169, %168 : vector<64x256xf32>
    %171 = arith.divf %169, %170 : vector<64x256xf32>
    %172 = arith.mulf %166, %171 : vector<64x256xf32>
    %cst_59 = arith.constant dense<0.000000e+00> : vector<64xf32>
    %173 = vector.multi_reduction <add>, %172, %cst_59 [1] : vector<64x256xf32> to vector<64xf32>
    %174 = vector.shape_cast %173 : vector<64xf32> to vector<64x1xf32>
    %cst_60 = arith.constant 2.560000e+02 : f32
    %175 = vector.broadcast %cst_60 : f32 to vector<64x1xf32>
    %176 = arith.divf %174, %175 : vector<64x1xf32>
    %177 = vector.broadcast %176 : vector<64x1xf32> to vector<64x256xf32>
    %178 = arith.subf %172, %177 : vector<64x256xf32>
    %179 = arith.mulf %178, %178 : vector<64x256xf32>
    %cst_61 = arith.constant dense<0.000000e+00> : vector<64xf32>
    %180 = vector.multi_reduction <add>, %179, %cst_61 [1] : vector<64x256xf32> to vector<64xf32>
    %181 = vector.shape_cast %180 : vector<64xf32> to vector<64x1xf32>
    %cst_62 = arith.constant 2.560000e+02 : f32
    %182 = vector.broadcast %cst_62 : f32 to vector<64x1xf32>
    %183 = arith.divf %181, %182 : vector<64x1xf32>
    %cst_63 = arith.constant 9.99999974E-6 : f32
    %184 = vector.broadcast %cst_63 : f32 to vector<64x1xf32>
    %185 = arith.addf %183, %184 : vector<64x1xf32>
    %186 = math.rsqrt %185 : vector<64x1xf32>
    %187 = vector.broadcast %186 : vector<64x1xf32> to vector<64x256xf32>
    %188 = arith.mulf %178, %187 : vector<64x256xf32>
    %c0_64 = arith.constant 0 : index
    %c3328 = arith.constant 3328 : index
    %189 = vector.load %arg6[%c0_64, %c3328] : memref<1x5376xf32, #tpu.memory_space<vmem>>, vector<1x256xf32>
    %190 = vector.broadcast %189 : vector<1x256xf32> to vector<64x256xf32>
    %191 = arith.mulf %188, %190 : vector<64x256xf32>
    %c0_65 = arith.constant 0 : index
    %c4480 = arith.constant 4480 : index
    %192 = vector.load %arg6[%c0_65, %c4480] : memref<1x5376xf32, #tpu.memory_space<vmem>>, vector<1x256xf32>
    %193 = vector.broadcast %192 : vector<1x256xf32> to vector<64x256xf32>
    %194 = arith.addf %191, %193 : vector<64x256xf32>
    %c0_66 = arith.constant 0 : index
    %c1792 = arith.constant 1792 : index
    %195 = vector.load %arg5[%c0_66, %c1792] : memref<256x2176xbf16, #tpu.memory_space<vmem>>, vector<256x128xbf16>
    %196 = arith.truncf %194 : vector<64x256xf32> to vector<64x256xbf16>
    %cst_67 = arith.constant dense<0.000000e+00> : vector<64x128xf32>
    %197 = tpu.matmul %196, %195, %cst_67 {dimension_numbers = #tpu.dot_dimension_numbers<[1], [0], [0], [1], [0, 0, 1, 1], [], []>} : vector<64x256xbf16>, vector<256x128xbf16>, vector<64x128xf32> -> vector<64x128xf32>
    %c0_68 = arith.constant 0 : index
    %c2176 = arith.constant 2176 : index
    %198 = vector.load %arg6[%c0_68, %c2176] : memref<1x5376xf32, #tpu.memory_space<vmem>>, vector<1x128xf32>
    %199 = vector.broadcast %198 : vector<1x128xf32> to vector<64x128xf32>
    %200 = arith.addf %197, %199 : vector<64x128xf32>
    %201 = vector.extract_strided_slice %26 {offsets = [0, 768], sizes = [64, 128], strides = [1, 1]} : vector<64x1024xf32> to vector<64x128xf32>
    %202 = arith.addf %200, %201 : vector<64x128xf32>
    %203 = arith.truncf %202 : vector<64x128xf32> to vector<64x128xbf16>
    %204 = tpu.concatenate %203, %82 in 1 : vector<64x128xbf16>, vector<64x128xbf16> -> vector<64x256xbf16>
    %c0_69 = arith.constant 0 : index
    %c1920_70 = arith.constant 1920 : index
    %205 = vector.load %arg5[%c0_69, %c1920_70] : memref<256x2176xbf16, #tpu.memory_space<vmem>>, vector<256x128xbf16>
    %cst_71 = arith.constant dense<0.000000e+00> : vector<64x128xf32>
    %206 = tpu.matmul %204, %205, %cst_71 {dimension_numbers = #tpu.dot_dimension_numbers<[1], [0], [0], [1], [0, 0, 1, 1], [], []>} : vector<64x256xbf16>, vector<256x128xbf16>, vector<64x128xf32> -> vector<64x128xf32>
    %c0_72 = arith.constant 0 : index
    %c2304 = arith.constant 2304 : index
    %207 = vector.load %arg6[%c0_72, %c2304] : memref<1x5376xf32, #tpu.memory_space<vmem>>, vector<1x128xf32>
    %208 = vector.broadcast %207 : vector<1x128xf32> to vector<64x128xf32>
    %209 = arith.addf %206, %208 : vector<64x128xf32>
    %210 = arith.negf %209 : vector<64x128xf32>
    %211 = math.exp %210 : vector<64x128xf32>
    %cst_73 = arith.constant 1.000000e+00 : f32
    %212 = vector.broadcast %cst_73 : f32 to vector<64x128xf32>
    %213 = arith.addf %212, %211 : vector<64x128xf32>
    %214 = arith.divf %212, %213 : vector<64x128xf32>
    %215 = arith.mulf %209, %214 : vector<64x128xf32>
    %cst_74 = arith.constant dense<0.000000e+00> : vector<64xf32>
    %216 = vector.multi_reduction <add>, %215, %cst_74 [1] : vector<64x128xf32> to vector<64xf32>
    %217 = vector.shape_cast %216 : vector<64xf32> to vector<64x1xf32>
    %cst_75 = arith.constant 1.280000e+02 : f32
    %218 = vector.broadcast %cst_75 : f32 to vector<64x1xf32>
    %219 = arith.divf %217, %218 : vector<64x1xf32>
    %220 = vector.broadcast %219 : vector<64x1xf32> to vector<64x128xf32>
    %221 = arith.subf %215, %220 : vector<64x128xf32>
    %222 = arith.mulf %221, %221 : vector<64x128xf32>
    %cst_76 = arith.constant dense<0.000000e+00> : vector<64xf32>
    %223 = vector.multi_reduction <add>, %222, %cst_76 [1] : vector<64x128xf32> to vector<64xf32>
    %224 = vector.shape_cast %223 : vector<64xf32> to vector<64x1xf32>
    %cst_77 = arith.constant 1.280000e+02 : f32
    %225 = vector.broadcast %cst_77 : f32 to vector<64x1xf32>
    %226 = arith.divf %224, %225 : vector<64x1xf32>
    %cst_78 = arith.constant 9.99999974E-6 : f32
    %227 = vector.broadcast %cst_78 : f32 to vector<64x1xf32>
    %228 = arith.addf %226, %227 : vector<64x1xf32>
    %229 = math.rsqrt %228 : vector<64x1xf32>
    %230 = vector.broadcast %229 : vector<64x1xf32> to vector<64x128xf32>
    %231 = arith.mulf %221, %230 : vector<64x128xf32>
    %c0_79 = arith.constant 0 : index
    %c3584 = arith.constant 3584 : index
    %232 = vector.load %arg6[%c0_79, %c3584] : memref<1x5376xf32, #tpu.memory_space<vmem>>, vector<1x128xf32>
    %233 = vector.broadcast %232 : vector<1x128xf32> to vector<64x128xf32>
    %234 = arith.mulf %231, %233 : vector<64x128xf32>
    %c0_80 = arith.constant 0 : index
    %c4736 = arith.constant 4736 : index
    %235 = vector.load %arg6[%c0_80, %c4736] : memref<1x5376xf32, #tpu.memory_space<vmem>>, vector<1x128xf32>
    %236 = vector.broadcast %235 : vector<1x128xf32> to vector<64x128xf32>
    %237 = arith.addf %234, %236 : vector<64x128xf32>
    %238 = vector.extract_strided_slice %26 {offsets = [0, 896], sizes = [64, 128], strides = [1, 1]} : vector<64x1024xf32> to vector<64x128xf32>
    %239 = arith.addf %237, %238 : vector<64x128xf32>
    %240 = arith.truncf %239 : vector<64x128xf32> to vector<64x128xbf16>
    %241 = tpu.concatenate %240, %82 in 1 : vector<64x128xbf16>, vector<64x128xbf16> -> vector<64x256xbf16>
    %c0_81 = arith.constant 0 : index
    %c2048 = arith.constant 2048 : index
    %242 = vector.load %arg5[%c0_81, %c2048] : memref<256x2176xbf16, #tpu.memory_space<vmem>>, vector<256x128xbf16>
    %cst_82 = arith.constant dense<0.000000e+00> : vector<64x128xf32>
    %243 = tpu.matmul %241, %242, %cst_82 {dimension_numbers = #tpu.dot_dimension_numbers<[1], [0], [0], [1], [0, 0, 1, 1], [], []>} : vector<64x256xbf16>, vector<256x128xbf16>, vector<64x128xf32> -> vector<64x128xf32>
    %c0_83 = arith.constant 0 : index
    %c2432 = arith.constant 2432 : index
    %244 = vector.load %arg6[%c0_83, %c2432] : memref<1x5376xf32, #tpu.memory_space<vmem>>, vector<1x128xf32>
    %245 = vector.broadcast %244 : vector<1x128xf32> to vector<64x128xf32>
    %246 = arith.addf %243, %245 : vector<64x128xf32>
    %247 = arith.negf %246 : vector<64x128xf32>
    %248 = math.exp %247 : vector<64x128xf32>
    %cst_84 = arith.constant 1.000000e+00 : f32
    %249 = vector.broadcast %cst_84 : f32 to vector<64x128xf32>
    %250 = arith.addf %249, %248 : vector<64x128xf32>
    %251 = arith.divf %249, %250 : vector<64x128xf32>
    %252 = arith.mulf %246, %251 : vector<64x128xf32>
    %253 = vector.extract_strided_slice %252 {offsets = [0, 0], sizes = [64, 64], strides = [1, 1]} : vector<64x128xf32> to vector<64x64xf32>
    %cst_85 = arith.constant dense<0.000000e+00> : vector<64xf32>
    %254 = vector.multi_reduction <add>, %253, %cst_85 [1] : vector<64x64xf32> to vector<64xf32>
    %255 = vector.shape_cast %254 : vector<64xf32> to vector<64x1xf32>
    %cst_86 = arith.constant 6.400000e+01 : f32
    %256 = vector.broadcast %cst_86 : f32 to vector<64x1xf32>
    %257 = arith.divf %255, %256 : vector<64x1xf32>
    %258 = vector.broadcast %257 : vector<64x1xf32> to vector<64x64xf32>
    %259 = arith.subf %253, %258 : vector<64x64xf32>
    %260 = arith.mulf %259, %259 : vector<64x64xf32>
    %cst_87 = arith.constant dense<0.000000e+00> : vector<64xf32>
    %261 = vector.multi_reduction <add>, %260, %cst_87 [1] : vector<64x64xf32> to vector<64xf32>
    %262 = vector.shape_cast %261 : vector<64xf32> to vector<64x1xf32>
    %cst_88 = arith.constant 6.400000e+01 : f32
    %263 = vector.broadcast %cst_88 : f32 to vector<64x1xf32>
    %264 = arith.divf %262, %263 : vector<64x1xf32>
    %265 = vector.broadcast %257 : vector<64x1xf32> to vector<64x128xf32>
    %266 = arith.subf %252, %265 : vector<64x128xf32>
    %cst_89 = arith.constant 9.99999974E-6 : f32
    %267 = vector.broadcast %cst_89 : f32 to vector<64x1xf32>
    %268 = arith.addf %264, %267 : vector<64x1xf32>
    %269 = math.rsqrt %268 : vector<64x1xf32>
    %270 = vector.broadcast %269 : vector<64x1xf32> to vector<64x128xf32>
    %271 = arith.mulf %266, %270 : vector<64x128xf32>
    %c0_90 = arith.constant 0 : index
    %c3712 = arith.constant 3712 : index
    %272 = vector.load %arg6[%c0_90, %c3712] : memref<1x5376xf32, #tpu.memory_space<vmem>>, vector<1x128xf32>
    %273 = vector.broadcast %272 : vector<1x128xf32> to vector<64x128xf32>
    %274 = arith.mulf %271, %273 : vector<64x128xf32>
    %c0_91 = arith.constant 0 : index
    %c4864 = arith.constant 4864 : index
    %275 = vector.load %arg6[%c0_91, %c4864] : memref<1x5376xf32, #tpu.memory_space<vmem>>, vector<1x128xf32>
    %276 = vector.broadcast %275 : vector<1x128xf32> to vector<64x128xf32>
    %277 = arith.addf %274, %276 : vector<64x128xf32>
    %c0_92 = arith.constant 0 : index
    %c512 = arith.constant 512 : index
    %278 = vector.load %arg4[%c0_92, %c512] : memref<128x640xbf16, #tpu.memory_space<vmem>>, vector<128x128xbf16>
    %279 = arith.truncf %277 : vector<64x128xf32> to vector<64x128xbf16>
    %cst_93 = arith.constant dense<0.000000e+00> : vector<64x128xf32>
    %280 = tpu.matmul %279, %278, %cst_93 {dimension_numbers = #tpu.dot_dimension_numbers<[1], [0], [0], [1], [0, 0, 1, 1], [], []>} : vector<64x128xbf16>, vector<128x128xbf16>, vector<64x128xf32> -> vector<64x128xf32>
    %c0_94 = arith.constant 0 : index
    %c2560 = arith.constant 2560 : index
    %281 = vector.load %arg6[%c0_94, %c2560] : memref<1x5376xf32, #tpu.memory_space<vmem>>, vector<1x128xf32>
    %282 = vector.broadcast %281 : vector<1x128xf32> to vector<64x128xf32>
    %283 = arith.addf %280, %282 : vector<64x128xf32>
    %284 = arith.truncf %283 : vector<64x128xf32> to vector<64x128xbf16>
    %c0_95 = arith.constant 0 : index
    %c0_96 = arith.constant 0 : index
    %285 = vector.load %arg7[%c0_95, %c0_96] : memref<64x128xbf16, #tpu.memory_space<vmem>>, vector<64x128xbf16>
    tpu.vector_store %arg7[%c0_95, %c0_96], %284 {strides = array<i32>} : memref<64x128xbf16, #tpu.memory_space<vmem>>, vector<64x128xbf16>,
    return
  }
  func.func @transform_0(%arg0: i32) -> (i32, i32) {
    %c0_i32 = arith.constant 0 : i32
    %c0_i32_0 = arith.constant 0 : i32
    return %arg0, %c0_i32 : i32, i32
  }
  func.func @transform_1(%arg0: i32) -> (i32, i32) {
    %c0_i32 = arith.constant 0 : i32
    %c0_i32_0 = arith.constant 0 : i32
    return %arg0, %c0_i32 : i32, i32
  }
  func.func @transform_2(%arg0: i32) -> (i32, i32) {
    %c0_i32 = arith.constant 0 : i32
    %c0_i32_0 = arith.constant 0 : i32
    return %arg0, %c0_i32 : i32, i32
  }
  func.func @transform_3(%arg0: i32) -> (i32, i32) {
    %c0_i32 = arith.constant 0 : i32
    %c0_i32_0 = arith.constant 0 : i32
    %c0_i32_1 = arith.constant 0 : i32
    return %c0_i32, %c0_i32_0 : i32, i32
  }
  func.func @transform_4(%arg0: i32) -> (i32, i32) {
    %c0_i32 = arith.constant 0 : i32
    %c0_i32_0 = arith.constant 0 : i32
    %c0_i32_1 = arith.constant 0 : i32
    return %c0_i32, %c0_i32_0 : i32, i32
  }
  func.func @transform_5(%arg0: i32) -> (i32, i32) {
    %c0_i32 = arith.constant 0 : i32
    %c0_i32_0 = arith.constant 0 : i32
    %c0_i32_1 = arith.constant 0 : i32
    return %c0_i32, %c0_i32_0 : i32, i32
  }
  func.func @transform_6(%arg0: i32) -> (i32, i32) {
    %c0_i32 = arith.constant 0 : i32
    %c0_i32_0 = arith.constant 0 : i32
    return %arg0, %c0_i32 : i32, i32
  }
}

</mosaic_0001>

<bundles_post_ra>
// kernel: tpu_custom_call.1
= control target key start
LH: loop header
LB: loop body
LE: loop exit
PB: predicated region body
PF: predicated region fallthrough
CT: control target
= control target key end

     0   :  { %s9146_s0 = inlined_call_operand.vmem [shape: f32[128,3], index: 0, kind: input, shape index: {}]   ;;  %s9147_s1 = inlined_call_operand.hbm [shape: bf16[128,128], index: 1, kind: input, shape index: {}]   ;;  %s9148_s2 = inlined_call_operand.hbm [shape: bf16[128,128], index: 2, kind: input, shape index: {}]   ;;  %s9149_s3 = inlined_call_operand.hbm [shape: bf16[128,640], index: 3, kind: input, shape index: {}]   ;;  %s9150_s4 = inlined_call_operand.hbm [shape: bf16[256,2176], index: 4, kind: input, shape index: {}]   ;;  %s9151_s5 = inlined_call_operand.hbm [shape: f32[1,5376], index: 5, kind: input, shape index: {}]   ;;  %s9152_s6 = inlined_call_operand.hbm [shape: bf16[128,128], index: 6, kind: output, shape index: {}]  }
   0x1   :  { %9158 = sst [smem:[#allocation28_spill]] %s9147_s1 }
   0x2   :  { %9159 = sst [smem:[#allocation29_spill]] %s9149_s3 }
   0x3   :  { %9160 = sst [smem:[#allocation30_spill]] %s9150_s4 }
   0x4   :  { %11 = vsyncpa [#allocation3], 0 }
   0x5   :  { %13 = vsyncpa [#allocation3 + $0x1], 0 }
   0x6   :  { %14 = vsyncpa [#allocation6], 0 }
   0x7   :  { %16 = vsyncpa [#allocation6 + $0x1], 0 }
   0x8   :  { %17 = vsyncpa [#allocation9], 0 }
   0x9   :  { %18 = vsyncpa [#allocation4], 0 }
   0xa   :  { %20 = vsyncpa [#allocation4 + $0x1], 0  ;;  %s7517_s21 = smov 0   ;;  %s7519_s22 = smov 0  }
   0xb   :  { %s7521_s23 = smov 0   ;;  %s7523_s24 = smov 0  }
   0xc LB: > { %s7538_s25 = sadd.s32 4294967295, %s7463_s24   ;;  %s5555_s26 = sadd.s32 4294967294, %s7463_s24   ;;  %s7463_s24 = sphi %s7523_s24, %s9205_s24   ;;  %s7459_s23 = sphi %s7521_s23, %s9204_s23   ;;  %s7455_s22 = sphi %s7519_s22, %s9203_s22   ;;  %s7451_s21 = sphi %s7517_s21, %s9202_s21  }
   0xd   : > { %p72_p0 = scmp.ne.s32.totalorder %s7455_s22, %s7451_s21  ;;  %p9153_p1 = scmp.eq.s32.totalorder %s7538_s25, 0 }
   0xe   : > { %p191_p3 = scmp.eq.s32.totalorder %s5555_s26, 1  ;;  %p5556_p5 = scmp.ge.s32.totalorder %s7463_s24, 1 }
   0xf   : > { %p7547_p4 = por %p9153_p1, %p72_p0  ;;  %p198_p7 = scmp.lt.s32.totalorder %s7463_s24, 3 }
  0x10   : > { %p7552_p6 = por %p191_p3, %p72_p0  ;;  %s7465_s30 = smov [#allocation7]  }
  0x11   : > { %s9161_s27 = scalar_select %p7547_p4, 1, 0 }
  0x12   : > { %s9162_s28 = scalar_select %p7552_p6, 1, 0 }
  0x13   : > { %p7557_p8 = pnand %p5556_p5, %p198_p7  ;;  %s210_s7 = sshll.u32 %s7465_s30, 4  ;;  %s211_s7 = int_to_ptr.vmem [resolvable:$true] %s210_s7 }
  0x14   : > { %s7466_s9 = smov [#allocation8]   ;;  %s7264_s11 = scalar_lea.vmem %s211_s7, 5120 }
  0x15   : > { %p6301_p9 = pneg %p7557_p8  ;;  %s223_s10 = sshll.u32 %s7466_s9, 4  ;;  %s224_s10 = int_to_ptr.vmem [resolvable:$true] %s223_s10 }
  0x16   : > { %p7265_p13 = scmp.ne.s32.totalorder %s211_s7, %s7264_s11  ;;  %p7272_p5 = scmp.lt.s32.totalorder %s211_s7, %s211_s7 }
  0x17   : > { %p7566_p11 = pnand %p6301_p9, %p9153_p1  ;;  %p7273_p7 = scmp.lt.s32.totalorder %s7264_s11, %s7264_s11 }
  0x19   : > { %p7255_p12 = pneg %p7566_p11  ;;  %p7274_p10 = por %p7273_p7, %p7272_p5 }
  0x1b   : > { %p7267_p0 = pnand %p7265_p13, %p7255_p12 }
  0x1d   : > { %p7268_p3 = pneg %p7267_p0 }
  0x1f   : > { %p7275_p9 = pnand %p7274_p10, %p7268_p3 }
  0x21   : > { %7278 = shalt.err (!%p7275_p9)
}
  0x22   : > { %s7467_s12 = smov 320   ;;  %s7468_s13 = smov 20  }
  0x23   : > { %s9165_s3 = sld [smem:[#allocation29_spill]]  ;;  %s7290_s16 = scalar_lea.vmem %s224_s10, 34816 }
  0x24   : > { %p7291_p1 = scmp.ne.s32.totalorder %s224_s10, %s7290_s16  ;;  %p7298_p2 = scmp.lt.s32.totalorder %s224_s10, %s224_s10 }
  0x25   : > { %p7299_p6 = scmp.lt.s32.totalorder %s7290_s16, %s7290_s16 }
  0x26   : > { %p7293_p13 = pnand %p7291_p1, %p7255_p12 }
  0x27   : > { %p7300_p5 = por %p7299_p6, %p7298_p2 }
  0x28   : > { %p7294_p0 = pneg %p7293_p13 }
  0x29   : > { %6304 = dma.hbm_to_vmem [thread:$0]  (!%p7566_p11), %s9165_s3, 5120, %s211_s7, [#allocation6], %s7467_s12, %s7467_s12, %s7468_s13  }
  0x2a   : > { %p7301_p10 = pnand %p7300_p5, %p7294_p0 }
  0x2c   : > { %7304 = shalt.err (!%p7301_p10)
}
  0x2d   : > { %s7469_s17 = smov 1088   ;;  %s7470_s18 = smov 68  }
  0x2e   : > { %s9166_s4 = sld [smem:[#allocation30_spill]]  ;;  %s7471_s26 = smov [#allocation10]  }
  0x2f   : > { %s237_s30 = sshll.u32 %s7471_s26, 4  ;;  %s7589_s7 = sadd.s32 1, %s7463_s24   ;;  %s238_s30 = int_to_ptr.vmem [resolvable:$true] %s237_s30 }
  0x30   : > { %s7316_s9 = scalar_lea.vmem %s238_s30, 672  ;;  %p7324_p3 = scmp.lt.s32.totalorder %s238_s30, %s238_s30 }
  0x31   : > { %p7317_p1 = scmp.ne.s32.totalorder %s238_s30, %s7316_s9  ;;  %p7325_p7 = scmp.lt.s32.totalorder %s7316_s9, %s7316_s9 }
  0x33   : > { %p7319_p2 = pnand %p7317_p1, %p7255_p12  ;;  %p7326_p9 = por %p7325_p7, %p7324_p3 }
  0x34   : > { %6307 = dma.hbm_to_vmem [thread:$0]  (!%p7566_p11), %s9166_s4, 34816, %s224_s10, [#allocation9], %s7469_s17, %s7469_s17, %s7470_s18  }
  0x35   : > { %p7320_p6 = pneg %p7319_p2 }
  0x37   : > { %p7327_p13 = pnand %p7326_p9, %p7320_p6 }
  0x39   : > { %7330 = shalt.err (!%p7327_p13)
}
  0x3a   : > { %6310 = dma.hbm_to_vmem [thread:$0]  (!%p7566_p11), %s9151_s5, 672, %s238_s30, [#allocation9]  }
  0x3b   : > { %s56_s12 = ssub.s32 %s7463_s24, %s7589_s7  ;;  %s59_s13 = sadd.s32 1, %s7459_s23 }
  0x3c   : > { %p57_p12 = scmp.eq.s32.totalorder %s56_s12, 0  ;;  %p66_p0 = scmp.ne.s32.totalorder %s7459_s23, %s7455_s22 }
  0x3d   : > { %p67_p5 = scmp.eq.s32.totalorder %s7463_s24, 0  ;;  %p6325_p10 = scmp.lt.s32.totalorder %s7463_s24, 2 }
  0x3e   : > { %s7607_s8 = scalar_select %p57_p12, %s7459_s23, %s59_s13  }
  0x3f   : > { %p68_p1 = por %p67_p5, %p66_p0  ;;  %p9167_p2 = scmp.eq.s32.totalorder %s7538_s25, 1 }
  0x40   : > { %s257_s15 = sand.u32 1, %s7459_s23   ;;  %s9154_s16 = sshll.u32 %s7463_s24, 9 }
  0x41   : > { %p7611_p6 = por %p9167_p2, %p66_p0  ;;  %s7617_s17 = sshll.u32 %s257_s15, 5 }
  0x42   : > { %s9169_s1 = sld [smem:[#allocation28_spill]]  ;;  %s261_s26 = scalar_lea.vmem [#allocation2], %s7617_s17 }
  0x43   : > { %s9168_s14 = scalar_select %p7611_p6, 1, 0 }
  0x44   : > { %s268_s30 = sshll.u32 %s261_s26, 4  ;;  %p7627_p11 = pnand %p6325_p10, %p68_p1  ;;  %s7631_s30 = int_to_ptr.vmem [resolvable:$true] %s268_s30 }
  0x45   : > { %s7633_s11 = scalar_lea.sflag [#allocation3], %s257_s15 }
  0x46   : > { %p7333_p7 = pneg %p7627_p11 }
  0x48   : > { %s7624_s20 = scalar_lea.hbm %s9169_s1, %s9154_s16  ;;  %s7336_s18 = scalar_lea.hbm %s9169_s1, 1024 }
  0x49   : > { %s7331_s10 = scalar_lea.hbm %s7624_s20, 512  ;;  %p7337_p12 = scmp.lt.s32.totalorder %s7624_s20, %s9169_s1 }
  0x4a   : > { %p7332_p3 = scmp.ne.s32.totalorder %s7624_s20, %s7331_s10  ;;  %p7338_p0 = scmp.lt.s32.totalorder %s7336_s18, %s7331_s10 }
  0x4c   : > { %p7334_p9 = pnand %p7333_p7, %p7332_p3  ;;  %p7339_p5 = por %p7338_p0, %p7337_p12 }
  0x4e   : > { %p7335_p13 = pneg %p7334_p9 }
  0x50   : > { %p7340_p10 = pnand %p7339_p5, %p7335_p13 }
  0x52   : > { %7343 = shalt.err (!%p7340_p10)
}
  0x53   : > { %s7344_s15 = scalar_lea.vmem %s7631_s30, 512  ;;  %s7472_s12 = smov [#allocation2]  }
  0x54   : > { %p7345_p1 = scmp.ne.s32.totalorder %s7631_s30, %s7344_s15  ;;  %s7349_s13 = sshll.u32 %s7472_s12, 4  ;;  %s7350_s13 = int_to_ptr.vmem [resolvable:$false] %s7349_s13 }
  0x55   : > { %s7351_s16 = scalar_lea.vmem %s7350_s13, 1024  ;;  %p7352_p9 = scmp.lt.s32.totalorder %s7631_s30, %s7350_s13 }
  0x56   : > { %p7347_p2 = pnand %p7345_p1, %p7333_p7  ;;  %p7353_p6 = scmp.lt.s32.totalorder %s7351_s16, %s7344_s15 }
  0x58   : > { %p7348_p3 = pneg %p7347_p2  ;;  %p7354_p4 = por %p7353_p6, %p7352_p9 }
  0x5a   : > { %p7355_p12 = pnand %p7354_p4, %p7348_p3 }
  0x5c   : > { %7358 = shalt.err (!%p7355_p12)
}
  0x5d   : > { %s7473_s10 = smov 64   ;;  %s7474_s18 = smov 4  }
  0x5e   : > { %6314 = dma.hbm_to_vmem [thread:$0]  (!%p7627_p11), %s7624_s20, 512, %s7631_s30, %s7633_s11, %s7473_s10, %s7473_s10, %s7474_s18  }
  0x5f   : > { %s9171_s19 = sshll.u32 %s7463_s24, 9  ;;  %s282_s12 = scalar_lea.vmem [#allocation5], %s7617_s17 }
  0x60   : > { %s7668_s15 = scalar_lea.hbm %s9148_s2, %s9171_s19  ;;  %s289_s13 = sshll.u32 %s282_s12, 4  ;;  %s7672_s13 = int_to_ptr.vmem [resolvable:$true] %s289_s13 }
  0x61   : > { %s278_s1 = sand.u32 1, %s7463_s24   ;;  %s7359_s4 = scalar_lea.hbm %s7668_s15, 512 }
  0x62   : > { %s279_s3 = scalar_lea.sflag [#allocation6], %s278_s1  ;;  %p7360_p4 = scmp.ne.s32.totalorder %s7668_s15, %s7359_s4 }
  0x63   : > { %s7364_s11 = scalar_lea.hbm %s9148_s2, 1024  ;;  %p7365_p0 = scmp.lt.s32.totalorder %s7668_s15, %s9148_s2 }
  0x64   : > { %p7362_p6 = pnand %p7360_p4, %p7333_p7  ;;  %p7366_p5 = scmp.lt.s32.totalorder %s7364_s11, %s7359_s4 }
  0x66   : > { %p7363_p13 = pneg %p7362_p6  ;;  %p7367_p10 = por %p7366_p5, %p7365_p0 }
  0x68   : > { %p7368_p1 = pnand %p7367_p10, %p7363_p13 }
  0x6a   : > { %7371 = shalt.err (!%p7368_p1)
}
  0x6b   : > { %s7372_s1 = scalar_lea.vmem %s7672_s13, 512  ;;  %s7475_s17 = smov [#allocation5]  }
  0x6c   : > { %p7373_p2 = scmp.ne.s32.totalorder %s7672_s13, %s7372_s1  ;;  %s7377_s26 = sshll.u32 %s7475_s17, 4  ;;  %s7378_s26 = int_to_ptr.vmem [resolvable:$false] %s7377_s26 }
  0x6d   : > { %s7379_s12 = scalar_lea.vmem %s7378_s26, 1024  ;;  %p7380_p12 = scmp.lt.s32.totalorder %s7672_s13, %s7378_s26 }
  0x6e   : > { %p7375_p3 = pnand %p7373_p2, %p7333_p7  ;;  %p7381_p4 = scmp.lt.s32.totalorder %s7379_s12, %s7372_s1 }
  0x70   : > { %p7376_p9 = pneg %p7375_p3  ;;  %p7382_p6 = por %p7381_p4, %p7380_p12 }
  0x72   : > { %p7383_p0 = pnand %p7382_p6, %p7376_p9 }
  0x74   : > { %7386 = shalt.err (!%p7383_p0)
}
  0x75   : > { %6317 = dma.hbm_to_vmem [thread:$0]  (!%p7627_p11), %s7668_s15, 512, %s7672_s13, %s279_s3, %s7473_s10, %s7473_s10, %s7474_s18  }
  0x76   : > { %301 = sbr.rel (%p7557_p8) target bundleno = 4513 (0x11a1), region = 44 }
  0x7b   : > { %s7702_s4 = sand.u32 1, %s7455_s22   ;;  %p9172_p7 = scmp.ne.s32.totalorder %s9161_s27, 0 }
  0x7c   : > { %s7705_s20 = sshll.u32 %s7702_s4, 5  ;;  %s304_s30 = scalar_lea.sflag [#allocation3], %s7702_s4 }
  0x7d   : > { %s7709_s9 = scalar_lea.vmem [#allocation2], %s7705_s20 }
  0x7e   : > { %7430 = dma.done.wait (%p9172_p7), %s304_s30, 512  }
  0x7f   : > { %7432 = vsyncadd (%p9172_p7), %s304_s30, 4294966784  ;;  %s312_s3 = sand.u32 1, %s7538_s25   ;;  %s7717_s10 = scalar_lea.vmem [#allocation5], %s7705_s20 }
  0x80   : > { %s313_s29 = scalar_lea.sflag [#allocation6], %s312_s3 }
  0x81   : > { %7434 = dma.done.wait (%p9172_p7), %s313_s29, 512  }
  0x82   : > { %7436 = vsyncadd (%p9172_p7), %s313_s29, 4294966784  ;;  %p9173_p8 = scmp.eq.s32.totalorder %s7538_s25, 0 }
  0x84   : > { %7438 = dma.done.wait (%p9173_p8), [#allocation6], 5120   ;;  %p9174_p11 = pmov %p9173_p8 }
  0x85   : > { %p9175_p13 = pmov %p9173_p8 }
  0x86   : > { %7440 = vsyncadd (%p9174_p11), [#allocation6], 4294962176 }
  0x87   : > { %7442 = dma.done.wait (%p9175_p13), [#allocation9], 35488   ;;  %p9176_p5 = pmov %p9173_p8 }
  0x88   : > { %v6395_v0 = vld [vmem:[#allocation7 + $0x118] ss:$20 sps:$4 sm:$0xff]   ;;  %v6396_v1 = vld [vmem:[#allocation7 + $0xf0] ss:$20 sps:$4 sm:$0xff]   ;;  %v6397_v2 = vld [vmem:[#allocation7 + $0xc8] ss:$20 sps:$4 sm:$0xff]  }
  0x89   : > { %7444 = vsyncadd (%p9176_p5), [#allocation9], 4294931808  ;;  %6195 = vmatprep.subr.bf16.mxu0 %v6395_v0  ;;  %v6398_v3 = vld [vmem:[#allocation7 + $0xa0] ss:$20 sps:$4 sm:$0xff]   ;;  %v6399_v5 = vld [vmem:[#allocation7 + $0x78] ss:$20 sps:$4 sm:$0xff]  }
  0x8a   : > { %6196 = vmatpush3.bf16.msra.mxu0 %v6395_v0  ;;  %v6403_v4 = vld [vmem:[%s7709_s9] sm:$0xff]   ;;  %v6401_v7 = vld [vmem:[#allocation7 + $0x28] ss:$20 sps:$4 sm:$0xff]   ;;  %v6405_v10 = vld [vmem:[%s7709_s9 + $0x10] sm:$0xff]   ;;  %s5574_s27 = sshll.u32 %s7538_s25, 3  ;;  %vm5089_vm0 = vcmask 523264  }
  0x8b   : > { %6197 = vmatprep.subr.bf16.mxu0 %v6396_v1  ;;  %6211 = vmatprep.mubr.bf16.mxu0 %v6403_v4  ;;  %v6400_v6 = vld [vmem:[#allocation7 + $0x50] ss:$20 sps:$4 sm:$0xff]   ;;  %v6402_v8 = vld [vmem:[#allocation7] ss:$20 sps:$4 sm:$0xff]   ;;  %v6404_v9 = vld [vmem:[%s7709_s9 + $0x8] sm:$0xff]   ;;  %p368_p10 = scmp.lt.s32.totalorder %s5574_s27, 15 }
  0x8c   : > { %v6406_v11 = vld [vmem:[%s7709_s9 + $0x18] sm:$0xff]   ;;  %v6408_v13 = vld [vmem:[#allocation7 + $0xf4] ss:$20 sps:$4 sm:$0xff]   ;;  %v6409_v14 = vld [vmem:[#allocation7 + $0xcc] ss:$20 sps:$4 sm:$0xff]   ;;  %s366_s19 = scalar_lea.vmem [#allocation11], %s7705_s20 }
  0x8d   : > { %v6407_v12 = vld [vmem:[#allocation7 + $0x11c] ss:$20 sps:$4 sm:$0xff]   ;;  %v6410_v15 = vld [vmem:[#allocation7 + $0xa4] ss:$20 sps:$4 sm:$0xff]   ;;  %v6412_v17 = vld [vmem:[#allocation7 + $0x54] ss:$20 sps:$4 sm:$0xff]  }
  0x8e   : > { %6198 = vmatpush3.bf16.msra.mxu0 %v6396_v1  ;;  %6219 = vmatprep.subr.bf16.mxu1 %v6407_v12  ;;  %v6411_v16 = vld [vmem:[#allocation7 + $0x7c] ss:$20 sps:$4 sm:$0xff]   ;;  %v6413_v18 = vld [vmem:[#allocation7 + $0x2c] ss:$20 sps:$4 sm:$0xff]   ;;  %v6414_v19 = vld [vmem:[#allocation7 + $0x4] ss:$20 sps:$4 sm:$0xff]  }
  0x8f   : > { %6199 = vmatprep.subr.bf16.mxu0 %v6397_v2  ;;  %6220 = vmatpush3.bf16.msra.mxu1 %v6407_v12  ;;  %v6415_v20 = vld [vmem:[#allocation8 + $0x3b8] ss:$68 sps:$4 sm:$0xff]   ;;  %v6420_v22 = vld [vmem:[#allocation8 + $0x3c4] ss:$68 sps:$4 sm:$0xff]   ;;  %v6421_v24 = vld [vmem:[#allocation8 + $0x330] ss:$68 sps:$4 sm:$0xff]  }
  0x90   : > { %6221 = vmatprep.subr.bf16.mxu1 %v6408_v13  ;;  %v6417_v21 = vld [vmem:[#allocation8 + $0x3bc] ss:$68 sps:$4 sm:$0xff]   ;;  %v6423_v23 = vld [vmem:[#allocation8 + $0x334] ss:$68 sps:$4 sm:$0xff]   ;;  %v6429_v25 = vld [vmem:[#allocation8 + $0x2ac] ss:$68 sps:$4 sm:$0xff]  }
  0x91   : > { %v6427_v26 = vld [vmem:[#allocation8 + $0x2a8] ss:$68 sps:$4 sm:$0xff]   ;;  %v6433_v28 = vld [vmem:[#allocation8 + $0x220] ss:$68 sps:$4 sm:$0xff]   ;;  %v6439_v30 = vld [vmem:[#allocation8 + $0x198] ss:$68 sps:$4 sm:$0xff]  }
  0x92   : > { %6200 = vmatpush3.bf16.msra.mxu0 %v6397_v2  ;;  %v6435_v27 = vld [vmem:[#allocation8 + $0x224] ss:$68 sps:$4 sm:$0xff]   ;;  %v6441_v29 = vld [vmem:[#allocation8 + $0x19c] ss:$68 sps:$4 sm:$0xff]   ;;  %v6447_v31 = vld [vmem:[#allocation8 + $0x114] ss:$68 sps:$4 sm:$0xff]  }
  0x93   : > { %6201 = vmatprep.subr.bf16.mxu0 %v6398_v3  ;;  %6222 = vmatpush3.bf16.msra.mxu1 %v6408_v13  ;;  %v6445_v32 = vld [vmem:[#allocation8 + $0x110] ss:$68 sps:$4 sm:$0xff]   ;;  %v6451_v34 = vld [vmem:[#allocation8 + $0x88] ss:$68 sps:$4 sm:$0xff]   ;;  %v6457_v36 = vld [vmem:[#allocation8] ss:$68 sps:$4 sm:$0xff]  }
  0x94   : > { %6223 = vmatprep.subr.bf16.mxu1 %v6409_v14  ;;  %v6453_v33 = vld [vmem:[#allocation8 + $0x8c] ss:$68 sps:$4 sm:$0xff]   ;;  %v6459_v35 = vld [vmem:[#allocation8 + $0x4] ss:$68 sps:$4 sm:$0xff]   ;;  %v6465_v37 = vld [vmem:[#allocation8 + $0x7fc] ss:$68 sps:$4 sm:$0xff]  }
  0x95   : > { %v6463_v38 = vld [vmem:[#allocation8 + $0x7f8] ss:$68 sps:$4 sm:$0xff]   ;;  %v6469_v40 = vld [vmem:[#allocation8 + $0x770] ss:$68 sps:$4 sm:$0xff]   ;;  %v6475_v42 = vld [vmem:[#allocation8 + $0x6e8] ss:$68 sps:$4 sm:$0xff]  }
  0x96   : > { %6202 = vmatpush3.bf16.msra.mxu0 %v6398_v3  ;;  %v6471_v39 = vld [vmem:[#allocation8 + $0x774] ss:$68 sps:$4 sm:$0xff]   ;;  %v6477_v41 = vld [vmem:[#allocation8 + $0x6ec] ss:$68 sps:$4 sm:$0xff]   ;;  %v6483_v43 = vld [vmem:[#allocation8 + $0x664] ss:$68 sps:$4 sm:$0xff]  }
  0x97   : > { %6203 = vmatprep.subr.bf16.mxu0 %v6399_v5  ;;  %6224 = vmatpush3.bf16.msra.mxu1 %v6409_v14  ;;  %v6481_v44 = vld [vmem:[#allocation8 + $0x660] ss:$68 sps:$4 sm:$0xff]   ;;  %v6487_v46 = vld [vmem:[#allocation8 + $0x5d8] ss:$68 sps:$4 sm:$0xff]   ;;  %v6493_v48 = vld [vmem:[#allocation8 + $0x550] ss:$68 sps:$4 sm:$0xff]  }
  0x98   : > { %6225 = vmatprep.subr.bf16.mxu1 %v6410_v15  ;;  %v6489_v45 = vld [vmem:[#allocation8 + $0x5dc] ss:$68 sps:$4 sm:$0xff]   ;;  %v6495_v47 = vld [vmem:[#allocation8 + $0x554] ss:$68 sps:$4 sm:$0xff]   ;;  %v5576_v49 = vld [vmem:[#allocation10 + $0x8] ss:$0 sm:$0xff] }
  0x99   : > { %s9207_s27 = smov (!%p368_p10, %s5574_s27), 15  ;;  %s5419_s16 = sshll.u32 %s366_s19, 4  ;;  %s9098_s16 = int_to_ptr.vmem [resolvable:$true] %s5419_s16 }
  0x9a   : > { %6204 = vmatpush3.bf16.msra.mxu0 %v6399_v5  ;;  %s5575_s18 = sshll.u32 %s9207_s27, 3  ;;  %s6015_s1 = sshll.u32 %s7538_s25, 9 }
  0x9b   : > { %6205 = vmatprep.subr.bf16.mxu0 %v6400_v6  ;;  %6226 = vmatpush3.bf16.msra.mxu1 %v6410_v15  ;;  %s7818_s11 = scalar_lea.vmem %s9146_s0, %s5575_s18  ;;  %s9103_s12 = scalar_lea.hbm %s9152_s6, %s6015_s1 }
  0x9c   : > { %6227 = vmatprep.subr.bf16.mxu1 %v6411_v16  ;;  %s5406_s20 = scalar_lea.sflag [#allocation4], %s7702_s4  ;;  %s7387_s30 = scalar_lea.vmem %s9098_s16, 512 }
  0x9d   : > { %p7388_p1 = scmp.ne.s32.totalorder %s9098_s16, %s7387_s30  ;;  %p9199_p2 = scmp.ne.s32.totalorder %s9168_s14, 0 }
  0x9e   : > { %6206 = vmatpush3.bf16.msra.mxu0 %v6400_v6  ;;  %s7479_s25 = smov [#allocation11]  }
  0x9f   : > { %6207 = vmatprep.subr.bf16.mxu0 %v6401_v7  ;;  %6228 = vmatpush3.bf16.msra.mxu1 %v6411_v16  ;;  %p7389_p3 = pnand %p7388_p1, %p9199_p2  ;;  %s7391_s9 = sshll.u32 %s7479_s25, 4  ;;  %s7392_s9 = int_to_ptr.vmem [resolvable:$false] %s7391_s9 }
  0xa0   : > { %6229 = vmatprep.subr.bf16.mxu1 %v6412_v17  ;;  %s7393_s3 = scalar_lea.vmem %s7392_s9, 1024  ;;  %p7394_p12 = scmp.lt.s32.totalorder %s9098_s16, %s7392_s9 }
  0xa1   : > { %p7390_p9 = pneg %p7389_p3  ;;  %p7395_p4 = scmp.lt.s32.totalorder %s7393_s3, %s7387_s30 }
  0xa2   : > { %6208 = vmatpush3.bf16.msra.mxu0 %v6401_v7 }
  0xa3   : > { %6209 = vmatprep.subr.bf16.mxu0 %v6402_v8  ;;  %6230 = vmatpush3.bf16.msra.mxu1 %v6412_v17  ;;  %p7396_p6 = por %p7395_p4, %p7394_p12 }
  0xa4   : > { %6231 = vmatprep.subr.bf16.mxu1 %v6413_v18 }
  0xa5   : > { %p7397_p0 = pnand %p7396_p6, %p7390_p9 }
  0xa6   : > { %6210 = vmatpush3.bf16.msra.mxu0 %v6402_v8 }
  0xa7   : > { %6232 = vmatpush3.bf16.msra.mxu1 %v6413_v18  ;;  %1595 = vmatprep.subr.bf16.mxu0 %v6417_v21 }
  0xa8   : > { %6233 = vmatprep.subr.bf16.mxu1 %v6414_v19 }
  0xa9   : > { %6212 = vmatmul.mubr.bf16.vlgmr.msra.gmra.mxu0 %v6404_v9 }
  0xaa   : > { %6215 = vmatprep.mubr.bf16.mxu0 %v6405_v10  ;;  %1596 = vmatpush1.bf16.msra.mxu0 %v6415_v20 }
  0xab   : > { %6234 = vmatpush3.bf16.msra.mxu1 %v6414_v19  ;;  %1597 = vmatprep.subr.bf16.mxu0 %v6423_v23 }
  0xac   : > { %1668 = vmatprep.subr.bf16.mxu1 %v6420_v22 }
  0xae   : > { %1598 = vmatpush1.bf16.msra.mxu0 %v6421_v24 }
  0xaf   : > { %1599 = vmatprep.subr.bf16.mxu0 %v6429_v25 }
  0xb1   : > { %6216 = vmatmul.mubr.bf16.gmra.mxu0 %v6406_v11 }
  0xb2   : > { %1600 = vmatpush1.bf16.msra.mxu0 %v6427_v26 }
  0xb3   : > { %1601 = vmatprep.subr.bf16.mxu0 %v6435_v27 }
  0xb6   : > { %1602 = vmatpush1.bf16.msra.mxu0 %v6433_v28 }
  0xb7   : > { %1603 = vmatprep.subr.bf16.mxu0 %v6441_v29 }
  0xba   : > { %1604 = vmatpush1.bf16.msra.mxu0 %v6439_v30 }
  0xbb   : > { %1605 = vmatprep.subr.bf16.mxu0 %v6447_v31 }
  0xbe   : > { %1606 = vmatpush1.bf16.msra.mxu0 %v6445_v32 }
  0xbf   : > { %1607 = vmatprep.subr.bf16.mxu0 %v6453_v33 }
  0xc2   : > { %1608 = vmatpush1.bf16.msra.mxu0 %v6451_v34 }
  0xc3   : > { %1609 = vmatprep.subr.bf16.mxu0 %v6459_v35  ;;  %v6418_v35 = vld [vmem:[#allocation8 + $0x3c0] ss:$68 sps:$4 sm:$0xff]  }
  0xc6   : > { %1610 = vmatpush1.bf16.msra.mxu0 %v6457_v36 }
  0xc7   : > { %1611 = vmatprep.subr.bf16.mxu0 %v6465_v37  ;;  %v6426_v37 = vld [vmem:[#allocation8 + $0x33c] ss:$68 sps:$4 sm:$0xff]  }
  0xca   : > { %1612 = vmatpush2.bf16.msra.mxu0 %v6463_v38 }
  0xcb   : > { %1613 = vmatprep.subr.bf16.mxu0 %v6471_v39 }
  0xce   : > { %1614 = vmatpush2.bf16.msra.mxu0 %v6469_v40 }
  0xcf   : > { %1615 = vmatprep.subr.bf16.mxu0 %v6477_v41  ;;  %v6424_v41 = vld [vmem:[#allocation8 + $0x338] ss:$68 sps:$4 sm:$0xff]  }
  0xd2   : > { %1616 = vmatpush2.bf16.msra.mxu0 %v6475_v42 }
  0xd3   : > { %1617 = vmatprep.subr.bf16.mxu0 %v6483_v43 }
  0xd6   : > { %1618 = vmatpush2.bf16.msra.mxu0 %v6481_v44  ;;  %v6432_v44 = vld [vmem:[#allocation8 + $0x2b4] ss:$68 sps:$4 sm:$0xff]  }
  0xd7   : > { %1619 = vmatprep.subr.bf16.mxu0 %v6489_v45 }
  0xda   : > { %1620 = vmatpush2.bf16.msra.mxu0 %v6487_v46 }
  0xdb   : > { %1621 = vmatprep.subr.bf16.mxu0 %v6495_v47 }
  0xde   : > { %1622 = vmatpush2.bf16.msra.mxu0 %v6493_v48 }
 0x169   : > { %v6213_v50 = vpop.f32.mrf.mxu0 }
 0x16a   : > { %v539_v51 = vadd.f32 %v6213_v50, %v5576_v49 }
 0x16b   : > { %v530_v52 = vpop.f32.mrf.mxu0 }
 0x16c   : > { %v5591_v53 = vmul.f32 -1.442695, %v539_v51  ;;  %v531_v54 = vadd.f32 %v5576_v49, %v530_v52  ;;  %v6436_v52 = vld [vmem:[#allocation8 + $0x228] ss:$68 sps:$4 sm:$0xff]  }
 0x16d   : > { %v6214_v55 = vpop.f32.mrf.mxu0 }
 0x16e   : > { %v5589_v56 = vmul.f32 -1.442695, %v531_v54  ;;  %v542_v57 = vadd.f32 %v6214_v55, %v5576_v49  ;;  %6835 = vpow2.f32 %v5591_v53  ;;  %v6444_v53 = vld [vmem:[#allocation8 + $0x1a4] ss:$68 sps:$4 sm:$0xff]   ;;  %v6450_v55 = vld [vmem:[#allocation8 + $0x11c] ss:$68 sps:$4 sm:$0xff]  }
 0x16f   : > { %v533_v58 = vpop.f32.mrf.mxu0 }
 0x170   : > { %6837 = vpow2.f32 %v5589_v56  ;;  %v5592_v59 = vmul.f32 -1.442695, %v542_v57  ;;  %v534_v60 = vadd.f32 %v5576_v49, %v533_v58  ;;  %v6448_v56 = vld [vmem:[#allocation8 + $0x118] ss:$68 sps:$4 sm:$0xff]   ;;  %v6454_v58 = vld [vmem:[#allocation8 + $0x90] ss:$68 sps:$4 sm:$0xff]  }
 0x171   : > { %v6217_v61 = vpop.f32.mrf.mxu0 }
 0x172   : > { %6839 = vpow2.f32 %v5592_v59  ;;  %v5590_v62 = vmul.f32 -1.442695, %v534_v60  ;;  %v7735_v63 = vadd.f32 %v6217_v61, %v5576_v49  ;;  %v6462_v59 = vld [vmem:[#allocation8 + $0xc] ss:$68 sps:$4 sm:$0xff]   ;;  %v6468_v61 = vld [vmem:[#allocation8 + $0x804] ss:$68 sps:$4 sm:$0xff]  }
 0x173   : > { %v546_v0 = vpop.f32.mrf.mxu0 }
 0x174   : > { %6841 = vpow2.f32 %v5590_v62  ;;  %v5595_v1 = vmul.f32 -1.442695, %v7735_v63  ;;  %v547_v2 = vadd.f32 %v5576_v49, %v546_v0  ;;  %v6466_v62 = vld [vmem:[#allocation8 + $0x800] ss:$68 sps:$4 sm:$0xff]   ;;  %v6472_v0 = vld [vmem:[#allocation8 + $0x778] ss:$68 sps:$4 sm:$0xff]  }
 0x175   : > { %v6218_v3 = vpop.f32.mrf.mxu0 }
 0x176   : > { %v5593_v4 = vmul.f32 -1.442695, %v547_v2  ;;  %v558_v5 = vadd.f32 %v6218_v3, %v5576_v49  ;;  %6843 = vpow2.f32 %v5595_v1  ;;  %v6480_v1 = vld [vmem:[#allocation8 + $0x6f4] ss:$68 sps:$4 sm:$0xff]   ;;  %v6486_v3 = vld [vmem:[#allocation8 + $0x66c] ss:$68 sps:$4 sm:$0xff]  }
 0x177   : > { %v549_v6 = vpop.f32.mrf.mxu0 }
 0x178   : > { %6845 = vpow2.f32 %v5593_v4  ;;  %v5596_v7 = vmul.f32 -1.442695, %v558_v5  ;;  %v550_v8 = vadd.f32 %v5576_v49, %v549_v6  ;;  %v6430_v49 = vld [vmem:[#allocation8 + $0x2b0] ss:$68 sps:$4 sm:$0xff]   ;;  %v6484_v4 = vld [vmem:[#allocation8 + $0x668] ss:$68 sps:$4 sm:$0xff]  }
 0x179   : > { %v6490_v6 = vld [vmem:[#allocation8 + $0x5e0] ss:$68 sps:$4 sm:$0xff]  }
 0x17a   : > { %6847 = vpow2.f32 %v5596_v7  ;;  %v5594_v9 = vmul.f32 -1.442695, %v550_v8  ;;  %v6498_v7 = vld [vmem:[#allocation8 + $0x55c] ss:$68 sps:$4 sm:$0xff]  }
 0x17b   : > { %v6836_v10 = vpop.eup %6835 }
 0x17c   : > { %6849 = vpow2.f32 %v5594_v9  ;;  %v587_v14 = vadd.f32 1.0, %v6836_v10  ;;  %v6501_v9 = vld [vmem:[#allocation8 + $0x4cc] ss:$68 sps:$4 sm:$0xff]   ;;  %v6504_v10 = vld [vmem:[#allocation8 + $0x4d4] ss:$68 sps:$4 sm:$0xff]  }
 0x17d   : > { %v6838_v11 = vpop.eup %6837  ;;  %1623 = vmatprep.subr.bf16.mxu0 %v6501_v9  ;;  %v6560_v9 = vld [vmem:[#allocation8 + $0x18] ss:$68 sps:$4 sm:$0xff]  }
 0x17e   : > { %v585_v12 = vadd.f32 1.0, %v6838_v11  ;;  %v6499_v11 = vld [vmem:[#allocation8 + $0x4c8] ss:$68 sps:$4 sm:$0xff]  }
 0x17f   : > { %v6840_v13 = vpop.eup %6839  ;;  %1624 = vmatpush2.bf16.msra.mxu0 %v6499_v11  ;;  %v6568_v11 = vld [vmem:[#allocation8 + $0x814] ss:$68 sps:$4 sm:$0xff]  }
 0x180   : > { %v588_v15 = vadd.f32 1.0, %v6840_v13  ;;  %6851 = vrcp.f32 %v585_v12  ;;  %v6502_v12 = vld [vmem:[#allocation8 + $0x4d0] ss:$68 sps:$4 sm:$0xff]   ;;  %v6507_v13 = vld [vmem:[#allocation8 + $0x444] ss:$68 sps:$4 sm:$0xff]  }
 0x181   : > { %v6842_v16 = vpop.eup %6841  ;;  %1625 = vmatprep.subr.bf16.mxu0 %v6507_v13  ;;  %v6566_v13 = vld [vmem:[#allocation8 + $0x810] ss:$68 sps:$4 sm:$0xff]  }
 0x182   : > { %6853 = vrcp.f32 %v588_v15  ;;  %v586_v17 = vadd.f32 1.0, %v6842_v16  ;;  %v6505_v15 = vld [vmem:[#allocation8 + $0x440] ss:$68 sps:$4 sm:$0xff]   ;;  %v6508_v16 = vld [vmem:[#allocation8 + $0x448] ss:$68 sps:$4 sm:$0xff]  }
 0x183   : > { %6855 = vrcp.f32 %v587_v14  ;;  %v6844_v18 = vpop.eup %6843  ;;  %v6510_v14 = vld [vmem:[#allocation8 + $0x44c] ss:$68 sps:$4 sm:$0xff]   ;;  %1626 = vmatpush2.bf16.msra.mxu0 %v6505_v15 }
 0x184   : > { %6857 = vrcp.f32 %v586_v17  ;;  %v591_v22 = vadd.f32 1.0, %v6844_v18  ;;  %v7740_v17 = vld [vmem:[%s7717_s10] sm:$0xff]   ;;  %v6514_v18 = vld [vmem:[#allocation8 + $0x3cc] ss:$68 sps:$4 sm:$0xff]  }
 0x185   : > { %v6846_v19 = vpop.eup %6845  ;;  %1627 = vmatprep.mubr.bf16.mxu0 %v7740_v17  ;;  %1741 = vmatprep.subr.bf16.mxu0 %v6514_v18  ;;  %v6574_v15 = vld [vmem:[#allocation8 + $0x78c] ss:$68 sps:$4 sm:$0xff]  }
 0x186   : > { %v589_v20 = vadd.f32 1.0, %v6846_v19  ;;  %v6517_v19 = vld [vmem:[#allocation8 + $0x3d4] ss:$68 sps:$4 sm:$0xff]   ;;  %v6572_v18 = vld [vmem:[#allocation8 + $0x788] ss:$68 sps:$4 sm:$0xff]  }
 0x187   : > { %v6848_v21 = vpop.eup %6847 }
 0x188   : > { %v592_v23 = vadd.f32 1.0, %v6848_v21  ;;  %6859 = vrcp.f32 %v589_v20 }
 0x189   : > { %v6850_v24 = vpop.eup %6849 }
 0x18a   : > { %6861 = vrcp.f32 %v592_v23  ;;  %v590_v25 = vadd.f32 1.0, %v6850_v24  ;;  %v7744_v23 = vld [vmem:[#allocation10 + $0x9] ss:$0 sm:$0xff] }
 0x18b   : > { %6863 = vrcp.f32 %v591_v22 }
 0x18c   : > { %6865 = vrcp.f32 %v590_v25 }
 0x18d   : > { %v6852_v26 = vpop.eup %6851 }
 0x18e   : > { %v609_v31 = vmul.f32 %v6852_v26, %v531_v54  ;;  %v6442_v54 = vld [vmem:[#allocation8 + $0x1a0] ss:$68 sps:$4 sm:$0xff]  }
 0x18f   : > { %v6854_v27 = vpop.eup %6853 }
 0x190   : > { %v6856_v28 = vpop.eup %6855  ;;  %v612_v30 = vmul.f32 %v6854_v27, %v542_v57  ;;  %v6456_v57 = vld [vmem:[#allocation8 + $0x94] ss:$68 sps:$4 sm:$0xff]  }
 0x191   : > { %v6858_v29 = vpop.eup %6857  ;;  %v611_v33 = vmul.f32 %v6856_v28, %v539_v51  ;;  %v6438_v51 = vld [vmem:[#allocation8 + $0x22c] ss:$68 sps:$4 sm:$0xff]  }
 0x192   : > { %v610_v32 = vmul.f32 %v6858_v29, %v534_v60  ;;  %v6460_v60 = vld [vmem:[#allocation8 + $0x8] ss:$68 sps:$4 sm:$0xff]   ;;  %v6515_v29 = vld [vmem:[#allocation8 + $0x3d0] ss:$68 sps:$4 sm:$0xff]  }
 0x193   : > { %v634_v36 = vpack.c.bf16 %v612_v30, %v611_v33  ;;  %v6512_v28 = vld [vmem:[#allocation8 + $0x3c8] ss:$68 sps:$4 sm:$0xff]  }
 0x194   : > { %v633_v34 = vpack.c.bf16 %v610_v32, %v609_v31  ;;  %v6520_v31 = vld [vmem:[#allocation8 + $0x344] ss:$68 sps:$4 sm:$0xff]   ;;  %v6523_v32 = vld [vmem:[#allocation8 + $0x34c] ss:$68 sps:$4 sm:$0xff]  }
 0x195   : > { %v6860_v38 = vpop.eup %6859 }
 0x196   : > { %6235 = vmatprep.mubr.bf16.mxu1 %v633_v34  ;;  %v613_v45 = vmul.f32 %v6860_v38, %v547_v2  ;;  %v6478_v2 = vld [vmem:[#allocation8 + $0x6f0] ss:$68 sps:$4 sm:$0xff]   ;;  %v7753_v34 = vld [vmem:[%s7717_s10 + $0x8] sm:$0xff]   ;;  %v6527_v38 = vld [vmem:[#allocation8 + $0x2bc] ss:$68 sps:$4 sm:$0xff]  }
 0x197   : > { %v6862_v39 = vpop.eup %6861  ;;  %6236 = vmatmul.mubr.bf16.vlgmr.msra.gmra.mxu1 %v634_v36  ;;  %v6521_v36 = vld [vmem:[#allocation8 + $0x348] ss:$68 sps:$4 sm:$0xff]  }
 0x198   : > { %v6864_v40 = vpop.eup %6863  ;;  %1669 = vmatpush1.bf16.msra.mxu1 %v6418_v35  ;;  %v616_v43 = vmul.f32 %v6862_v39, %v558_v5  ;;  %v6492_v5 = vld [vmem:[#allocation8 + $0x5e4] ss:$68 sps:$4 sm:$0xff]  }
 0x199   : > { %v6866_v42 = vpop.eup %6865  ;;  %1670 = vmatprep.subr.bf16.mxu1 %v6426_v37  ;;  %v615_v47 = vmul.f32 %v6864_v40, %v7735_v63  ;;  %v6474_v63 = vld [vmem:[#allocation8 + $0x77c] ss:$68 sps:$4 sm:$0xff]   ;;  %v6530_v39 = vld [vmem:[#allocation8 + $0x2c4] ss:$68 sps:$4 sm:$0xff]  }
 0x19a   : > { %v614_v46 = vmul.f32 %v6866_v42, %v550_v8  ;;  %v6496_v8 = vld [vmem:[#allocation8 + $0x558] ss:$68 sps:$4 sm:$0xff]   ;;  %v6518_v35 = vld [vmem:[#allocation8 + $0x340] ss:$68 sps:$4 sm:$0xff]  }
 0x19b   : > { %v636_v50 = vpack.c.bf16 %v616_v43, %v615_v47  ;;  %v6525_v42 = vld [vmem:[#allocation8 + $0x2b8] ss:$68 sps:$4 sm:$0xff]   ;;  %v6528_v43 = vld [vmem:[#allocation8 + $0x2c0] ss:$68 sps:$4 sm:$0xff]  }
 0x19c   : > { %v635_v48 = vpack.c.bf16 %v614_v46, %v613_v45  ;;  %1671 = vmatpush1.bf16.msra.mxu1 %v6424_v41  ;;  %v6533_v45 = vld [vmem:[#allocation8 + $0x234] ss:$68 sps:$4 sm:$0xff]   ;;  %v6536_v46 = vld [vmem:[#allocation8 + $0x23c] ss:$68 sps:$4 sm:$0xff]  }
 0x19d   : > { %1672 = vmatprep.subr.bf16.mxu1 %v6432_v44 }
 0x19e   : > { %6239 = vmatprep.mubr.bf16.mxu1 %v635_v48  ;;  %v7764_v48 = vld [vmem:[%s7717_s10 + $0x10] sm:$0xff]  }
 0x19f   : > { %6240 = vmatmul.mubr.bf16.gmra.mxu1 %v636_v50  ;;  %v6534_v50 = vld [vmem:[#allocation8 + $0x238] ss:$68 sps:$4 sm:$0xff]  }
 0x1a0   : > { %1673 = vmatpush1.bf16.msra.mxu1 %v6430_v49  ;;  %1700 = vmatprep.mubr.bf16.mxu1 %v7740_v17  ;;  %v6531_v49 = vld [vmem:[#allocation8 + $0x230] ss:$68 sps:$4 sm:$0xff]  }
 0x1a1   : > { %1674 = vmatprep.subr.bf16.mxu1 %v6438_v51 }
 0x1a4   : > { %1675 = vmatpush1.bf16.msra.mxu1 %v6436_v52  ;;  %v6540_v52 = vld [vmem:[#allocation8 + $0x1ac] ss:$68 sps:$4 sm:$0xff]  }
 0x1a5   : > { %1676 = vmatprep.subr.bf16.mxu1 %v6444_v53  ;;  %v6543_v53 = vld [vmem:[#allocation8 + $0x1b4] ss:$68 sps:$4 sm:$0xff]  }
 0x1a8   : > { %1677 = vmatpush1.bf16.msra.mxu1 %v6442_v54 }
 0x1a9   : > { %1678 = vmatprep.subr.bf16.mxu1 %v6450_v55  ;;  %v6538_v55 = vld [vmem:[#allocation8 + $0x1a8] ss:$68 sps:$4 sm:$0xff]  }
 0x1ac   : > { %1679 = vmatpush1.bf16.msra.mxu1 %v6448_v56  ;;  %v6541_v56 = vld [vmem:[#allocation8 + $0x1b0] ss:$68 sps:$4 sm:$0xff]  }
 0x1ad   : > { %1680 = vmatprep.subr.bf16.mxu1 %v6456_v57 }
 0x1b0   : > { %1681 = vmatpush1.bf16.msra.mxu1 %v6454_v58  ;;  %v6546_v58 = vld [vmem:[#allocation8 + $0x124] ss:$68 sps:$4 sm:$0xff]  }
 0x1b1   : > { %1682 = vmatprep.subr.bf16.mxu1 %v6462_v59  ;;  %v6549_v59 = vld [vmem:[#allocation8 + $0x12c] ss:$68 sps:$4 sm:$0xff]  }
 0x1b4   : > { %1683 = vmatpush1.bf16.msra.mxu1 %v6460_v60  ;;  %v7775_v60 = vld [vmem:[%s7717_s10 + $0x18] sm:$0xff]  }
 0x1b5   : > { %1684 = vmatprep.subr.bf16.mxu1 %v6468_v61  ;;  %v6544_v61 = vld [vmem:[#allocation8 + $0x120] ss:$68 sps:$4 sm:$0xff]  }
 0x1b8   : > { %1685 = vmatpush2.bf16.msra.mxu1 %v6466_v62  ;;  %v6547_v62 = vld [vmem:[#allocation8 + $0x128] ss:$68 sps:$4 sm:$0xff]  }
 0x1b9   : > { %1686 = vmatprep.subr.bf16.mxu1 %v6474_v63 }
 0x1bc   : > { %1687 = vmatpush2.bf16.msra.mxu1 %v6472_v0  ;;  %v6553_v0 = vld [vmem:[#allocation8 + $0x9c] ss:$68 sps:$4 sm:$0xff]  }
 0x1bd   : > { %1688 = vmatprep.subr.bf16.mxu1 %v6480_v1  ;;  %v6556_v1 = vld [vmem:[#allocation8 + $0xa4] ss:$68 sps:$4 sm:$0xff]  }
 0x1c0   : > { %1689 = vmatpush2.bf16.msra.mxu1 %v6478_v2 }
 0x1c1   : > { %1690 = vmatprep.subr.bf16.mxu1 %v6486_v3  ;;  %v6551_v3 = vld [vmem:[#allocation8 + $0x98] ss:$68 sps:$4 sm:$0xff]  }
 0x1c4   : > { %1691 = vmatpush2.bf16.msra.mxu1 %v6484_v4  ;;  %v6554_v4 = vld [vmem:[#allocation8 + $0xa0] ss:$68 sps:$4 sm:$0xff]  }
 0x1c5   : > { %1692 = vmatprep.subr.bf16.mxu1 %v6492_v5 }
 0x1c8   : > { %1693 = vmatpush2.bf16.msra.mxu1 %v6490_v6  ;;  %v6559_v6 = vld [vmem:[#allocation8 + $0x14] ss:$68 sps:$4 sm:$0xff]  }
 0x1c9   : > { %1694 = vmatprep.subr.bf16.mxu1 %v6498_v7  ;;  %v6562_v7 = vld [vmem:[#allocation8 + $0x1c] ss:$68 sps:$4 sm:$0xff]  }
 0x1cc   : > { %1695 = vmatpush2.bf16.msra.mxu1 %v6496_v8  ;;  %v6557_v8 = vld [vmem:[#allocation8 + $0x10] ss:$68 sps:$4 sm:$0xff]  }
 0x1cd   : > { %1696 = vmatprep.subr.bf16.mxu1 %v6504_v10  ;;  %v6565_v10 = vld [vmem:[#allocation8 + $0x80c] ss:$68 sps:$4 sm:$0xff]  }
 0x1d0   : > { %1697 = vmatpush2.bf16.msra.mxu1 %v6502_v12  ;;  %v6563_v12 = vld [vmem:[#allocation8 + $0x808] ss:$68 sps:$4 sm:$0xff]  }
 0x1d1   : > { %1698 = vmatprep.subr.bf16.mxu1 %v6510_v14  ;;  %v6571_v14 = vld [vmem:[#allocation8 + $0x784] ss:$68 sps:$4 sm:$0xff]  }
 0x1d4   : > { %1699 = vmatpush2.bf16.msra.mxu1 %v6508_v16  ;;  %v6569_v16 = vld [vmem:[#allocation8 + $0x780] ss:$68 sps:$4 sm:$0xff]  }
 0x1d5   : > { %1814 = vmatprep.subr.bf16.mxu1 %v6517_v19  ;;  %v6577_v19 = vld [vmem:[#allocation8 + $0x6fc] ss:$68 sps:$4 sm:$0xff]  }
 0x257   : > { %v6237_v20 = vpop.f32.mrf.mxu1 }
 0x258   : > { %v735_v41 = vadd.f32 %v6237_v20, %v7744_v23  ;;  %v6580_v20 = vld [vmem:[#allocation8 + $0x704] ss:$68 sps:$4 sm:$0xff]  }
 0x259   : > { %v726_v21 = vpop.f32.mrf.mxu1 }
 0x25a   : > { %v727_v25 = vadd.f32 %v7744_v23, %v726_v21  ;;  %v6575_v21 = vld [vmem:[#allocation8 + $0x6f8] ss:$68 sps:$4 sm:$0xff]  }
 0x25b   : > { %v6238_v22 = vpop.f32.mrf.mxu1 }
 0x25c   : > { %v738_v37 = vadd.f32 %v6238_v22, %v7744_v23  ;;  %v6583_v22 = vld [vmem:[#allocation8 + $0x674] ss:$68 sps:$4 sm:$0xff]  }
 0x25d   : > { %v729_v24 = vpop.f32.mrf.mxu1 }
 0x25e   : > { %v730_v26 = vadd.f32 %v7744_v23, %v729_v24  ;;  %v7761_v44 = vpack.c.bf16 %v738_v37, %v735_v41  ;;  %v6581_v24 = vld [vmem:[#allocation8 + $0x670] ss:$68 sps:$4 sm:$0xff]   ;;  %v6604_v37 = vld [vmem:[#allocation8 + $0x4e4] ss:$68 sps:$4 sm:$0xff]   ;;  %v6610_v41 = vld [vmem:[#allocation8 + $0x45c] ss:$68 sps:$4 sm:$0xff]  }
 0x25f   : > { %v7748_v27 = vpop.f32.mrf.mxu1 }
 0x260   : > { %v7750_v30 = vpack.c.bf16 %v730_v26, %v727_v25  ;;  %v751_v2 = vadd.f32 %v7748_v27, %v7744_v23  ;;  %v6584_v25 = vld [vmem:[#allocation8 + $0x678] ss:$68 sps:$4 sm:$0xff]   ;;  %v6589_v26 = vld [vmem:[#allocation8 + $0x5ec] ss:$68 sps:$4 sm:$0xff]  }
 0x261   : > { %v742_v33 = vpop.f32.mrf.mxu1  ;;  %v6592_v27 = vld [vmem:[#allocation8 + $0x5f4] ss:$68 sps:$4 sm:$0xff]  }
 0x262   : > { %1628 = vmatmul.mubr.bf16.vlgmr.msra.gmra.mxu0 %v7750_v30  ;;  %1701 = vmatmul.mubr.bf16.vlgmr.msra.gmra.mxu1 %v7750_v30  ;;  %v743_v54 = vadd.f32 %v7744_v23, %v742_v33  ;;  %v6593_v33 = vld [vmem:[#allocation8 + $0x560] ss:$68 sps:$4 sm:$0xff]  }
 0x263   : > { %1742 = vmatpush1.bf16.msra.mxu0 %v6512_v28  ;;  %1815 = vmatpush1.bf16.msra.mxu1 %v6515_v29  ;;  %v6242_v40 = vpop.f32.mrf.mxu1  ;;  %v6587_v28 = vld [vmem:[#allocation8 + $0x5e8] ss:$68 sps:$4 sm:$0xff]   ;;  %v6590_v29 = vld [vmem:[#allocation8 + $0x5f0] ss:$68 sps:$4 sm:$0xff]  }
 0x264   : > { %1743 = vmatprep.subr.bf16.mxu0 %v6520_v31  ;;  %1816 = vmatprep.subr.bf16.mxu1 %v6523_v32  ;;  %v754_v63 = vadd.f32 %v6242_v40, %v7744_v23  ;;  %v6595_v31 = vld [vmem:[#allocation8 + $0x564] ss:$68 sps:$4 sm:$0xff]   ;;  %v6598_v32 = vld [vmem:[#allocation8 + $0x56c] ss:$68 sps:$4 sm:$0xff]   ;;  %v6607_v40 = vld [vmem:[#allocation8 + $0x454] ss:$68 sps:$4 sm:$0xff]  }
 0x265   : > { %1637 = vmatprep.mubr.bf16.mxu0 %v7753_v34  ;;  %1710 = vmatprep.mubr.bf16.mxu1 %v7753_v34  ;;  %v745_v47 = vpop.f32.mrf.mxu1 }
 0x266   : > { %v746_v51 = vadd.f32 %v7744_v23, %v745_v47  ;;  %v7784_v5 = vpack.c.bf16 %v754_v63, %v751_v2  ;;  %v6586_v23 = vld [vmem:[#allocation8 + $0x67c] ss:$68 sps:$4 sm:$0xff]  }
 0x267   : > { %1744 = vmatpush1.bf16.msra.mxu0 %v6518_v35  ;;  %1817 = vmatpush1.bf16.msra.mxu1 %v6521_v36  ;;  %v6596_v35 = vld [vmem:[#allocation8 + $0x568] ss:$68 sps:$4 sm:$0xff]   ;;  %v6601_v36 = vld [vmem:[#allocation8 + $0x4dc] ss:$68 sps:$4 sm:$0xff]  }
 0x268   : > { %1745 = vmatprep.subr.bf16.mxu0 %v6527_v38  ;;  %1818 = vmatprep.subr.bf16.mxu1 %v6530_v39  ;;  %v7772_v57 = vpack.c.bf16 %v746_v51, %v743_v54  ;;  %v6599_v38 = vld [vmem:[#allocation8 + $0x4d8] ss:$68 sps:$4 sm:$0xff]   ;;  %v6602_v39 = vld [vmem:[#allocation8 + $0x4e0] ss:$68 sps:$4 sm:$0xff]   ;;  %v378_v54 = vld [vmem:[%s7818_s11 + $0x8] sm:$0xff] }
 0x269   : > { %v7813_v47 = vld [vmem:[#allocation10] sm:$0xff] }
 0x26a   : > { %1638 = vmatmul.mubr.bf16.gmra.mxu0 %v7761_v44  ;;  %1711 = vmatmul.mubr.bf16.gmra.mxu1 %v7761_v44 }
 0x26b   : > { %1746 = vmatpush1.bf16.msra.mxu0 %v6525_v42  ;;  %1819 = vmatpush1.bf16.msra.mxu1 %v6528_v43  ;;  %v6605_v42 = vld [vmem:[#allocation8 + $0x450] ss:$68 sps:$4 sm:$0xff]   ;;  %v6608_v43 = vld [vmem:[#allocation8 + $0x458] ss:$68 sps:$4 sm:$0xff]  }
 0x26c   : > { %1747 = vmatprep.subr.bf16.mxu0 %v6533_v45  ;;  %1820 = vmatprep.subr.bf16.mxu1 %v6536_v46  ;;  %v7476_v45 = vmov 1   ;;  %v7477_v46 = vmov 0  }
 0x26d   : > { %1647 = vmatprep.mubr.bf16.mxu0 %v7764_v48  ;;  %1720 = vmatprep.mubr.bf16.mxu1 %v7764_v48 }
 0x26e   : > { %6377 = vset.pattern.permute.xlu1 %v7476_v45  ;;  %6376 = vset.pattern.permute.xlu0 %v7477_v46 }
 0x26f   : > { %1748 = vmatpush1.bf16.msra.mxu0 %v6531_v49  ;;  %1821 = vmatpush1.bf16.msra.mxu1 %v6534_v50  ;;  %v377_v49 = vld [vmem:[%s7818_s11] sm:$0xff] }
 0x270   : > { %1749 = vmatprep.subr.bf16.mxu0 %v6540_v52  ;;  %1822 = vmatprep.subr.bf16.mxu1 %v6543_v53 }
 0x272   : > { %1648 = vmatmul.mubr.bf16.gmra.mxu0 %v7772_v57  ;;  %1721 = vmatmul.mubr.bf16.gmra.mxu1 %v7772_v57 }
 0x273   : > { %1750 = vmatpush1.bf16.msra.mxu0 %v6538_v55  ;;  %1823 = vmatpush1.bf16.msra.mxu1 %v6541_v56 }
 0x274   : > { %1751 = vmatprep.subr.bf16.mxu0 %v6546_v58  ;;  %1824 = vmatprep.subr.bf16.mxu1 %v6549_v59 }
 0x275   : > { %1657 = vmatprep.mubr.bf16.mxu0 %v7775_v60  ;;  %1730 = vmatprep.mubr.bf16.mxu1 %v7775_v60 }
 0x277   : > { %1752 = vmatpush1.bf16.msra.mxu0 %v6544_v61  ;;  %1825 = vmatpush1.bf16.msra.mxu1 %v6547_v62 }
 0x278   : > { %1753 = vmatprep.subr.bf16.mxu0 %v6553_v0  ;;  %1826 = vmatprep.subr.bf16.mxu1 %v6556_v1  ;;  %v379_v0 = vld [vmem:[%s7818_s11 + $0x10] sm:$0xff] }
 0x27a   : > { %1658 = vmatmul.mubr.bf16.gmra.mxu0 %v7784_v5  ;;  %1731 = vmatmul.mubr.bf16.gmra.mxu1 %v7784_v5 }
 0x27b   : > { %1754 = vmatpush1.bf16.msra.mxu0 %v6551_v3  ;;  %1827 = vmatpush1.bf16.msra.mxu1 %v6554_v4 }
 0x27c   : > { %1755 = vmatprep.subr.bf16.mxu0 %v6559_v6  ;;  %1828 = vmatprep.subr.bf16.mxu1 %v6562_v7  ;;  %v380_v6 = vld [vmem:[%s7818_s11 + $0x18] sm:$0xff] }
 0x27d   : > { %1773 = vmatprep.mubr.bf16.mxu0 %v7740_v17  ;;  %1846 = vmatprep.mubr.bf16.mxu1 %v7740_v17  ;;  %v6578_v17 = vld [vmem:[#allocation8 + $0x700] ss:$68 sps:$4 sm:$0xff]  }
 0x27f   : > { %1756 = vmatpush1.bf16.msra.mxu0 %v6557_v8  ;;  %1829 = vmatpush1.bf16.msra.mxu1 %v6560_v9 }
 0x280   : > { %1757 = vmatprep.subr.bf16.mxu0 %v6565_v10  ;;  %1830 = vmatprep.subr.bf16.mxu1 %v6568_v11 }
 0x283   : > { %1758 = vmatpush2.bf16.msra.mxu0 %v6563_v12  ;;  %1831 = vmatpush2.bf16.msra.mxu1 %v6566_v13  ;;  %v381_v12 = vld [vmem:[%s7818_s11 + $0x20] sm:$0xff] }
 0x284   : > { %1759 = vmatprep.subr.bf16.mxu0 %v6571_v14  ;;  %1832 = vmatprep.subr.bf16.mxu1 %v6574_v15 }
 0x287   : > { %1760 = vmatpush2.bf16.msra.mxu0 %v6569_v16  ;;  %1833 = vmatpush2.bf16.msra.mxu1 %v6572_v18  ;;  %v382_v16 = vld [vmem:[%s7818_s11 + $0x28] sm:$0xff] }
 0x288   : > { %1761 = vmatprep.subr.bf16.mxu0 %v6577_v19  ;;  %1834 = vmatprep.subr.bf16.mxu1 %v6580_v20 }
 0x28b   : > { %1762 = vmatpush2.bf16.msra.mxu0 %v6575_v21  ;;  %1835 = vmatpush2.bf16.msra.mxu1 %v6578_v17  ;;  %v384_v21 = vld [vmem:[%s7818_s11 + $0x38] sm:$0xff] }
 0x28c   : > { %1763 = vmatprep.subr.bf16.mxu0 %v6583_v22  ;;  %1836 = vmatprep.subr.bf16.mxu1 %v6586_v23  ;;  %v383_v23 = vld [vmem:[%s7818_s11 + $0x30] sm:$0xff] }
 0x28f   : > { %1764 = vmatpush2.bf16.msra.mxu0 %v6581_v24  ;;  %1837 = vmatpush2.bf16.msra.mxu1 %v6584_v25  ;;  %v7871_v25 = vld [vmem:[#allocation10 + $0x27] ss:$0 sm:$0xff] }
 0x290   : > { %1765 = vmatprep.subr.bf16.mxu0 %v6589_v26  ;;  %1838 = vmatprep.subr.bf16.mxu1 %v6592_v27  ;;  %v7873_v26 = vld [vmem:[#allocation10 + $0x28] ss:$0 sm:$0xff] }
 0x293   : > { %1766 = vmatpush2.bf16.msra.mxu0 %v6587_v28  ;;  %1839 = vmatpush2.bf16.msra.mxu1 %v6590_v29  ;;  %v7875_v28 = vld [vmem:[#allocation10 + $0xa] ss:$0 sm:$0xff] }
 0x294   : > { %1767 = vmatprep.subr.bf16.mxu0 %v6595_v31  ;;  %1840 = vmatprep.subr.bf16.mxu1 %v6598_v32 }
 0x297   : > { %1768 = vmatpush2.bf16.msra.mxu0 %v6593_v33  ;;  %1841 = vmatpush2.bf16.msra.mxu1 %v6596_v35  ;;  %v7880_v35 = vld [vmem:[#allocation10 + $0x29] ss:$0 sm:$0xff] }
 0x298   : > { %1769 = vmatprep.subr.bf16.mxu0 %v6601_v36  ;;  %1842 = vmatprep.subr.bf16.mxu1 %v6604_v37 }
 0x29b   : > { %1770 = vmatpush2.bf16.msra.mxu0 %v6599_v38  ;;  %1843 = vmatpush2.bf16.msra.mxu1 %v6602_v39 }
 0x29c   : > { %1771 = vmatprep.subr.bf16.mxu0 %v6607_v40  ;;  %1844 = vmatprep.subr.bf16.mxu1 %v6610_v41 }
 0x29f   : > { %1772 = vmatpush2.bf16.msra.mxu0 %v6605_v42  ;;  %1845 = vmatpush2.bf16.msra.mxu1 %v6608_v43 }
 0x2a2   : > { %1774 = vmatmul.mubr.bf16.vlgmr.msra.gmra.mxu0 %v7750_v30  ;;  %1847 = vmatmul.mubr.bf16.vlgmr.msra.gmra.mxu1 %v7750_v30  ;;  %v915_v30 = vlaneseq }
 0x2a3   : > { %1783 = vmatprep.mubr.bf16.mxu0 %v7753_v34  ;;  %1856 = vmatprep.mubr.bf16.mxu1 %v7753_v34 }
 0x2a4   : > { %v7808_v34 = vshrl.u32 %v915_v30, 7 }
 0x2aa   : > { %1784 = vmatmul.mubr.bf16.gmra.mxu0 %v7761_v44  ;;  %1857 = vmatmul.mubr.bf16.gmra.mxu1 %v7761_v44  ;;  %v7811_v44 = vsub.s32 0, %v7808_v34 }
 0x2ab   : > { %1793 = vmatprep.mubr.bf16.mxu0 %v7764_v48  ;;  %1866 = vmatprep.mubr.bf16.mxu1 %v7764_v48 }
 0x2ac   : > { %v7822_v48 = vrot.slane %v7813_v47, %v7811_v44 }
 0x2b2   : > { %1794 = vmatmul.mubr.bf16.gmra.mxu0 %v7772_v57  ;;  %1867 = vmatmul.mubr.bf16.gmra.mxu1 %v7772_v57 }
 0x2b3   : > { %1803 = vmatprep.mubr.bf16.mxu0 %v7775_v60  ;;  %1876 = vmatprep.mubr.bf16.mxu1 %v7775_v60  ;;  %v7478_v60 = vmov 2  }
 0x2ba   : > { %1804 = vmatmul.mubr.bf16.gmra.mxu0 %v7784_v5  ;;  %1877 = vmatmul.mubr.bf16.gmra.mxu1 %v7784_v5 }
 0x2bb   : > { %2406 = vmatprep.mubr.bf16.mxu0 %v7477_v46 }
 0x322   : > { %v1629_v50 = vpop.f32.mrf.mxu0 }
 0x323   : > { %v1630_v51 = vadd.f32 %v1629_v50, %v7822_v48 }
 0x324   : > { %v7826_v52 = vpop.f32.mrf.mxu0 }
 0x325   : > { %v1888_v53 = vadd.f32 %v1630_v51, %v377_v49 }
 0x326   : > { %v1633_v55 = vpop.f32.mrf.mxu0 }
 0x327   : > { %v1634_v56 = vadd.f32 %v1633_v55, %v7822_v48  ;;  %1967 = vperm.xlu1 %6377, %v1888_v53   ;;  %1899 = vperm.xlu0 %6376, %v1888_v53  }
 0x328   : > { %v7830_v57 = vpop.f32.mrf.mxu0 }
 0x329   : > { %v1889_v58 = vadd.f32 %v1634_v56, %v378_v54 }
 0x32a   : > { %v1639_v59 = vpop.f32.mrf.mxu0 }
 0x32b   : > { %1971 = vperm.xlu1 %6377, %v1889_v58   ;;  %6378 = vset.pattern.permute.xlu0 %v7478_v60  ;;  %v1640_v63 = vadd.f32 %v1639_v59, %v7822_v48 }
 0x32c   : > { %v7833_v61 = vpop.f32.mrf.mxu0  ;;  %2022 = vperm.xlu0 %6378, %v1888_v53  }
 0x32d   : > { %v1890_v3 = vadd.f32 %v1640_v63, %v379_v0 }
 0x32e   : > { %v1643_v62 = vpop.f32.mrf.mxu0 }
 0x32f   : > { %6380 = vset.pattern.permute.xlu1 %v7478_v60  ;;  %v1644_v5 = vadd.f32 %v1643_v62, %v7822_v48 }
 0x330   : > { %v7838_v1 = vpop.f32.mrf.mxu0  ;;  %2026 = vperm.xlu1 %6380, %v1889_v58   ;;  %6379 = vset.pattern.permute.xlu0 %v7477_v46 }
 0x331   : > { %1904 = vperm.xlu0 %6379, %v1889_v58   ;;  %v1891_v9 = vadd.f32 %v1644_v5, %v380_v6 }
 0x332   : > { %v1649_v2 = vpop.f32.mrf.mxu0 }
 0x333   : > { %v1650_v10 = vadd.f32 %v1649_v2, %v7822_v48 }
 0x334   : > { %v7841_v4 = vpop.f32.mrf.mxu0  ;;  %6381 = vset.pattern.permute.xlu1 %v7477_v46 }
 0x335   : > { %1909 = vperm.xlu1 %6381, %v1890_v3   ;;  %6383 = vset.pattern.permute.xlu0 %v7478_v60  ;;  %v1892_v14 = vadd.f32 %v1650_v10, %v381_v12 }
 0x336   : > { %v1653_v7 = vpop.f32.mrf.mxu0  ;;  %2030 = vperm.xlu0 %6383, %v1890_v3  }
 0x337   : > { %v1654_v15 = vadd.f32 %v1653_v7, %v7822_v48 }
 0x338   : > { %v7847_v8 = vpop.f32.mrf.mxu0 }
 0x339   : > { %6382 = vset.pattern.permute.xlu1 %v7476_v45  ;;  %v1893_v19 = vadd.f32 %v1654_v15, %v382_v16 }
 0x33a   : > { %v1659_v11 = vpop.f32.mrf.mxu0  ;;  %1975 = vperm.xlu1 %6382, %v1890_v3   ;;  %6384 = vset.pattern.permute.xlu0 %v7477_v46 }
 0x33b   : > { %1914 = vperm.xlu0 %6384, %v1891_v9   ;;  %v1660_v22 = vadd.f32 %v1659_v11, %v7822_v48 }
 0x33c   : > { %v7853_v13 = vpop.f32.mrf.mxu0 }
 0x33d   : > { %v1894_v24 = vadd.f32 %v1660_v22, %v383_v23 }
 0x33e   : > { %1979 = vperm.xlu1 %6382, %v1891_v9   ;;  %v1663_v18 = vpop.f32.mrf.mxu0 }
 0x33f   : > { %6388 = vset.pattern.permute.xlu0 %v7478_v60  ;;  %v1664_v20 = vadd.f32 %v1663_v18, %v7822_v48 }
 0x340   : > { %2038 = vperm.xlu0 %6388, %v1892_v14  }
 0x341   : > { %v1895_v17 = vadd.f32 %v1664_v20, %v384_v21 }
 0x342   : > { %6385 = vset.pattern.permute.xlu1 %v7478_v60 }
 0x343   : > { %2034 = vperm.xlu1 %6385, %v1891_v9  }
 0x344   : > { %6389 = vset.pattern.permute.xlu0 %v7477_v46 }
 0x345   : > { %1924 = vperm.xlu0 %6389, %v1893_v19  }
 0x347   : > { %6386 = vset.pattern.permute.xlu1 %v7477_v46 }
 0x348   : > { %1919 = vperm.xlu1 %6386, %v1892_v14  }
 0x349   : > { %1934 = vperm.xlu0 %6389, %v1895_v17  }
 0x34c   : > { %6387 = vset.pattern.permute.xlu1 %v7476_v45 }
 0x34d   : > { %1983 = vperm.xlu1 %6387, %v1892_v14   ;;  %6393 = vset.pattern.permute.xlu0 %v7478_v60 }
 0x34e   : > { %2046 = vperm.xlu0 %6393, %v1894_v24  }
 0x351   : > { %1987 = vperm.xlu1 %6387, %v1893_v19  }
 0x355   : > { %6390 = vset.pattern.permute.xlu1 %v7478_v60 }
 0x356   : > { %2042 = vperm.xlu1 %6390, %v1893_v19  }
 0x35a   : > { %6391 = vset.pattern.permute.xlu1 %v7477_v46 }
 0x35b   : > { %1929 = vperm.xlu1 %6391, %v1894_v24  }
 0x35f   : > { %6392 = vset.pattern.permute.xlu1 %v7476_v45 }
 0x360   : > { %1991 = vperm.xlu1 %6392, %v1894_v24  }
 0x364   : > { %1995 = vperm.xlu1 %6392, %v1895_v17  }
 0x368   : > { %6394 = vset.pattern.permute.xlu1 %v7478_v60 }
 0x369   : > { %2050 = vperm.xlu1 %6394, %v1895_v17  }
 0x3a2   : > { %v1968_v27 = vpop.permute.xlu1 %1967  ;;  %v1900_v29 = vpop.permute.xlu0 %1899 }
 0x3a3   : > { %v1943_v31 = vmul.f32 %v7871_v25, %v1900_v29  ;;  %v2004_v32 = vmul.f32 %v7873_v26, %v1968_v27 }
 0x3a5   : > { %v1957_v33 = vadd.f32 %v7875_v28, %v1943_v31 }
 0x3a6   : > { %v1972_v36 = vpop.permute.xlu1 %1971 }
 0x3a7   : > { %v2023_v37 = vpop.permute.xlu0 %2022  ;;  %v2012_v38 = vadd.f32 %v2004_v32, %v1957_v33  ;;  %v2005_v30 = vmul.f32 %v7873_v26, %v1972_v36 }
 0x3a8   : > { %v2059_v39 = vmul.f32 %v7880_v35, %v2023_v37 }
 0x3aa   : > { %v2067_v40 = vadd.f32 %v2059_v39, %v2012_v38 }
 0x3ab   : > { %v2027_v41 = vpop.permute.xlu1 %2026 }
 0x3ac   : > { %v1905_v42 = vpop.permute.xlu0 %1904  ;;  %v5742_v43 = vmul.f32 -1.442695, %v2067_v40  ;;  %v2060_v50 = vmul.f32 %v7880_v35, %v2027_v41 }
 0x3ad   : > { %v1944_v45 = vmul.f32 %v7871_v25, %v1905_v42 }
 0x3ae   : > { %6867 = vpow2.f32 %v5742_v43 }
 0x3af   : > { %v1958_v48 = vadd.f32 %v7875_v28, %v1944_v45 }
 0x3b0   : > { %v1910_v49 = vpop.permute.xlu1 %1909 }
 0x3b1   : > { %v2031_v51 = vpop.permute.xlu0 %2030  ;;  %v2013_v53 = vadd.f32 %v2005_v30, %v1958_v48  ;;  %v1945_v54 = vmul.f32 %v7871_v25, %v1910_v49 }
 0x3b2   : > { %v2061_v0 = vmul.f32 %v7880_v35, %v2031_v51 }
 0x3b3   : > { %v2068_v55 = vadd.f32 %v2060_v50, %v2013_v53  ;;  %v1959_v59 = vadd.f32 %v7875_v28, %v1945_v54 }
 0x3b5   : > { %v1976_v56 = vpop.permute.xlu1 %1975  ;;  %v5743_v58 = vmul.f32 -1.442695, %v2068_v55 }
 0x3b6   : > { %v2006_v60 = vmul.f32 %v7873_v26, %v1976_v56  ;;  %v1915_v62 = vpop.permute.xlu0 %1914 }
 0x3b7   : > { %v1946_v63 = vmul.f32 %v7871_v25, %v1915_v62  ;;  %6869 = vpow2.f32 %v5743_v58 }
 0x3b8   : > { %v2014_v2 = vadd.f32 %v2006_v60, %v1959_v59 }
 0x3b9   : > { %v1980_v3 = vpop.permute.xlu1 %1979  ;;  %v1960_v7 = vadd.f32 %v7875_v28, %v1946_v63 }
 0x3ba   : > { %v2069_v5 = vadd.f32 %v2061_v0, %v2014_v2  ;;  %v2007_v9 = vmul.f32 %v7873_v26, %v1980_v3 }
 0x3bb   : > { %v6868_v6 = vpop.eup %6867  ;;  %v2039_v18 = vpop.permute.xlu0 %2038 }
 0x3bc   : > { %v2099_v10 = vadd.f32 1.0, %v6868_v6  ;;  %v5744_v11 = vmul.f32 -1.442695, %v2069_v5  ;;  %v2015_v14 = vadd.f32 %v2007_v9, %v1960_v7  ;;  %v2063_v32 = vmul.f32 %v7880_v35, %v2039_v18 }
 0x3be   : > { %v2035_v12 = vpop.permute.xlu1 %2034  ;;  %6871 = vrcp.f32 %v2099_v10 }
 0x3bf   : > { %v2062_v15 = vmul.f32 %v7880_v35, %v2035_v12  ;;  %6873 = vpow2.f32 %v5744_v11 }
 0x3c0   : > { %v1925_v24 = vpop.permute.xlu0 %1924 }
 0x3c1   : > { %v2070_v16 = vadd.f32 %v2062_v15, %v2015_v14  ;;  %v1948_v37 = vmul.f32 %v7871_v25, %v1925_v24 }
 0x3c3   : > { %v1920_v19 = vpop.permute.xlu1 %1919  ;;  %v5745_v20 = vmul.f32 -1.442695, %v2070_v16  ;;  %v1962_v30 = vadd.f32 %v7875_v28, %v1948_v37 }
 0x3c4   : > { %v6870_v21 = vpop.eup %6869  ;;  %v1947_v17 = vmul.f32 %v7871_v25, %v1920_v19  ;;  %v1935_v56 = vpop.permute.xlu0 %1934 }
 0x3c5   : > { %v2100_v22 = vadd.f32 1.0, %v6870_v21  ;;  %6875 = vpow2.f32 %v5745_v20  ;;  %v1950_v11 = vmul.f32 %v7871_v25, %v1935_v56 }
 0x3c6   : > { %v1961_v27 = vadd.f32 %v7875_v28, %v1947_v17 }
 0x3c7   : > { %6877 = vrcp.f32 %v2100_v22  ;;  %v1964_v21 = vadd.f32 %v7875_v28, %v1950_v11 }
 0x3c8   : > { %v1984_v23 = vpop.permute.xlu1 %1983 }
 0x3c9   : > { %v2008_v29 = vmul.f32 %v7873_v26, %v1984_v23  ;;  %v2047_v63 = vpop.permute.xlu0 %2046 }
 0x3cb   : > { %v6872_v31 = vpop.eup %6871  ;;  %v2016_v33 = vadd.f32 %v2008_v29, %v1961_v27 }
 0x3cc   : > { %v6874_v36 = vpop.eup %6873  ;;  %v1988_v38 = vpop.permute.xlu1 %1987  ;;  %v7900_v39 = vmul.f32 %v6872_v31, %v2067_v40 }
 0x3cd   : > { %v2101_v41 = vadd.f32 1.0, %v6874_v36  ;;  %v2071_v42 = vadd.f32 %v2063_v32, %v2016_v33  ;;  %v2009_v43 = vmul.f32 %v7873_v26, %v1988_v38 }
 0x3ce   : > { %2131 = vadd.xlane.f32.xlu1 %v7900_v39 }
 0x3cf   : > { %6879 = vrcp.f32 %v2101_v41  ;;  %v5746_v45 = vmul.f32 -1.442695, %v2071_v42  ;;  %v2017_v50 = vadd.f32 %v2009_v43, %v1962_v30 }
 0x3d1   : > { %v2043_v48 = vpop.permute.xlu1 %2042  ;;  %6881 = vpow2.f32 %v5746_v45 }
 0x3d2   : > { %v6876_v49 = vpop.eup %6875  ;;  %v2064_v51 = vmul.f32 %v7880_v35, %v2043_v48 }
 0x3d3   : > { %v2102_v53 = vadd.f32 1.0, %v6876_v49 }
 0x3d4   : > { %v6878_v54 = vpop.eup %6877  ;;  %v2072_v40 = vadd.f32 %v2064_v51, %v2017_v50 }
 0x3d5   : > { %v7906_v58 = vmul.f32 %v6878_v54, %v2068_v55  ;;  %6883 = vrcp.f32 %v2102_v53  ;;  %v2065_v55 = vmul.f32 %v7880_v35, %v2047_v63 }
 0x3d6   : > { %v1930_v59 = vpop.permute.xlu1 %1929  ;;  %v5747_v60 = vmul.f32 -1.442695, %v2072_v40 }
 0x3d7   : > { %2133 = vadd.xlane.f32.xlu0 %v7906_v58  ;;  %v1949_v62 = vmul.f32 %v7871_v25, %v1930_v59  ;;  %v6613_v59 = vld [vmem:[#allocation7 + $0x124] ss:$20 sps:$4 sm:$0xff]  }
 0x3d8   : > { %6885 = vpow2.f32 %v5747_v60  ;;  %v6611_v60 = vld [vmem:[#allocation7 + $0x120] ss:$20 sps:$4 sm:$0xff]   ;;  %2374 = vmatprep.subr.bf16.mxu0 %v6613_v59  ;;  %v7963_v59 = vsub.s32 1, %v7808_v34 }
 0x3d9   : > { %v1963_v3 = vadd.f32 %v7875_v28, %v1949_v62  ;;  %2375 = vmatpush1.bf16.msra.mxu0 %v6611_v60 }
 0x3db   : > { %v1992_v0 = vpop.permute.xlu1 %1991 }
 0x3dc   : > { %v6880_v2 = vpop.eup %6879  ;;  %v2010_v6 = vmul.f32 %v7873_v26, %v1992_v0 }
 0x3dd   : > { %v2125_v7 = vmul.f32 %v6880_v2, %v2069_v5  ;;  %v6614_v2 = vld [vmem:[#allocation7 + $0xf8] ss:$20 sps:$4 sm:$0xff]  }
 0x3de   : > { %v6882_v9 = vpop.eup %6881  ;;  %v2018_v10 = vadd.f32 %v2010_v6, %v1963_v3  ;;  %v6619_v6 = vld [vmem:[#allocation7 + $0xd4] ss:$20 sps:$4 sm:$0xff]  }
 0x3df   : > { %2135 = vadd.xlane.f32.xlu0 %v2125_v7  ;;  %v1996_v12 = vpop.permute.xlu1 %1995  ;;  %v2103_v14 = vadd.f32 1.0, %v6882_v9  ;;  %v6622_v9 = vld [vmem:[#allocation7 + $0xac] ss:$20 sps:$4 sm:$0xff]  }
 0x3e0   : > { %v2073_v15 = vadd.f32 %v2065_v55, %v2018_v10  ;;  %v2011_v18 = vmul.f32 %v7873_v26, %v1996_v12  ;;  %v6620_v55 = vld [vmem:[#allocation7 + $0xa8] ss:$20 sps:$4 sm:$0xff]   ;;  %v6625_v12 = vld [vmem:[#allocation7 + $0x84] ss:$20 sps:$4 sm:$0xff]  }
 0x3e1   : > { %6887 = vrcp.f32 %v2103_v14 }
 0x3e2   : > { %v6884_v19 = vpop.eup %6883  ;;  %v5748_v20 = vmul.f32 -1.442695, %v2073_v15  ;;  %v2019_v23 = vadd.f32 %v2011_v18, %v1964_v21  ;;  %v6626_v21 = vld [vmem:[#allocation7 + $0x58] ss:$20 sps:$4 sm:$0xff]  }
 0x3e3   : > { %v2126_v17 = vmul.f32 %v6884_v19, %v2070_v16  ;;  %v6628_v19 = vld [vmem:[#allocation7 + $0x5c] ss:$20 sps:$4 sm:$0xff]  }
 0x3e4   : > { %v2051_v22 = vpop.permute.xlu1 %2050  ;;  %6889 = vpow2.f32 %v5748_v20 }
 0x3e5   : > { %v6886_v5 = vpop.eup %6885  ;;  %v2066_v24 = vmul.f32 %v7880_v35, %v2051_v22  ;;  %2137 = vadd.xlane.f32.xlu1 %v2126_v17 }
 0x3e6   : > { %v2104_v25 = vadd.f32 1.0, %v6886_v5  ;;  %v6631_v5 = vld [vmem:[#allocation7 + $0x34] ss:$20 sps:$4 sm:$0xff]  }
 0x3e7   : > { %v2074_v27 = vadd.f32 %v2066_v24, %v2019_v23  ;;  %v6629_v23 = vld [vmem:[#allocation7 + $0x30] ss:$20 sps:$4 sm:$0xff]   ;;  %v6634_v24 = vld [vmem:[#allocation7 + $0xc] ss:$20 sps:$4 sm:$0xff]  }
 0x3e8   : > { %6891 = vrcp.f32 %v2104_v25 }
 0x3e9   : > { %v5749_v29 = vmul.f32 -1.442695, %v2074_v27 }
 0x3eb   : > { %6893 = vpow2.f32 %v5749_v29 }
 0x3ee   : > { %v6888_v31 = vpop.eup %6887 }
 0x3ef   : > { %v2127_v26 = vmul.f32 %v6888_v31, %v2071_v42 }
 0x3f1   : > { %v6890_v32 = vpop.eup %6889  ;;  %2139 = vadd.xlane.f32.xlu0 %v2127_v26 }
 0x3f2   : > { %v2105_v33 = vadd.f32 1.0, %v6890_v32 }
 0x3f4   : > { %6895 = vrcp.f32 %v2105_v33 }
 0x3f5   : > { %v6892_v28 = vpop.eup %6891 }
 0x3f6   : > { %v2128_v16 = vmul.f32 %v6892_v28, %v2072_v40 }
 0x3f8   : > { %v6894_v36 = vpop.eup %6893  ;;  %2141 = vadd.xlane.f32.xlu1 %v2128_v16 }
 0x3f9   : > { %v2106_v37 = vadd.f32 1.0, %v6894_v36 }
 0x3fb   : > { %6897 = vrcp.f32 %v2106_v37 }
 0x401   : > { %v6896_v38 = vpop.eup %6895 }
 0x402   : > { %v7917_v35 = vmul.f32 %v6896_v38, %v2073_v15  ;;  %v6623_v15 = vld [vmem:[#allocation7 + $0x80] ss:$20 sps:$4 sm:$0xff]  }
 0x404   : > { %2143 = vadd.xlane.f32.xlu0 %v7917_v35 }
 0x408   : > { %v6898_v41 = vpop.eup %6897 }
 0x409   : > { %v7920_v43 = vmul.f32 %v6898_v41, %v2074_v27  ;;  %v6632_v27 = vld [vmem:[#allocation7 + $0x8] ss:$20 sps:$4 sm:$0xff]  }
 0x40b   : > { %2145 = vadd.xlane.f32.xlu1 %v7920_v43 }
 0x457   : > { %v2132_v42 = vpop.xlane.xlu1 %2131 }
 0x458   : > { %v2148_v45 = vmul.f32 0.0078125, %v2132_v42 }
 0x45a   : > { %v7924_v30 = vsub.f32 %v7900_v39, %v2148_v45 }
 0x45c   : > { %v2164_v48 = vmul.f32 %v7924_v30, %v7924_v30 }
 0x45e   : > { %2172 = vadd.xlane.f32.xlu0 %v2164_v48 }
 0x460   : > { %v2134_v49 = vpop.xlane.xlu0 %2133 }
 0x461   : > { %v2149_v50 = vmul.f32 0.0078125, %v2134_v49 }
 0x463   : > { %v7929_v51 = vsub.f32 %v7906_v58, %v2149_v50  ;;  %v6616_v58 = vld [vmem:[#allocation7 + $0xfc] ss:$20 sps:$4 sm:$0xff]  }
 0x464   : > { %2376 = vmatprep.subr.bf16.mxu0 %v6616_v58  ;;  %v7966_v58 = vld [vmem:[#allocation10 + $0x1e] ss:$0 sm:$0xff] }
 0x465   : > { %v2165_v53 = vmul.f32 %v7929_v51, %v7929_v51  ;;  %2377 = vmatpush1.bf16.msra.mxu0 %v6614_v2  ;;  %v7970_v2 = vrot.slane %v7813_v47, %v7963_v59 }
 0x466   : > { %2378 = vmatprep.subr.bf16.mxu0 %v6619_v6 }
 0x467   : > { %2174 = vadd.xlane.f32.xlu1 %v2165_v53 }
 0x468   : > { %v2136_v54 = vpop.xlane.xlu0 %2135 }
 0x469   : > { %v2150_v40 = vmul.f32 0.0078125, %v2136_v54 }
 0x46b   : > { %v7933_v56 = vsub.f32 %v2125_v7, %v2150_v40  ;;  %v6617_v7 = vld [vmem:[#allocation7 + $0xd0] ss:$20 sps:$4 sm:$0xff]  }
 0x46c   : > { %2379 = vmatpush1.bf16.msra.mxu0 %v6617_v7  ;;  %v1632_v7 = vadd.f32 %v7826_v52, %v7970_v2 }
 0x46d   : > { %v2166_v39 = vmul.f32 %v7933_v56, %v7933_v56  ;;  %2380 = vmatprep.subr.bf16.mxu0 %v6622_v9  ;;  %v1636_v9 = vadd.f32 %v7830_v57, %v7970_v2 }
 0x46e   : > { %v2138_v62 = vpop.xlane.xlu1 %2137 }
 0x46f   : > { %v2151_v63 = vmul.f32 0.0078125, %v2138_v62  ;;  %2176 = vadd.xlane.f32.xlu0 %v2166_v39 }
 0x470   : > { %2381 = vmatpush1.bf16.msra.mxu0 %v6620_v55 }
 0x471   : > { %v7937_v0 = vsub.f32 %v2126_v17, %v2151_v63  ;;  %2382 = vmatprep.subr.bf16.mxu0 %v6625_v12 }
 0x473   : > { %v2167_v3 = vmul.f32 %v7937_v0, %v7937_v0 }
 0x474   : > { %2383 = vmatpush1.bf16.msra.mxu0 %v6623_v15 }
 0x475   : > { %2178 = vadd.xlane.f32.xlu1 %v2167_v3  ;;  %2384 = vmatprep.subr.bf16.mxu0 %v6628_v19 }
 0x478   : > { %2385 = vmatpush1.bf16.msra.mxu0 %v6626_v21 }
 0x479   : > { %2386 = vmatprep.subr.bf16.mxu0 %v6631_v5 }
 0x47a   : > { %v2140_v10 = vpop.xlane.xlu0 %2139 }
 0x47b   : > { %v2152_v11 = vmul.f32 0.0078125, %v2140_v10 }
 0x47c   : > { %2387 = vmatpush1.bf16.msra.mxu0 %v6629_v23 }
 0x47d   : > { %v7941_v14 = vsub.f32 %v2127_v26, %v2152_v11  ;;  %2388 = vmatprep.subr.bf16.mxu0 %v6634_v24 }
 0x47f   : > { %v2168_v18 = vmul.f32 %v7941_v14, %v7941_v14 }
 0x480   : > { %2389 = vmatpush1.bf16.msra.mxu0 %v6632_v27  ;;  %v1646_v27 = vadd.f32 %v7838_v1, %v7970_v2 }
 0x481   : > { %v2142_v20 = vpop.xlane.xlu1 %2141  ;;  %2180 = vadd.xlane.f32.xlu0 %v2168_v18 }
 0x482   : > { %v2153_v17 = vmul.f32 0.0078125, %v2142_v20 }
 0x484   : > { %v7945_v22 = vsub.f32 %v2128_v16, %v2153_v17 }
 0x486   : > { %v2169_v25 = vmul.f32 %v7945_v22, %v7945_v22 }
 0x488   : > { %2182 = vadd.xlane.f32.xlu1 %v2169_v25 }
 0x48d   : > { %v2144_v29 = vpop.xlane.xlu0 %2143 }
 0x48e   : > { %v2154_v31 = vmul.f32 0.0078125, %v2144_v29 }
 0x490   : > { %v7950_v26 = vsub.f32 %v7917_v35, %v2154_v31 }
 0x492   : > { %v2170_v32 = vmul.f32 %v7950_v26, %v7950_v26 }
 0x494   : > { %v2146_v33 = vpop.xlane.xlu1 %2145  ;;  %2184 = vadd.xlane.f32.xlu0 %v2170_v32 }
 0x495   : > { %v2155_v28 = vmul.f32 0.0078125, %v2146_v33 }
 0x497   : > { %v7955_v16 = vsub.f32 %v7920_v43, %v2155_v28  ;;  %v7960_v43 = vld [vmem:[#allocation10 + $0x15] ss:$0 sm:$0xff] }
 0x499   : > { %v2171_v36 = vmul.f32 %v7955_v16, %v7955_v16 }
 0x49b   : > { %2186 = vadd.xlane.f32.xlu1 %v2171_v36 }
 0x4e7   : > { %v2173_v37 = vpop.xlane.xlu0 %2172 }
 0x4e8   : > { %v2188_v38 = vmul.f32 0.0078125, %v2173_v37 }
 0x4ea   : > { %v2196_v41 = vadd.f32 1e-05, %v2188_v38 }
 0x4ec   : > { %6899 = vrsqrt.f32 %v2196_v41 }
 0x4f0   : > { %v2175_v42 = vpop.xlane.xlu1 %2174 }
 0x4f1   : > { %v2189_v35 = vmul.f32 0.0078125, %v2175_v42 }
 0x4f3   : > { %v2197_v45 = vadd.f32 1e-05, %v2189_v35 }
 0x4f5   : > { %6901 = vrsqrt.f32 %v2197_v45 }
 0x4f8   : > { %v2177_v48 = vpop.xlane.xlu0 %2176 }
 0x4f9   : > { %v2190_v49 = vmul.f32 0.0078125, %v2177_v48  ;;  %v6900_v50 = vpop.eup %6899 }
 0x4fa   : > { %v2212_v54 = vmul.f32 %v6900_v50, %v7924_v30 }
 0x4fb   : > { %v2198_v53 = vadd.f32 1e-05, %v2190_v49 }
 0x4fc   : > { %v2227_v60 = vmul.f32 %v7960_v43, %v2212_v54 }
 0x4fd   : > { %6903 = vrsqrt.f32 %v2198_v53  ;;  %v1652_v53 = vadd.f32 %v7841_v4, %v7970_v2 }
 0x4fe   : > { %v2179_v40 = vpop.xlane.xlu1 %2178  ;;  %v2242_v6 = vadd.f32 %v7966_v58, %v2227_v60 }
 0x4ff   : > { %v2191_v39 = vmul.f32 0.0078125, %v2179_v40 }
 0x500   : > { %v2254_v10 = vadd.f32 %v2242_v6, %v1632_v7 }
 0x501   : > { %v2199_v62 = vadd.f32 1e-05, %v2191_v39 }
 0x502   : > { %v6902_v63 = vpop.eup %6901 }
 0x503   : > { %v2213_v30 = vmul.f32 %v6902_v63, %v7929_v51  ;;  %6905 = vrsqrt.f32 %v2199_v62 }
 0x505   : > { %v2228_v3 = vmul.f32 %v7960_v43, %v2213_v30 }
 0x507   : > { %v2243_v55 = vadd.f32 %v7966_v58, %v2228_v3 }
 0x509   : > { %v2255_v11 = vadd.f32 %v2243_v55, %v1636_v9  ;;  %v7980_v12 = vpack.c.bf16 %v2243_v55, %v2242_v6  ;;  %v1662_v9 = vadd.f32 %v7853_v13, %v7970_v2 }
 0x50a   : > { %v6904_v47 = vpop.eup %6903  ;;  %v2181_v15 = vpop.xlane.xlu0 %2180 }
 0x50b   : > { %v2192_v51 = vmul.f32 0.0078125, %v2181_v15  ;;  %v2278_v18 = vpack.c.bf16 %v2255_v11, %v2254_v10  ;;  %v2214_v19 = vmul.f32 %v6904_v47, %v7933_v56  ;;  %v1642_v56 = vadd.f32 %v7833_v61, %v7970_v2 }
 0x50d   : > { %v2200_v20 = vadd.f32 1e-05, %v2192_v51  ;;  %2407 = vmatmul.mubr.bf16.vlgmr.msra.gmra.mxu0 %v2278_v18  ;;  %v2229_v52 = vmul.f32 %v7960_v43, %v2214_v19 }
 0x50e   : > { %2416 = vmatprep.mubr.bf16.mxu0 %v7477_v46 }
 0x50f   : > { %6907 = vrsqrt.f32 %v2200_v20  ;;  %v2244_v24 = vadd.f32 %v7966_v58, %v2229_v52 }
 0x510   : > { %v6906_v57 = vpop.eup %6905 }
 0x511   : > { %v2183_v21 = vpop.xlane.xlu1 %2182  ;;  %v2215_v17 = vmul.f32 %v6906_v57, %v7937_v0  ;;  %v2256_v31 = vadd.f32 %v2244_v24, %v1642_v56 }
 0x512   : > { %v2193_v5 = vmul.f32 0.0078125, %v2183_v21 }
 0x513   : > { %v2230_v23 = vmul.f32 %v7960_v43, %v2215_v17 }
 0x514   : > { %v2201_v25 = vadd.f32 1e-05, %v2193_v5 }
 0x515   : > { %v2245_v29 = vadd.f32 %v7966_v58, %v2230_v23  ;;  %v2282_v23 = vld [vmem:[#allocation10 + $0xb] sm:$0x3] }
 0x516   : > { %6909 = vrsqrt.f32 %v2201_v25  ;;  %v8056_v56 = vrot.slane %v2282_v23, %v7963_v59 }
 0x517   : > { %v2257_v32 = vadd.f32 %v2245_v29, %v1646_v27  ;;  %v7993_v33 = vpack.c.bf16 %v2245_v29, %v2244_v24  ;;  %v8051_v24 = vrot.slane %v2282_v23, %v7811_v44 }
 0x519   : > { %v2279_v0 = vpack.c.bf16 %v2257_v32, %v2256_v31 }
 0x51b   : > { %2417 = vmatmul.mubr.bf16.gmra.mxu0 %v2279_v0 }
 0x51c   : > { %v6908_v28 = vpop.eup %6907  ;;  %2426 = vmatprep.mubr.bf16.mxu0 %v7477_v46 }
 0x51d   : > { %v2185_v36 = vpop.xlane.xlu0 %2184  ;;  %v2216_v38 = vmul.f32 %v6908_v28, %v7941_v14  ;;  %v1656_v14 = vadd.f32 %v7847_v8, %v7970_v2  ;;  %v1665_v8 = vpop.f32.mrf.mxu0 }
 0x51e   : > { %v2194_v37 = vmul.f32 0.0078125, %v2185_v36  ;;  %v1666_v55 = vadd.f32 %v1665_v8, %v7970_v2 }
 0x51f   : > { %v2231_v1 = vmul.f32 %v7960_v43, %v2216_v38  ;;  %v8020_v15 = vpop.f32.mrf.mxu0 }
 0x520   : > { %v2202_v61 = vadd.f32 1e-05, %v2194_v37 }
 0x521   : > { %v2246_v49 = vadd.f32 %v7966_v58, %v2231_v1 }
 0x522   : > { %6911 = vrsqrt.f32 %v2202_v61 }
 0x523   : > { %v6910_v41 = vpop.eup %6909  ;;  %v2258_v40 = vadd.f32 %v2246_v49, %v1652_v53 }
 0x524   : > { %v2187_v42 = vpop.xlane.xlu1 %2186  ;;  %v2217_v35 = vmul.f32 %v6910_v41, %v7945_v22 }
 0x525   : > { %v2195_v45 = vmul.f32 0.0078125, %v2187_v42 }
 0x526   : > { %v2232_v48 = vmul.f32 %v7960_v43, %v2217_v35 }
 0x527   : > { %v2203_v50 = vadd.f32 1e-05, %v2195_v45 }
 0x528   : > { %v2247_v54 = vadd.f32 %v7966_v58, %v2232_v48 }
 0x529   : > { %6913 = vrsqrt.f32 %v2203_v50 }
 0x52a   : > { %v2259_v39 = vadd.f32 %v2247_v54, %v1656_v14  ;;  %v8006_v60 = vpack.c.bf16 %v2247_v54, %v2246_v49 }
 0x52c   : > { %v2280_v22 = vpack.c.bf16 %v2259_v39, %v2258_v40 }
 0x52e   : > { %2427 = vmatmul.mubr.bf16.gmra.mxu0 %v2280_v22 }
 0x52f   : > { %v6912_v62 = vpop.eup %6911  ;;  %2436 = vmatprep.mubr.bf16.mxu0 %v7477_v46 }
 0x530   : > { %v2218_v63 = vmul.f32 %v6912_v62, %v7950_v26 }
 0x532   : > { %v2233_v30 = vmul.f32 %v7960_v43, %v2218_v63 }
 0x534   : > { %v2248_v7 = vadd.f32 %v7966_v58, %v2233_v30 }
 0x536   : > { %v6914_v4 = vpop.eup %6913  ;;  %v2260_v46 = vadd.f32 %v2248_v7, %v1662_v9 }
 0x537   : > { %v2219_v3 = vmul.f32 %v6914_v4, %v7955_v16  ;;  %v8022_v16 = vpop.f32.mrf.mxu0 }
 0x539   : > { %v2234_v6 = vmul.f32 %v7960_v43, %v2219_v3  ;;  %v8024_v43 = vpop.f32.mrf.mxu0 }
 0x53b   : > { %v2249_v10 = vadd.f32 %v7966_v58, %v2234_v6  ;;  %v8026_v51 = vpop.f32.mrf.mxu0 }
 0x53d   : > { %v2261_v11 = vadd.f32 %v2249_v10, %v1666_v55  ;;  %v8018_v26 = vpack.c.bf16 %v2249_v10, %v2248_v7  ;;  %v8028_v18 = vpop.f32.mrf.mxu0 }
 0x53f   : > { %9177 = vst [vmem:[#allocation17_spill] sm:$0xff] %v8018_v26  ;;  %v2281_v47 = vpack.c.bf16 %v2261_v11, %v2260_v46  ;;  %v8030_v13 = vpop.f32.mrf.mxu0 }
 0x541   : > { %2437 = vmatmul.mubr.bf16.gmra.mxu0 %v2281_v47  ;;  %v8032_v2 = vpop.f32.mrf.mxu0 }
 0x543   : > { %v8034_v58 = vpop.f32.mrf.mxu0 }
 0x545   : > { %v8036_v19 = vpop.f32.mrf.mxu0 }
 0x547   : > { %v8038_v20 = vpop.f32.mrf.mxu0 }
 0x549   : > { %v8040_v52 = vpop.f32.mrf.mxu0 }
 0x54b   : > { %v8042_v57 = vpop.f32.mrf.mxu0 }
 0x54d   : > { %v8044_v21 = vpop.f32.mrf.mxu0 }
 0x54f   : > { %v8046_v17 = vpop.f32.mrf.mxu0 }
 0x551   : > { %v8048_v5 = vpop.f32.mrf.mxu0 }
 0x553   : > { %v8053_v25 = vpop.f32.mrf.mxu0 }
 0x5cd   : > { %v2408_v27 = vpop.f32.mrf.mxu0 }
 0x5ce   : > { %v2409_v29 = vadd.f32 %v2408_v27, %v8051_v24 }
 0x5cf   : > { %v2410_v31 = vpop.f32.mrf.mxu0 }
 0x5d0   : > { %v5768_v32 = vmul.f32 -1.442695, %v2409_v29  ;;  %v2411_v0 = vadd.f32 %v2410_v31, %v8056_v56 }
 0x5d1   : > { %v2412_v28 = vpop.f32.mrf.mxu0 }
 0x5d2   : > { %6915 = vpow2.f32 %v5768_v32  ;;  %v5769_v36 = vmul.f32 -1.442695, %v2411_v0  ;;  %v8061_v37 = vadd.f32 %v2412_v28, %v8051_v24 }
 0x5d3   : > { %v2414_v38 = vpop.f32.mrf.mxu0 }
 0x5d4   : > { %6917 = vpow2.f32 %v5769_v36  ;;  %v5770_v61 = vmul.f32 -1.442695, %v8061_v37  ;;  %v8065_v1 = vadd.f32 %v2414_v38, %v8056_v56 }
 0x5d6   : > { %6919 = vpow2.f32 %v5770_v61  ;;  %v5771_v41 = vmul.f32 -1.442695, %v8065_v1 }
 0x5d8   : > { %6921 = vpow2.f32 %v5771_v41 }
 0x5db   : > { %v2418_v42 = vpop.f32.mrf.mxu0 }
 0x5dc   : > { %v8069_v35 = vadd.f32 %v2418_v42, %v8051_v24 }
 0x5dd   : > { %v2420_v45 = vpop.f32.mrf.mxu0 }
 0x5de   : > { %v5772_v48 = vmul.f32 -1.442695, %v8069_v35  ;;  %v8073_v49 = vadd.f32 %v2420_v45, %v8056_v56 }
 0x5df   : > { %v6916_v50 = vpop.eup %6915  ;;  %v2422_v53 = vpop.f32.mrf.mxu0 }
 0x5e0   : > { %v2495_v14 = vadd.f32 1.0, %v6916_v50  ;;  %6923 = vpow2.f32 %v5772_v48  ;;  %v5773_v54 = vmul.f32 -1.442695, %v8073_v49  ;;  %v8077_v40 = vadd.f32 %v2422_v53, %v8051_v24 }
 0x5e1   : > { %v6918_v39 = vpop.eup %6917  ;;  %v2424_v22 = vpop.f32.mrf.mxu0 }
 0x5e2   : > { %6925 = vrcp.f32 %v2495_v14  ;;  %v2496_v62 = vadd.f32 1.0, %v6918_v39  ;;  %v5774_v63 = vmul.f32 -1.442695, %v8077_v40  ;;  %v8081_v30 = vadd.f32 %v2424_v22, %v8056_v56 }
 0x5e3   : > { %v6920_v4 = vpop.eup %6919  ;;  %6927 = vpow2.f32 %v5773_v54 }
 0x5e4   : > { %6929 = vrcp.f32 %v2496_v62  ;;  %v2497_v3 = vadd.f32 1.0, %v6920_v4  ;;  %v5775_v8 = vmul.f32 -1.442695, %v8081_v30 }
 0x5e5   : > { %v6922_v6 = vpop.eup %6921  ;;  %6931 = vpow2.f32 %v5774_v63 }
 0x5e6   : > { %6933 = vrcp.f32 %v2497_v3  ;;  %v2498_v7 = vadd.f32 1.0, %v6922_v6 }
 0x5e7   : > { %6935 = vpow2.f32 %v5775_v8 }
 0x5e8   : > { %6937 = vrcp.f32 %v2498_v7 }
 0x5ed   : > { %v6924_v9 = vpop.eup %6923 }
 0x5ee   : > { %v2499_v55 = vadd.f32 1.0, %v6924_v9  ;;  %v2428_v10 = vpop.f32.mrf.mxu0 }
 0x5ef   : > { %v6926_v46 = vpop.eup %6925  ;;  %v8085_v11 = vadd.f32 %v2428_v10, %v8051_v24 }
 0x5f0   : > { %v6928_v47 = vpop.eup %6927  ;;  %v2430_v23 = vpop.f32.mrf.mxu0  ;;  %6939 = vrcp.f32 %v2499_v55  ;;  %v8091_v38 = vmul.f32 %v6926_v46, %v2409_v29 }
 0x5f1   : > { %v6930_v27 = vpop.eup %6929  ;;  %v2500_v31 = vadd.f32 1.0, %v6928_v47  ;;  %v5776_v32 = vmul.f32 -1.442695, %v8085_v11  ;;  %v8089_v28 = vadd.f32 %v2430_v23, %v8056_v56 }
 0x5f2   : > { %v6932_v36 = vpop.eup %6931  ;;  %v8093_v61 = vmul.f32 %v6930_v27, %v2411_v0  ;;  %v2432_v41 = vpop.f32.mrf.mxu0 }
 0x5f3   : > { %v6934_v42 = vpop.eup %6933  ;;  %6941 = vrcp.f32 %v2500_v31  ;;  %v2501_v45 = vadd.f32 1.0, %v6932_v36  ;;  %v5777_v48 = vmul.f32 -1.442695, %v8089_v28  ;;  %v8097_v50 = vadd.f32 %v2432_v41, %v8051_v24 }
 0x5f4   : > { %v6936_v53 = vpop.eup %6935  ;;  %6943 = vpow2.f32 %v5776_v32  ;;  %v2434_v14 = vpop.f32.mrf.mxu0  ;;  %v2559_v54 = vadd.f32 %v8093_v61, %v8091_v38  ;;  %v8104_v62 = vmul.f32 %v6934_v42, %v8061_v37 }
 0x5f5   : > { %v6938_v39 = vpop.eup %6937  ;;  %6945 = vrcp.f32 %v2501_v45  ;;  %v2502_v29 = vadd.f32 1.0, %v6936_v53  ;;  %v5778_v0 = vmul.f32 -1.442695, %v8097_v50  ;;  %v2435_v22 = vadd.f32 %v2434_v14, %v8056_v56 }
 0x5f6   : > { %v8107_v63 = vmul.f32 %v6938_v39, %v8065_v1  ;;  %6947 = vpow2.f32 %v5777_v48  ;;  %2560 = vadd.xlane.f32.xlu0 %v2559_v54 }
 0x5f7   : > { %6949 = vrcp.f32 %v2502_v29  ;;  %v5779_v4 = vmul.f32 -1.442695, %v2435_v22 }
 0x5f8   : > { %6951 = vpow2.f32 %v5778_v0  ;;  %v2562_v3 = vadd.f32 %v8107_v63, %v8104_v62 }
 0x5f9   : > { %6953 = vpow2.f32 %v5779_v4 }
 0x5fa   : > { %2563 = vadd.xlane.f32.xlu1 %v2562_v3 }
 0x5fd   : > { %v6940_v8 = vpop.eup %6939 }
 0x5fe   : > { %v8112_v9 = vmul.f32 %v6940_v8, %v8069_v35 }
 0x600   : > { %v6942_v6 = vpop.eup %6941 }
 0x601   : > { %v6944_v7 = vpop.eup %6943  ;;  %v8115_v37 = vmul.f32 %v6942_v6, %v8073_v49  ;;  %v2438_v1 = vpop.f32.mrf.mxu0 }
 0x602   : > { %v6946_v55 = vpop.eup %6945  ;;  %v2503_v10 = vadd.f32 1.0, %v6944_v7  ;;  %v2439_v46 = vadd.f32 %v2438_v1, %v8051_v24 }
 0x603   : > { %v6948_v47 = vpop.eup %6947  ;;  %v2440_v23 = vpop.f32.mrf.mxu0  ;;  %v2565_v27 = vadd.f32 %v8115_v37, %v8112_v9  ;;  %v8122_v49 = vmul.f32 %v6946_v55, %v8077_v40 }
 0x604   : > { %v6950_v31 = vpop.eup %6949  ;;  %6955 = vrcp.f32 %v2503_v10  ;;  %v2504_v32 = vadd.f32 1.0, %v6948_v47  ;;  %v5780_v36 = vmul.f32 -1.442695, %v2439_v46  ;;  %v2441_v35 = vadd.f32 %v2440_v23, %v8056_v56 }
 0x605   : > { %v6952_v41 = vpop.eup %6951  ;;  %v8125_v42 = vmul.f32 %v6950_v31, %v8081_v30  ;;  %2566 = vadd.xlane.f32.xlu0 %v2565_v27  ;;  %v2442_v45 = vpop.f32.mrf.mxu0 }
 0x606   : > { %v6954_v48 = vpop.eup %6953  ;;  %6957 = vrcp.f32 %v2504_v32  ;;  %v2505_v53 = vadd.f32 1.0, %v6952_v41  ;;  %v5781_v14 = vmul.f32 -1.442695, %v2441_v35  ;;  %v2443_v54 = vadd.f32 %v2442_v45, %v8051_v24 }
 0x607   : > { %v2506_v39 = vadd.f32 1.0, %v6954_v48  ;;  %6959 = vpow2.f32 %v5780_v36  ;;  %v2444_v29 = vpop.f32.mrf.mxu0  ;;  %v2568_v0 = vadd.f32 %v8125_v42, %v8122_v49 }
 0x608   : > { %6961 = vrcp.f32 %v2505_v53  ;;  %v5782_v40 = vmul.f32 -1.442695, %v2443_v54  ;;  %v2445_v4 = vadd.f32 %v2444_v29, %v8056_v56 }
 0x609   : > { %6963 = vrcp.f32 %v2506_v39  ;;  %2569 = vadd.xlane.f32.xlu1 %v2568_v0 }
 0x60a   : > { %6965 = vpow2.f32 %v5781_v14  ;;  %v5783_v30 = vmul.f32 -1.442695, %v2445_v4 }
 0x60b   : > { %6967 = vpow2.f32 %v5782_v40 }
 0x60c   : > { %6969 = vpow2.f32 %v5783_v30  ;;  %v6635_v30 = vld [vmem:[#allocation8 + $0x3e8] ss:$68 sps:$4 sm:$0xff]  }
 0x611   : > { %v6956_v3 = vpop.eup %6955 }
 0x612   : > { %v8132_v24 = vmul.f32 %v6956_v3, %v8085_v11  ;;  %v6637_v3 = vld [vmem:[#allocation8 + $0x3ec] ss:$68 sps:$4 sm:$0xff]  }
 0x613   : > { %v6958_v8 = vpop.eup %6957  ;;  %3597 = vmatprep.subr.bf16.mxu0 %v6637_v3  ;;  %v6671_v3 = vld [vmem:[#allocation8 + $0xb8] ss:$68 sps:$4 sm:$0xff]  }
 0x614   : > { %v6960_v6 = vpop.eup %6959  ;;  %v8135_v7 = vmul.f32 %v6958_v8, %v8089_v28  ;;  %v6638_v8 = vld [vmem:[#allocation8 + $0x3d8] ss:$68 sps:$4 sm:$0xff]   ;;  %3598 = vmatpush1.bf16.msra.mxu0 %v6635_v30  ;;  %v6676_v30 = vld [vmem:[#allocation8 + $0xac] ss:$68 sps:$4 sm:$0xff]  }
 0x615   : > { %v6962_v1 = vpop.eup %6961  ;;  %v2507_v55 = vadd.f32 1.0, %v6960_v6  ;;  %v6643_v6 = vld [vmem:[#allocation8 + $0x364] ss:$68 sps:$4 sm:$0xff]  }
 0x616   : > { %v6964_v10 = vpop.eup %6963  ;;  %v2571_v56 = vadd.f32 %v8135_v7, %v8132_v24  ;;  %v8140_v23 = vmul.f32 %v6962_v1, %v8097_v50  ;;  %3599 = vmatprep.subr.bf16.mxu0 %v6643_v6  ;;  %v6649_v1 = vld [vmem:[#allocation8 + $0x2dc] ss:$68 sps:$4 sm:$0xff]   ;;  %v6682_v6 = vld [vmem:[#allocation8 + $0x24] ss:$68 sps:$4 sm:$0xff]  }
 0x617   : > { %v6966_v47 = vpop.eup %6965  ;;  %v8142_v27 = vmul.f32 %v6964_v10, %v2435_v22  ;;  %6971 = vrcp.f32 %v2507_v55  ;;  %v6652_v55 = vld [vmem:[#allocation8 + $0x2cc] ss:$68 sps:$4 sm:$0xff]   ;;  %v6647_v10 = vld [vmem:[#allocation8 + $0x2d8] ss:$68 sps:$4 sm:$0xff]  }
 0x618   : > { %v6968_v31 = vpop.eup %6967  ;;  %v2508_v32 = vadd.f32 1.0, %v6966_v47  ;;  %2572 = vadd.xlane.f32.xlu0 %v2571_v56  ;;  %v6650_v56 = vld [vmem:[#allocation8 + $0x2c8] ss:$68 sps:$4 sm:$0xff]   ;;  %v6655_v47 = vld [vmem:[#allocation8 + $0x254] ss:$68 sps:$4 sm:$0xff]  }
 0x619   : > { %v6970_v11 = vpop.eup %6969  ;;  %v2509_v36 = vadd.f32 1.0, %v6968_v31  ;;  %v2574_v28 = vadd.f32 %v8142_v27, %v8140_v23  ;;  %v6658_v31 = vld [vmem:[#allocation8 + $0x244] ss:$68 sps:$4 sm:$0xff]  }
 0x61a   : > { %6973 = vrcp.f32 %v2508_v32  ;;  %v2510_v41 = vadd.f32 1.0, %v6970_v11  ;;  %v6653_v32 = vld [vmem:[#allocation8 + $0x250] ss:$68 sps:$4 sm:$0xff]   ;;  %v6656_v11 = vld [vmem:[#allocation8 + $0x240] ss:$68 sps:$4 sm:$0xff]  }
 0x61b   : > { %6975 = vrcp.f32 %v2509_v36  ;;  %2575 = vadd.xlane.f32.xlu1 %v2574_v28  ;;  %v6661_v36 = vld [vmem:[#allocation8 + $0x1cc] ss:$68 sps:$4 sm:$0xff]   ;;  %v6664_v28 = vld [vmem:[#allocation8 + $0x1bc] ss:$68 sps:$4 sm:$0xff]  }
 0x61c   : > { %6977 = vrcp.f32 %v2510_v41  ;;  %v6659_v41 = vld [vmem:[#allocation8 + $0x1c8] ss:$68 sps:$4 sm:$0xff]  }
 0x624   : > { %v6972_v45 = vpop.eup %6971 }
 0x625   : > { %v8146_v53 = vmul.f32 %v6972_v45, %v2439_v46  ;;  %v6640_v46 = vld [vmem:[#allocation8 + $0x3dc] ss:$68 sps:$4 sm:$0xff]  }
 0x626   : > { %2972 = vmatprep.subr.bf16.mxu1 %v6640_v46  ;;  %v6662_v45 = vld [vmem:[#allocation8 + $0x1b8] ss:$68 sps:$4 sm:$0xff]  }
 0x627   : > { %v6974_v48 = vpop.eup %6973  ;;  %2973 = vmatpush1.bf16.msra.mxu1 %v6638_v8  ;;  %v6674_v8 = vld [vmem:[#allocation8 + $0xa8] ss:$68 sps:$4 sm:$0xff]   ;;  %v6679_v46 = vld [vmem:[#allocation8 + $0x34] ss:$68 sps:$4 sm:$0xff]  }
 0x628   : > { %v6976_v50 = vpop.eup %6975  ;;  %v8148_v22 = vmul.f32 %v6974_v48, %v2441_v35  ;;  %v6646_v35 = vld [vmem:[#allocation8 + $0x354] ss:$68 sps:$4 sm:$0xff]   ;;  %v6667_v48 = vld [vmem:[#allocation8 + $0x144] ss:$68 sps:$4 sm:$0xff]  }
 0x629   : > { %v6978_v14 = vpop.eup %6977  ;;  %v8150_v39 = vmul.f32 %v6976_v50, %v2443_v54  ;;  %v6641_v54 = vld [vmem:[#allocation8 + $0x360] ss:$68 sps:$4 sm:$0xff]   ;;  %2974 = vmatprep.subr.bf16.mxu1 %v6646_v35  ;;  %v6670_v50 = vld [vmem:[#allocation8 + $0x134] ss:$68 sps:$4 sm:$0xff]  }
 0x62a   : > { %v8152_v29 = vmul.f32 %v6978_v14, %v2445_v4  ;;  %v2577_v0 = vadd.f32 %v8148_v22, %v8146_v53  ;;  %v6644_v4 = vld [vmem:[#allocation8 + $0x350] ss:$68 sps:$4 sm:$0xff]   ;;  %3600 = vmatpush1.bf16.msra.mxu0 %v6641_v54  ;;  %v6665_v14 = vld [vmem:[#allocation8 + $0x140] ss:$68 sps:$4 sm:$0xff]  }
 0x62b   : > { %2975 = vmatpush1.bf16.msra.mxu1 %v6644_v4  ;;  %3601 = vmatprep.subr.bf16.mxu0 %v6649_v1  ;;  %v6677_v35 = vld [vmem:[#allocation8 + $0x30] ss:$68 sps:$4 sm:$0xff]   ;;  %v6680_v54 = vld [vmem:[#allocation8 + $0x20] ss:$68 sps:$4 sm:$0xff]   ;;  %v6683_v1 = vld [vmem:[#allocation8 + $0x828] ss:$68 sps:$4 sm:$0xff]  }
 0x62c   : > { %2578 = vadd.xlane.f32.xlu0 %v2577_v0  ;;  %v2580_v40 = vadd.f32 %v8152_v29, %v8150_v39  ;;  %2976 = vmatprep.subr.bf16.mxu1 %v6652_v55  ;;  %v6668_v0 = vld [vmem:[#allocation8 + $0x130] ss:$68 sps:$4 sm:$0xff]  }
 0x62d   : > { %v6685_v4 = vld [vmem:[#allocation8 + $0x82c] ss:$68 sps:$4 sm:$0xff]  }
 0x62e   : > { %2581 = vadd.xlane.f32.xlu1 %v2580_v40  ;;  %3602 = vmatpush1.bf16.msra.mxu0 %v6647_v10  ;;  %v6673_v40 = vld [vmem:[#allocation8 + $0xbc] ss:$68 sps:$4 sm:$0xff]  }
 0x62f   : > { %2977 = vmatpush1.bf16.msra.mxu1 %v6650_v56  ;;  %3603 = vmatprep.subr.bf16.mxu0 %v6655_v47 }
 0x630   : > { %2978 = vmatprep.subr.bf16.mxu1 %v6658_v31 }
 0x632   : > { %3604 = vmatpush1.bf16.msra.mxu0 %v6653_v32 }
 0x633   : > { %2979 = vmatpush1.bf16.msra.mxu1 %v6656_v11  ;;  %3605 = vmatprep.subr.bf16.mxu0 %v6661_v36 }
 0x634   : > { %2980 = vmatprep.subr.bf16.mxu1 %v6664_v28 }
 0x636   : > { %3606 = vmatpush1.bf16.msra.mxu0 %v6659_v41 }
 0x637   : > { %2981 = vmatpush1.bf16.msra.mxu1 %v6662_v45  ;;  %3607 = vmatprep.subr.bf16.mxu0 %v6667_v48 }
 0x638   : > { %2982 = vmatprep.subr.bf16.mxu1 %v6670_v50 }
 0x63a   : > { %3608 = vmatpush1.bf16.msra.mxu0 %v6665_v14 }
 0x63b   : > { %2983 = vmatpush1.bf16.msra.mxu1 %v6668_v0  ;;  %3609 = vmatprep.subr.bf16.mxu0 %v6673_v40 }
 0x63c   : > { %2984 = vmatprep.subr.bf16.mxu1 %v6676_v30 }
 0x63e   : > { %3610 = vmatpush1.bf16.msra.mxu0 %v6671_v3 }
 0x63f   : > { %2985 = vmatpush1.bf16.msra.mxu1 %v6674_v8  ;;  %3611 = vmatprep.subr.bf16.mxu0 %v6679_v46  ;;  %v6688_v8 = vld [vmem:[#allocation8 + $0x81c] ss:$68 sps:$4 sm:$0xff]  }
 0x640   : > { %2986 = vmatprep.subr.bf16.mxu1 %v6682_v6  ;;  %v6686_v46 = vld [vmem:[#allocation8 + $0x818] ss:$68 sps:$4 sm:$0xff]  }
 0x642   : > { %3612 = vmatpush1.bf16.msra.mxu0 %v6677_v35 }
 0x643   : > { %2987 = vmatpush1.bf16.msra.mxu1 %v6680_v54  ;;  %3613 = vmatprep.subr.bf16.mxu0 %v6685_v4  ;;  %v6689_v54 = vld [vmem:[#allocation8 + $0x7a0] ss:$68 sps:$4 sm:$0xff]  }
 0x644   : > { %2988 = vmatprep.subr.bf16.mxu1 %v6688_v8 }
 0x646   : > { %3614 = vmatpush2.bf16.msra.mxu0 %v6683_v1 }
 0x647   : > { %2989 = vmatpush2.bf16.msra.mxu1 %v6686_v46  ;;  %v6710_v46 = vld [vmem:[#allocation8 + $0x5f8] ss:$68 sps:$4 sm:$0xff]  }
 0x67f   : > { %v2561_v55 = vpop.xlane.xlu0 %2560 }
 0x680   : > { %v2584_v10 = vmul.f32 0.00390625, %v2561_v55  ;;  %v6694_v55 = vld [vmem:[#allocation8 + $0x794] ss:$68 sps:$4 sm:$0xff]  }
 0x681   : > { %2990 = vmatprep.subr.bf16.mxu1 %v6694_v55  ;;  %v6718_v55 = vld [vmem:[#allocation8 + $0x574] ss:$68 sps:$4 sm:$0xff]  }
 0x682   : > { %v8159_v56 = vsub.f32 %v8091_v38, %v2584_v10  ;;  %v8162_v47 = vsub.f32 %v8093_v61, %v2584_v10 }
 0x683   : > { %v2564_v31 = vpop.xlane.xlu1 %2563 }
 0x684   : > { %v2585_v32 = vmul.f32 0.00390625, %v2564_v31  ;;  %v2608_v11 = vmul.f32 %v8159_v56, %v8159_v56  ;;  %v2609_v36 = vmul.f32 %v8162_v47, %v8162_v47  ;;  %v6695_v31 = vld [vmem:[#allocation8 + $0x718] ss:$68 sps:$4 sm:$0xff]  }
 0x686   : > { %v8169_v28 = vsub.f32 %v8104_v62, %v2585_v32  ;;  %v8172_v41 = vsub.f32 %v8107_v63, %v2585_v32  ;;  %v2624_v45 = vadd.f32 %v2609_v36, %v2608_v11  ;;  %v6700_v32 = vld [vmem:[#allocation8 + $0x70c] ss:$68 sps:$4 sm:$0xff]   ;;  %v6703_v36 = vld [vmem:[#allocation8 + $0x694] ss:$68 sps:$4 sm:$0xff]  }
 0x687   : > { %v6698_v11 = vld [vmem:[#allocation8 + $0x708] ss:$68 sps:$4 sm:$0xff]  }
 0x688   : > { %2625 = vadd.xlane.f32.xlu0 %v2624_v45  ;;  %v2610_v38 = vmul.f32 %v8169_v28, %v8169_v28  ;;  %v2611_v61 = vmul.f32 %v8172_v41, %v8172_v41  ;;  %v6701_v45 = vld [vmem:[#allocation8 + $0x690] ss:$68 sps:$4 sm:$0xff]  }
 0x68a   : > { %v2627_v48 = vadd.f32 %v2611_v61, %v2610_v38  ;;  %v6706_v38 = vld [vmem:[#allocation8 + $0x684] ss:$68 sps:$4 sm:$0xff]  }
 0x68b   : > { %v6704_v61 = vld [vmem:[#allocation8 + $0x680] ss:$68 sps:$4 sm:$0xff]  }
 0x68c   : > { %2628 = vadd.xlane.f32.xlu1 %v2627_v48 }
 0x68e   : > { %v2567_v50 = vpop.xlane.xlu0 %2566 }
 0x68f   : > { %v2586_v14 = vmul.f32 0.00390625, %v2567_v50  ;;  %v6709_v50 = vld [vmem:[#allocation8 + $0x60c] ss:$68 sps:$4 sm:$0xff]  }
 0x691   : > { %v8179_v0 = vsub.f32 %v8112_v9, %v2586_v14  ;;  %v8182_v62 = vsub.f32 %v8115_v37, %v2586_v14  ;;  %v6691_v37 = vld [vmem:[#allocation8 + $0x7a4] ss:$68 sps:$4 sm:$0xff]  }
 0x692   : > { %v2570_v63 = vpop.xlane.xlu1 %2569  ;;  %3615 = vmatprep.subr.bf16.mxu0 %v6691_v37  ;;  %v6715_v37 = vld [vmem:[#allocation8 + $0x584] ss:$68 sps:$4 sm:$0xff]  }
 0x693   : > { %v2587_v40 = vmul.f32 0.00390625, %v2570_v63  ;;  %v2612_v30 = vmul.f32 %v8179_v0, %v8179_v0  ;;  %v2613_v3 = vmul.f32 %v8182_v62, %v8182_v62  ;;  %3616 = vmatpush2.bf16.msra.mxu0 %v6689_v54  ;;  %v6707_v63 = vld [vmem:[#allocation8 + $0x608] ss:$68 sps:$4 sm:$0xff]  }
 0x695   : > { %v8189_v6 = vsub.f32 %v8122_v49, %v2587_v40  ;;  %v8192_v35 = vsub.f32 %v8125_v42, %v2587_v40  ;;  %v2630_v9 = vadd.f32 %v2613_v3, %v2612_v30  ;;  %v6692_v49 = vld [vmem:[#allocation8 + $0x790] ss:$68 sps:$4 sm:$0xff]   ;;  %v6697_v42 = vld [vmem:[#allocation8 + $0x71c] ss:$68 sps:$4 sm:$0xff]  }
 0x696   : > { %2991 = vmatpush2.bf16.msra.mxu1 %v6692_v49  ;;  %3617 = vmatprep.subr.bf16.mxu0 %v6697_v42  ;;  %v6712_v40 = vld [vmem:[#allocation8 + $0x5fc] ss:$68 sps:$4 sm:$0xff]  }
 0x697   : > { %2631 = vadd.xlane.f32.xlu0 %v2630_v9  ;;  %v2614_v4 = vmul.f32 %v8189_v6, %v8189_v6  ;;  %v2615_v1 = vmul.f32 %v8192_v35, %v8192_v35  ;;  %3618 = vmatpush2.bf16.msra.mxu0 %v6695_v31 }
 0x698   : > { %2992 = vmatprep.subr.bf16.mxu1 %v6700_v32  ;;  %3619 = vmatprep.subr.bf16.mxu0 %v6703_v36  ;;  %v6719_v32 = vld [vmem:[#allocation8 + $0x4f8] ss:$68 sps:$4 sm:$0xff]   ;;  %v6724_v36 = vld [vmem:[#allocation8 + $0x4ec] ss:$68 sps:$4 sm:$0xff]  }
 0x699   : > { %v2633_v10 = vadd.f32 %v2615_v1, %v2614_v4  ;;  %v6713_v1 = vld [vmem:[#allocation8 + $0x580] ss:$68 sps:$4 sm:$0xff]  }
 0x69a   : > { %2993 = vmatpush2.bf16.msra.mxu1 %v6698_v11  ;;  %v6721_v11 = vld [vmem:[#allocation8 + $0x4fc] ss:$68 sps:$4 sm:$0xff]  }
 0x69b   : > { %2634 = vadd.xlane.f32.xlu1 %v2633_v10  ;;  %3620 = vmatpush2.bf16.msra.mxu0 %v6701_v45  ;;  %v6716_v10 = vld [vmem:[#allocation8 + $0x570] ss:$68 sps:$4 sm:$0xff]  }
 0x69c   : > { %2994 = vmatprep.subr.bf16.mxu1 %v6706_v38  ;;  %3621 = vmatprep.subr.bf16.mxu0 %v6709_v50  ;;  %v6730_v38 = vld [vmem:[#allocation8 + $0x464] ss:$68 sps:$4 sm:$0xff]  }
 0x69e   : > { %2995 = vmatpush2.bf16.msra.mxu1 %v6704_v61  ;;  %v6725_v61 = vld [vmem:[#allocation8 + $0x470] ss:$68 sps:$4 sm:$0xff]  }
 0x69f   : > { %3622 = vmatpush2.bf16.msra.mxu0 %v6707_v63  ;;  %2996 = vmatprep.subr.bf16.mxu1 %v6712_v40 }
 0x6a0   : > { %3623 = vmatprep.subr.bf16.mxu0 %v6715_v37 }
 0x6a1   : > { %v2573_v48 = vpop.xlane.xlu0 %2572 }
 0x6a2   : > { %v2588_v14 = vmul.f32 0.00390625, %v2573_v48  ;;  %2997 = vmatpush2.bf16.msra.mxu1 %v6710_v46  ;;  %v6728_v48 = vld [vmem:[#allocation8 + $0x460] ss:$68 sps:$4 sm:$0xff]  }
 0x6a3   : > { %3624 = vmatpush2.bf16.msra.mxu0 %v6713_v1  ;;  %2998 = vmatprep.subr.bf16.mxu1 %v6718_v55 }
 0x6a4   : > { %v8199_v30 = vsub.f32 %v8132_v24, %v2588_v14  ;;  %v8202_v3 = vsub.f32 %v8135_v7, %v2588_v14  ;;  %v2576_v8 = vpop.xlane.xlu1 %2575  ;;  %3625 = vmatprep.subr.bf16.mxu0 %v6721_v11  ;;  %v2688_v11 = vld [vmem:[#allocation10 + $0x16] sm:$0x3] }
 0x6a5   : > { %v2589_v9 = vmul.f32 0.00390625, %v2576_v8 }
 0x6a6   : > { %v2616_v54 = vmul.f32 %v8199_v30, %v8199_v30  ;;  %v2617_v4 = vmul.f32 %v8202_v3, %v8202_v3  ;;  %2999 = vmatpush2.bf16.msra.mxu1 %v6716_v10 }
 0x6a7   : > { %v8209_v24 = vsub.f32 %v8140_v23, %v2589_v9  ;;  %v8212_v7 = vsub.f32 %v8142_v27, %v2589_v9  ;;  %v6722_v23 = vld [vmem:[#allocation8 + $0x4e8] ss:$68 sps:$4 sm:$0xff]   ;;  %v6727_v27 = vld [vmem:[#allocation8 + $0x474] ss:$68 sps:$4 sm:$0xff]   ;;  %3626 = vmatpush2.bf16.msra.mxu0 %v6719_v32  ;;  %3000 = vmatprep.subr.bf16.mxu1 %v6724_v36  ;;  %v1702_v32 = vpop.f32.mrf.mxu1 }
 0x6a8   : > { %v2636_v49 = vadd.f32 %v2617_v4, %v2616_v54  ;;  %3627 = vmatprep.subr.bf16.mxu0 %v6727_v27 }
 0x6a9   : > { %v2618_v42 = vmul.f32 %v8209_v24, %v8209_v24  ;;  %v2619_v31 = vmul.f32 %v8212_v7, %v8212_v7 }
 0x6aa   : > { %2637 = vadd.xlane.f32.xlu0 %v2636_v49  ;;  %3001 = vmatpush2.bf16.msra.mxu1 %v6722_v23  ;;  %v1704_v23 = vpop.f32.mrf.mxu1 }
 0x6ab   : > { %v2639_v45 = vadd.f32 %v2619_v31, %v2618_v42  ;;  %3002 = vmatprep.subr.bf16.mxu1 %v6730_v38  ;;  %3628 = vmatpush2.bf16.msra.mxu0 %v6725_v61  ;;  %v8242_v38 = vrot.slane %v2688_v11, %v7963_v59  ;;  %v2716_v61 = vld [vmem:[#allocation10 + $0x1f] sm:$0x3] }
 0x6ad   : > { %2640 = vadd.xlane.f32.xlu1 %v2639_v45  ;;  %v8239_v45 = vrot.slane %v2688_v11, %v7811_v44 }
 0x6ae   : > { %3003 = vmatpush2.bf16.msra.mxu1 %v6728_v48 }
 0x6b5   : > { %v2579_v50 = vpop.xlane.xlu0 %2578 }
 0x6b6   : > { %v2590_v14 = vmul.f32 0.00390625, %v2579_v50  ;;  %v925_v50 = vsub.s32 2, %v7808_v34 }
 0x6b7   : > { %v2582_v63 = vpop.xlane.xlu1 %2581 }
 0x6b8   : > { %v8219_v40 = vsub.f32 %v8146_v53, %v2590_v14  ;;  %v8222_v8 = vsub.f32 %v8148_v22, %v2590_v14  ;;  %v2591_v46 = vmul.f32 0.00390625, %v2582_v63  ;;  %v929_v14 = vsub.s32 3, %v7808_v34 }
 0x6ba   : > { %v8225_v9 = vsub.f32 %v8150_v39, %v2591_v46  ;;  %v8228_v37 = vsub.f32 %v8152_v29, %v2591_v46  ;;  %v2620_v54 = vmul.f32 %v8219_v40, %v8219_v40  ;;  %v2621_v4 = vmul.f32 %v8222_v8, %v8222_v8  ;;  %v1706_v46 = vpop.f32.mrf.mxu1 }
 0x6bc   : > { %v2642_v1 = vadd.f32 %v2621_v4, %v2620_v54  ;;  %v2622_v53 = vmul.f32 %v8225_v9, %v8225_v9  ;;  %v2623_v22 = vmul.f32 %v8228_v37, %v8228_v37 }
 0x6be   : > { %2643 = vadd.xlane.f32.xlu0 %v2642_v1  ;;  %v2645_v55 = vadd.f32 %v2623_v22, %v2622_v53  ;;  %v8249_v22 = vrot.slane %v2716_v61, %v7811_v44 }
 0x6c0   : > { %2646 = vadd.xlane.f32.xlu1 %v2645_v55  ;;  %v8252_v55 = vrot.slane %v2716_v61, %v7963_v59 }
 0x711   : > { %v2626_v39 = vpop.xlane.xlu0 %2625 }
 0x712   : > { %v2648_v49 = vmul.f32 0.00390625, %v2626_v39 }
 0x714   : > { %v2656_v29 = vadd.f32 1e-05, %v2648_v49 }
 0x715   : > { %v2629_v10 = vpop.xlane.xlu1 %2628 }
 0x716   : > { %6979 = vrsqrt.f32 %v2656_v29  ;;  %v2649_v42 = vmul.f32 0.00390625, %v2629_v10  ;;  %v8256_v10 = vld [vmem:[#allocation10] sm:$0xff] }
 0x718   : > { %v2657_v31 = vadd.f32 1e-05, %v2649_v42 }
 0x71a   : > { %6981 = vrsqrt.f32 %v2657_v31  ;;  %v1708_v31 = vpop.f32.mrf.mxu1 }
 0x720   : > { %v2632_v36 = vpop.xlane.xlu0 %2631 }
 0x721   : > { %v2650_v27 = vmul.f32 0.00390625, %v2632_v36 }
 0x723   : > { %v6980_v48 = vpop.eup %6979  ;;  %v2658_v63 = vadd.f32 1e-05, %v2650_v27 }
 0x724   : > { %v2672_v54 = vmul.f32 %v6980_v48, %v8159_v56  ;;  %v2635_v4 = vpop.xlane.xlu1 %2634  ;;  %v2673_v1 = vmul.f32 %v6980_v48, %v8162_v47  ;;  %v8259_v56 = vrot.slane %v8256_v10, %v925_v50  ;;  %v8262_v47 = vrot.slane %v8256_v10, %v929_v14 }
 0x725   : > { %6983 = vrsqrt.f32 %v2658_v63  ;;  %v2651_v53 = vmul.f32 0.00390625, %v2635_v4 }
 0x726   : > { %v2701_v39 = vmul.f32 %v8242_v38, %v2673_v1  ;;  %v2700_v49 = vmul.f32 %v8239_v45, %v2672_v54  ;;  %v1703_v50 = vadd.f32 %v1702_v32, %v8259_v56  ;;  %v1705_v14 = vadd.f32 %v1704_v23, %v8262_v47 }
 0x727   : > { %v6982_v29 = vpop.eup %6981  ;;  %v2659_v42 = vadd.f32 1e-05, %v2651_v53  ;;  %v1707_v54 = vadd.f32 %v1706_v46, %v8259_v56  ;;  %v1709_v4 = vadd.f32 %v1708_v31, %v8262_v47 }
 0x728   : > { %v2674_v11 = vmul.f32 %v6982_v29, %v8169_v28  ;;  %v2675_v36 = vmul.f32 %v6982_v29, %v8172_v41  ;;  %v2729_v27 = vadd.f32 %v8252_v55, %v2701_v39  ;;  %v2728_v61 = vadd.f32 %v8249_v22, %v2700_v49  ;;  %v1712_v28 = vpop.f32.mrf.mxu1 }
 0x729   : > { %6985 = vrsqrt.f32 %v2659_v42 }
 0x72a   : > { %v2703_v48 = vmul.f32 %v8242_v38, %v2675_v36  ;;  %v2702_v63 = vmul.f32 %v8239_v45, %v2674_v11  ;;  %v2745_v53 = vadd.f32 %v2729_v27, %v1705_v14  ;;  %v2744_v39 = vadd.f32 %v2728_v61, %v1703_v50  ;;  %v1714_v11 = vpop.f32.mrf.mxu1 }
 0x72c   : > { %v2731_v41 = vadd.f32 %v8252_v55, %v2703_v48  ;;  %v2730_v1 = vadd.f32 %v8249_v22, %v2702_v63  ;;  %v1716_v63 = vpop.f32.mrf.mxu1 }
 0x72e   : > { %v3430_v49 = vpack.c.bf16 %v2731_v41, %v2729_v27  ;;  %v3429_v29 = vpack.c.bf16 %v2730_v1, %v2728_v61  ;;  %v2747_v42 = vadd.f32 %v2731_v41, %v1709_v4  ;;  %v2746_v36 = vadd.f32 %v2730_v1, %v1707_v54 }
 0x730   : > { %3629 = vmatprep.mubr.bf16.mxu0 %v3430_v49  ;;  %v2793_v32 = vpack.c.bf16 %v2747_v42, %v2745_v53  ;;  %v2792_v26 = vpack.c.bf16 %v2746_v36, %v2744_v39  ;;  %v1718_v39 = vpop.f32.mrf.mxu1  ;;  %v1713_v42 = vadd.f32 %v1712_v28, %v8259_v56  ;;  %v1715_v36 = vadd.f32 %v1714_v11, %v8262_v47 }
 0x731   : > { %3630 = vmatmul.mubr.bf16.vlgmr.msra.gmra.mxu0 %v3429_v29 }
 0x732   : > { %v6984_v23 = vpop.eup %6983  ;;  %3004 = vmatprep.mubr.bf16.mxu1 %v2793_v32  ;;  %v1717_v32 = vadd.f32 %v1716_v63, %v8259_v56 }
 0x733   : > { %v2638_v46 = vpop.xlane.xlu0 %2637  ;;  %3005 = vmatmul.mubr.bf16.vlgmr.msra.gmra.mxu1 %v2792_v26  ;;  %v2677_v31 = vmul.f32 %v6984_v23, %v8182_v62  ;;  %v2676_v48 = vmul.f32 %v6984_v23, %v8179_v0 }
 0x734   : > { %v2652_v14 = vmul.f32 0.00390625, %v2638_v46 }
 0x735   : > { %v2705_v27 = vmul.f32 %v8242_v38, %v2677_v31  ;;  %v2704_v61 = vmul.f32 %v8239_v45, %v2676_v48 }
 0x736   : > { %v6986_v50 = vpop.eup %6985  ;;  %v2660_v54 = vadd.f32 1e-05, %v2652_v14  ;;  %v2641_v4 = vpop.xlane.xlu1 %2640 }
 0x737   : > { %v2653_v41 = vmul.f32 0.00390625, %v2641_v4  ;;  %v2679_v1 = vmul.f32 %v6986_v50, %v8192_v35  ;;  %v2678_v53 = vmul.f32 %v6986_v50, %v8189_v6  ;;  %v2733_v26 = vadd.f32 %v8252_v55, %v2705_v27  ;;  %v1722_v50 = vpop.f32.mrf.mxu1 }
 0x738   : > { %6987 = vrsqrt.f32 %v2660_v54  ;;  %v2732_v0 = vadd.f32 %v8249_v22, %v2704_v61  ;;  %v1719_v35 = vadd.f32 %v1718_v39, %v8262_v47 }
 0x739   : > { %v2661_v62 = vadd.f32 1e-05, %v2653_v41  ;;  %v2707_v49 = vmul.f32 %v8242_v38, %v2679_v1  ;;  %v2706_v29 = vmul.f32 %v8239_v45, %v2678_v53  ;;  %v2749_v46 = vadd.f32 %v2733_v26, %v1715_v36  ;;  %v1724_v11 = vpop.f32.mrf.mxu1 }
 0x73a   : > { %v2748_v31 = vadd.f32 %v2732_v0, %v1713_v42 }
 0x73b   : > { %6989 = vrsqrt.f32 %v2661_v62  ;;  %v2735_v6 = vadd.f32 %v8252_v55, %v2707_v49  ;;  %v2734_v23 = vadd.f32 %v8249_v22, %v2706_v29  ;;  %v1726_v4 = vpop.f32.mrf.mxu1 }
 0x73d   : > { %v3432_v48 = vpack.c.bf16 %v2735_v6, %v2733_v26  ;;  %v3431_v14 = vpack.c.bf16 %v2734_v23, %v2732_v0  ;;  %v2751_v27 = vadd.f32 %v2735_v6, %v1719_v35  ;;  %v2750_v61 = vadd.f32 %v2734_v23, %v1717_v32  ;;  %v1728_v36 = vpop.f32.mrf.mxu1 }
 0x73f   : > { %3639 = vmatprep.mubr.bf16.mxu0 %v3432_v48  ;;  %v2795_v28 = vpack.c.bf16 %v2751_v27, %v2749_v46  ;;  %v2794_v54 = vpack.c.bf16 %v2750_v61, %v2748_v31  ;;  %v1723_v46 = vadd.f32 %v1722_v50, %v8259_v56  ;;  %v1725_v31 = vadd.f32 %v1724_v11, %v8262_v47  ;;  %v1732_v50 = vpop.f32.mrf.mxu1 }
 0x740   : > { %3640 = vmatmul.mubr.bf16.gmra.mxu0 %v3431_v14 }
 0x741   : > { %3014 = vmatprep.mubr.bf16.mxu1 %v2795_v28 }
 0x742   : > { %3015 = vmatmul.mubr.bf16.gmra.mxu1 %v2794_v54 }
 0x745   : > { %v6988_v63 = vpop.eup %6987 }
 0x746   : > { %v2681_v41 = vmul.f32 %v6988_v63, %v8202_v3  ;;  %v2680_v1 = vmul.f32 %v6988_v63, %v8199_v30 }
 0x747   : > { %v2644_v53 = vpop.xlane.xlu0 %2643 }
 0x748   : > { %v6990_v39 = vpop.eup %6989  ;;  %v2654_v26 = vmul.f32 0.00390625, %v2644_v53  ;;  %v2709_v0 = vmul.f32 %v8242_v38, %v2681_v41  ;;  %v2708_v62 = vmul.f32 %v8239_v45, %v2680_v1 }
 0x749   : > { %v2647_v49 = vpop.xlane.xlu1 %2646  ;;  %v2683_v29 = vmul.f32 %v6990_v39, %v8212_v7  ;;  %v2682_v42 = vmul.f32 %v6990_v39, %v8209_v24  ;;  %v1727_v7 = vadd.f32 %v1726_v4, %v8259_v56  ;;  %v1729_v24 = vadd.f32 %v1728_v36, %v8262_v47  ;;  %v1734_v4 = vpop.f32.mrf.mxu1 }
 0x74a   : > { %v2662_v32 = vadd.f32 1e-05, %v2654_v26  ;;  %v2655_v35 = vmul.f32 0.00390625, %v2647_v49  ;;  %v2737_v6 = vadd.f32 %v8252_v55, %v2709_v0  ;;  %v2736_v3 = vadd.f32 %v8249_v22, %v2708_v62 }
 0x74b   : > { %v2711_v30 = vmul.f32 %v8242_v38, %v2683_v29  ;;  %v2710_v23 = vmul.f32 %v8239_v45, %v2682_v42  ;;  %v1736_v26 = vpop.f32.mrf.mxu1 }
 0x74c   : > { %6991 = vrsqrt.f32 %v2662_v32  ;;  %v2663_v48 = vadd.f32 1e-05, %v2655_v35  ;;  %v2753_v61 = vadd.f32 %v2737_v6, %v1725_v31  ;;  %v2752_v28 = vadd.f32 %v2736_v3, %v1723_v46 }
 0x74d   : > { %v2739_v14 = vadd.f32 %v8252_v55, %v2711_v30  ;;  %v2738_v27 = vadd.f32 %v8249_v22, %v2710_v23  ;;  %v1738_v35 = vpop.f32.mrf.mxu1  ;;  %v1735_v23 = vadd.f32 %v1734_v4, %v8262_v47 }
 0x74e   : > { %6993 = vrsqrt.f32 %v2663_v48  ;;  %v1739_v46 = vadd.f32 %v1738_v35, %v8262_v47 }
 0x74f   : > { %v3434_v54 = vpack.c.bf16 %v2739_v14, %v2737_v6  ;;  %v3433_v63 = vpack.c.bf16 %v2738_v27, %v2736_v3  ;;  %v2755_v41 = vadd.f32 %v2739_v14, %v1729_v24  ;;  %v2754_v1 = vadd.f32 %v2738_v27, %v1727_v7 }
 0x751   : > { %3649 = vmatprep.mubr.bf16.mxu0 %v3434_v54  ;;  %v2797_v11 = vpack.c.bf16 %v2755_v41, %v2753_v61  ;;  %v2796_v53 = vpack.c.bf16 %v2754_v1, %v2752_v28  ;;  %v8324_v28 = vpop.f32.mrf.mxu1 }
 0x752   : > { %3650 = vmatmul.mubr.bf16.gmra.mxu0 %v3433_v63 }
 0x753   : > { %3024 = vmatprep.mubr.bf16.mxu1 %v2797_v11 }
 0x754   : > { %3025 = vmatmul.mubr.bf16.gmra.mxu1 %v2796_v53 }
 0x759   : > { %v6992_v39 = vpop.eup %6991 }
 0x75a   : > { %v2685_v0 = vmul.f32 %v6992_v39, %v8222_v8  ;;  %v2684_v62 = vmul.f32 %v6992_v39, %v8219_v40  ;;  %v1733_v40 = vadd.f32 %v1732_v50, %v8259_v56 }
 0x75b   : > { %v6994_v49 = vpop.eup %6993 }
 0x75c   : > { %v2687_v29 = vmul.f32 %v6994_v49, %v8228_v37  ;;  %v2713_v42 = vmul.f32 %v8242_v38, %v2685_v0  ;;  %v2686_v36 = vmul.f32 %v6994_v49, %v8225_v9  ;;  %v2712_v32 = vmul.f32 %v8239_v45, %v2684_v62  ;;  %v2800_v0 = vld [vmem:[#allocation10 + $0xd] sm:$0x3] }
 0x75d   : > { %v1737_v37 = vadd.f32 %v1736_v26, %v8259_v56  ;;  %v8326_v56 = vpop.f32.mrf.mxu1  ;;  %v8355_v62 = vrot.slane %v2800_v0, %v7811_v44 }
 0x75e   : > { %v2715_v6 = vmul.f32 %v8242_v38, %v2687_v29  ;;  %v2741_v3 = vadd.f32 %v8252_v55, %v2713_v42  ;;  %v2714_v30 = vmul.f32 %v8239_v45, %v2686_v36  ;;  %v2740_v8 = vadd.f32 %v8249_v22, %v2712_v32  ;;  %9178 = vst [vmem:[#allocation18_spill] sm:$0xff] %v8326_v56 }
 0x75f   : > { %v8328_v47 = vpop.f32.mrf.mxu1  ;;  %v8360_v29 = vrot.slane %v2800_v0, %v7963_v59 }
 0x760   : > { %v2743_v9 = vadd.f32 %v8252_v55, %v2715_v6  ;;  %v2742_v31 = vadd.f32 %v8249_v22, %v2714_v30  ;;  %v2757_v48 = vadd.f32 %v2741_v3, %v1735_v23  ;;  %v2756_v38 = vadd.f32 %v2740_v8, %v1733_v40 }
 0x761   : > { %v8330_v55 = vpop.f32.mrf.mxu1 }
 0x762   : > { %v3436_v7 = vpack.c.bf16 %v2743_v9, %v2741_v3  ;;  %v3435_v24 = vpack.c.bf16 %v2742_v31, %v2740_v8  ;;  %v2759_v14 = vadd.f32 %v2743_v9, %v1739_v46  ;;  %v2758_v45 = vadd.f32 %v2742_v31, %v1737_v37  ;;  %9179 = vst [vmem:[#allocation19_spill] sm:$0xff] %v8330_v55 }
 0x763   : > { %v8332_v22 = vpop.f32.mrf.mxu1 }
 0x764   : > { %3659 = vmatprep.mubr.bf16.mxu0 %v3436_v7  ;;  %v2799_v27 = vpack.c.bf16 %v2759_v14, %v2757_v48  ;;  %v2798_v61 = vpack.c.bf16 %v2758_v45, %v2756_v38 }
 0x765   : > { %3660 = vmatmul.mubr.bf16.gmra.mxu0 %v3435_v24  ;;  %v8334_v54 = vpop.f32.mrf.mxu1 }
 0x766   : > { %3034 = vmatprep.mubr.bf16.mxu1 %v2799_v27  ;;  %9180 = vst [vmem:[#allocation20_spill] sm:$0xff] %v8334_v54 }
 0x767   : > { %3035 = vmatmul.mubr.bf16.gmra.mxu1 %v2798_v61  ;;  %v8336_v63 = vpop.f32.mrf.mxu1 }
 0x769   : > { %v8338_v41 = vpop.f32.mrf.mxu1 }
 0x76a   : > { %9181 = vst [vmem:[#allocation21_spill] sm:$0xff] %v8338_v41 }
 0x76b   : > { %v8340_v1 = vpop.f32.mrf.mxu1 }
 0x76d   : > { %v8342_v50 = vpop.f32.mrf.mxu1 }
 0x76e   : > { %9182 = vst [vmem:[#allocation22_spill] sm:$0xff] %v8342_v50 }
 0x76f   : > { %v8344_v11 = vpop.f32.mrf.mxu1 }
 0x771   : > { %v8346_v53 = vpop.f32.mrf.mxu1 }
 0x772   : > { %9183 = vst [vmem:[#allocation23_spill] sm:$0xff] %v8346_v53 }
 0x773   : > { %v8348_v4 = vpop.f32.mrf.mxu1 }
 0x774   : > { %9184 = vst [vmem:[#allocation24_spill] sm:$0xff] %v8348_v4 }
 0x775   : > { %v8350_v39 = vpop.f32.mrf.mxu1 }
 0x776   : > { %9185 = vst [vmem:[#allocation25_spill] sm:$0xff] %v8350_v39 }
 0x777   : > { %v8352_v26 = vpop.f32.mrf.mxu1 }
 0x778   : > { %9186 = vst [vmem:[#allocation26_spill] sm:$0xff] %v8352_v26 }
 0x779   : > { %v8357_v49 = vpop.f32.mrf.mxu1 }
 0x77a   : > { %9187 = vst [vmem:[#allocation27_spill] sm:$0xff] %v8357_v49 }
 0x7f3   : > { %v3006_v42 = vpop.f32.mrf.mxu1 }
 0x7f4   : > { %v3007_v36 = vadd.f32 %v3006_v42, %v8355_v62 }
 0x7f5   : > { %v3008_v32 = vpop.f32.mrf.mxu1 }
 0x7f6   : > { %v5816_v35 = vmul.f32 -1.442695, %v3007_v36  ;;  %v3009_v6 = vadd.f32 %v3008_v32, %v8360_v29 }
 0x7f7   : > { %v3010_v3 = vpop.f32.mrf.mxu1 }
 0x7f8   : > { %6995 = vpow2.f32 %v5816_v35  ;;  %v5817_v30 = vmul.f32 -1.442695, %v3009_v6  ;;  %v8365_v8 = vadd.f32 %v3010_v3, %v8355_v62 }
 0x7f9   : > { %v3012_v40 = vpop.f32.mrf.mxu1 }
 0x7fa   : > { %6997 = vpow2.f32 %v5817_v30  ;;  %v5818_v23 = vmul.f32 -1.442695, %v8365_v8  ;;  %v8369_v37 = vadd.f32 %v3012_v40, %v8360_v29 }
 0x7fc   : > { %6999 = vpow2.f32 %v5818_v23  ;;  %v5819_v46 = vmul.f32 -1.442695, %v8369_v37 }
 0x7fe   : > { %7001 = vpow2.f32 %v5819_v46 }
 0x802   : > { %v3016_v9 = vpop.f32.mrf.mxu1 }
 0x803   : > { %v8373_v31 = vadd.f32 %v3016_v9, %v8355_v62 }
 0x804   : > { %v3018_v48 = vpop.f32.mrf.mxu1 }
 0x805   : > { %v6996_v38 = vpop.eup %6995  ;;  %v5820_v7 = vmul.f32 -1.442695, %v8373_v31  ;;  %v8377_v24 = vadd.f32 %v3018_v48, %v8360_v29 }
 0x806   : > { %v3093_v14 = vadd.f32 1.0, %v6996_v38  ;;  %v3020_v45 = vpop.f32.mrf.mxu1 }
 0x807   : > { %v6998_v27 = vpop.eup %6997  ;;  %7003 = vpow2.f32 %v5820_v7  ;;  %v5821_v61 = vmul.f32 -1.442695, %v8377_v24  ;;  %v8381_v0 = vadd.f32 %v3020_v45, %v8355_v62 }
 0x808   : > { %7005 = vrcp.f32 %v3093_v14  ;;  %v3094_v42 = vadd.f32 1.0, %v6998_v27  ;;  %v3022_v32 = vpop.f32.mrf.mxu1 }
 0x809   : > { %v7000_v35 = vpop.eup %6999  ;;  %7007 = vpow2.f32 %v5821_v61  ;;  %v5822_v3 = vmul.f32 -1.442695, %v8381_v0  ;;  %v8385_v30 = vadd.f32 %v3022_v32, %v8360_v29 }
 0x80a   : > { %7009 = vrcp.f32 %v3094_v42  ;;  %v3095_v40 = vadd.f32 1.0, %v7000_v35 }
 0x80b   : > { %v7002_v23 = vpop.eup %7001  ;;  %7011 = vpow2.f32 %v5822_v3  ;;  %v5823_v46 = vmul.f32 -1.442695, %v8385_v30 }
 0x80c   : > { %7013 = vrcp.f32 %v3095_v40  ;;  %v3096_v9 = vadd.f32 1.0, %v7002_v23 }
 0x80d   : > { %7015 = vpow2.f32 %v5823_v46 }
 0x80e   : > { %7017 = vrcp.f32 %v3096_v9 }
 0x814   : > { %v7004_v48 = vpop.eup %7003  ;;  %v3026_v38 = vpop.f32.mrf.mxu1 }
 0x815   : > { %v7006_v7 = vpop.eup %7005  ;;  %v3097_v14 = vadd.f32 1.0, %v7004_v48  ;;  %v8389_v45 = vadd.f32 %v3026_v38, %v8355_v62 }
 0x816   : > { %v7008_v27 = vpop.eup %7007  ;;  %v3028_v61 = vpop.f32.mrf.mxu1  ;;  %v8395_v23 = vmul.f32 %v7006_v7, %v3007_v36 }
 0x817   : > { %v7010_v32 = vpop.eup %7009  ;;  %7019 = vrcp.f32 %v3097_v14  ;;  %v3098_v42 = vadd.f32 1.0, %v7008_v27  ;;  %v5824_v35 = vmul.f32 -1.442695, %v8389_v45  ;;  %v8393_v3 = vadd.f32 %v3028_v61, %v8360_v29 }
 0x818   : > { %v7012_v40 = vpop.eup %7011  ;;  %v8397_v46 = vmul.f32 %v7010_v32, %v3009_v6  ;;  %v3030_v9 = vpop.f32.mrf.mxu1 }
 0x819   : > { %v7014_v48 = vpop.eup %7013  ;;  %7021 = vrcp.f32 %v3098_v42  ;;  %v3099_v38 = vadd.f32 1.0, %v7012_v40  ;;  %v5825_v49 = vmul.f32 -1.442695, %v8393_v3  ;;  %v8401_v39 = vadd.f32 %v3030_v9, %v8355_v62 }
 0x81a   : > { %v7016_v14 = vpop.eup %7015  ;;  %7023 = vpow2.f32 %v5824_v35  ;;  %v3032_v27 = vpop.f32.mrf.mxu1  ;;  %v3157_v61 = vadd.f32 %v8397_v46, %v8395_v23  ;;  %v8408_v32 = vmul.f32 %v7014_v48, %v8365_v8 }
 0x81b   : > { %v7018_v53 = vpop.eup %7017  ;;  %7025 = vrcp.f32 %v3099_v38  ;;  %v3100_v36 = vadd.f32 1.0, %v7016_v14  ;;  %v5826_v6 = vmul.f32 -1.442695, %v8401_v39  ;;  %v3033_v7 = vadd.f32 %v3032_v27, %v8360_v29 }
 0x81c   : > { %v8411_v42 = vmul.f32 %v7018_v53, %v8369_v37  ;;  %7027 = vpow2.f32 %v5825_v49  ;;  %3158 = vadd.xlane.f32.xlu0 %v3157_v61 }
 0x81d   : > { %7029 = vrcp.f32 %v3100_v36  ;;  %v5827_v35 = vmul.f32 -1.442695, %v3033_v7 }
 0x81e   : > { %7031 = vpow2.f32 %v5826_v6  ;;  %v3160_v40 = vadd.f32 %v8411_v42, %v8408_v32 }
 0x81f   : > { %7033 = vpow2.f32 %v5827_v35 }
 0x820   : > { %3161 = vadd.xlane.f32.xlu1 %v3160_v40 }
 0x824   : > { %v7020_v9 = vpop.eup %7019 }
 0x825   : > { %v8416_v27 = vmul.f32 %v7020_v9, %v8373_v31 }
 0x826   : > { %v7022_v38 = vpop.eup %7021 }
 0x827   : > { %v7024_v14 = vpop.eup %7023  ;;  %v8419_v8 = vmul.f32 %v7022_v38, %v8377_v24  ;;  %v3036_v53 = vpop.f32.mrf.mxu1 }
 0x828   : > { %v7026_v49 = vpop.eup %7025  ;;  %v3101_v37 = vadd.f32 1.0, %v7024_v14  ;;  %v3037_v48 = vadd.f32 %v3036_v53, %v8355_v62 }
 0x829   : > { %v7028_v61 = vpop.eup %7027  ;;  %v3038_v36 = vpop.f32.mrf.mxu1  ;;  %v3163_v6 = vadd.f32 %v8419_v8, %v8416_v27  ;;  %v8426_v24 = vmul.f32 %v7026_v49, %v8381_v0 }
 0x82a   : > { %v7030_v35 = vpop.eup %7029  ;;  %7035 = vrcp.f32 %v3101_v37  ;;  %v3102_v40 = vadd.f32 1.0, %v7028_v61  ;;  %v5828_v50 = vmul.f32 -1.442695, %v3037_v48  ;;  %v3039_v31 = vadd.f32 %v3038_v36, %v8360_v29 }
 0x82b   : > { %v7032_v9 = vpop.eup %7031  ;;  %v8429_v38 = vmul.f32 %v7030_v35, %v8385_v30  ;;  %3164 = vadd.xlane.f32.xlu0 %v3163_v6  ;;  %v3040_v14 = vpop.f32.mrf.mxu1 }
 0x82c   : > { %v7034_v53 = vpop.eup %7033  ;;  %7037 = vrcp.f32 %v3102_v40  ;;  %v3103_v41 = vadd.f32 1.0, %v7032_v9  ;;  %v5829_v54 = vmul.f32 -1.442695, %v3039_v31  ;;  %v3041_v55 = vadd.f32 %v3040_v14, %v8355_v62 }
 0x82d   : > { %v3104_v37 = vadd.f32 1.0, %v7034_v53  ;;  %7039 = vpow2.f32 %v5828_v50  ;;  %v3042_v61 = vpop.f32.mrf.mxu1  ;;  %v3166_v36 = vadd.f32 %v8429_v38, %v8426_v24 }
 0x82e   : > { %7041 = vrcp.f32 %v3103_v41  ;;  %v5830_v0 = vmul.f32 -1.442695, %v3041_v55  ;;  %v3043_v49 = vadd.f32 %v3042_v61, %v8360_v29 }
 0x82f   : > { %7043 = vrcp.f32 %v3104_v37  ;;  %3167 = vadd.xlane.f32.xlu1 %v3166_v36 }
 0x830   : > { %7045 = vpow2.f32 %v5829_v54  ;;  %v5831_v30 = vmul.f32 -1.442695, %v3043_v49 }
 0x831   : > { %7047 = vpow2.f32 %v5830_v0 }
 0x832   : > { %7049 = vpow2.f32 %v5831_v30 }
 0x837   : > { %v7036_v6 = vpop.eup %7035 }
 0x838   : > { %v8436_v62 = vmul.f32 %v7036_v6, %v8389_v45 }
 0x839   : > { %v7038_v35 = vpop.eup %7037 }
 0x83a   : > { %v7040_v40 = vpop.eup %7039  ;;  %v8439_v50 = vmul.f32 %v7038_v35, %v8393_v3 }
 0x83b   : > { %v7042_v9 = vpop.eup %7041  ;;  %v3105_v41 = vadd.f32 1.0, %v7040_v40 }
 0x83c   : > { %v7044_v14 = vpop.eup %7043  ;;  %v3169_v29 = vadd.f32 %v8439_v50, %v8436_v62  ;;  %v8444_v54 = vmul.f32 %v7042_v9, %v8401_v39 }
 0x83d   : > { %v7046_v53 = vpop.eup %7045  ;;  %v8446_v37 = vmul.f32 %v7044_v14, %v3033_v7  ;;  %7051 = vrcp.f32 %v3105_v41 }
 0x83e   : > { %v7048_v61 = vpop.eup %7047  ;;  %v3106_v36 = vadd.f32 1.0, %v7046_v53  ;;  %3170 = vadd.xlane.f32.xlu0 %v3169_v29 }
 0x83f   : > { %v7050_v45 = vpop.eup %7049  ;;  %v3107_v0 = vadd.f32 1.0, %v7048_v61  ;;  %v3172_v3 = vadd.f32 %v8446_v37, %v8444_v54  ;;  %v6731_v61 = vld [vmem:[#allocation8 + $0x3e0] ss:$68 sps:$4 sm:$0xff]  }
 0x840   : > { %7053 = vrcp.f32 %v3106_v36  ;;  %v3108_v30 = vadd.f32 1.0, %v7050_v45  ;;  %v6733_v36 = vld [vmem:[#allocation8 + $0x3e4] ss:$68 sps:$4 sm:$0xff]   ;;  %v6736_v45 = vld [vmem:[#allocation8 + $0x35c] ss:$68 sps:$4 sm:$0xff]  }
 0x841   : > { %7055 = vrcp.f32 %v3107_v0  ;;  %3173 = vadd.xlane.f32.xlu1 %v3172_v3  ;;  %3830 = vmatprep.subr.bf16.mxu1 %v6733_v36  ;;  %v6740_v0 = vld [vmem:[#allocation8 + $0x248] ss:$68 sps:$4 sm:$0xff]  }
 0x842   : > { %7057 = vrcp.f32 %v3108_v30  ;;  %3831 = vmatpush1.bf16.msra.mxu1 %v6731_v61  ;;  %v6745_v3 = vld [vmem:[#allocation8 + $0x1c4] ss:$68 sps:$4 sm:$0xff]  }
 0x843   : > { %3832 = vmatprep.subr.bf16.mxu1 %v6736_v45  ;;  %v6743_v30 = vld [vmem:[#allocation8 + $0x1c0] ss:$68 sps:$4 sm:$0xff]  }
 0x84a   : > { %v7052_v6 = vpop.eup %7051 }
 0x84b   : > { %v8450_v40 = vmul.f32 %v7052_v6, %v3037_v48  ;;  %v6734_v48 = vld [vmem:[#allocation8 + $0x358] ss:$68 sps:$4 sm:$0xff]  }
 0x84c   : > { %3833 = vmatpush1.bf16.msra.mxu1 %v6734_v48  ;;  %v6748_v6 = vld [vmem:[#allocation8 + $0x13c] ss:$68 sps:$4 sm:$0xff]  }
 0x84d   : > { %v7054_v35 = vpop.eup %7053 }
 0x84e   : > { %v7056_v39 = vpop.eup %7055  ;;  %v8452_v7 = vmul.f32 %v7054_v35, %v3039_v31  ;;  %v6739_v31 = vld [vmem:[#allocation8 + $0x2d4] ss:$68 sps:$4 sm:$0xff]  }
 0x84f   : > { %v7058_v9 = vpop.eup %7057  ;;  %v8454_v41 = vmul.f32 %v7056_v39, %v3041_v55  ;;  %v6737_v55 = vld [vmem:[#allocation8 + $0x2d0] ss:$68 sps:$4 sm:$0xff]   ;;  %3834 = vmatprep.subr.bf16.mxu1 %v6739_v31  ;;  %v6746_v35 = vld [vmem:[#allocation8 + $0x138] ss:$68 sps:$4 sm:$0xff]  }
 0x850   : > { %v8456_v14 = vmul.f32 %v7058_v9, %v3043_v49  ;;  %v3175_v29 = vadd.f32 %v8452_v7, %v8450_v40  ;;  %v6742_v49 = vld [vmem:[#allocation8 + $0x24c] ss:$68 sps:$4 sm:$0xff]   ;;  %3835 = vmatpush1.bf16.msra.mxu1 %v6737_v55  ;;  %v6751_v39 = vld [vmem:[#allocation8 + $0xb4] ss:$68 sps:$4 sm:$0xff]  }
 0x851   : > { %3836 = vmatprep.subr.bf16.mxu1 %v6742_v49  ;;  %v6749_v9 = vld [vmem:[#allocation8 + $0xb0] ss:$68 sps:$4 sm:$0xff]  }
 0x852   : > { %3176 = vadd.xlane.f32.xlu0 %v3175_v29  ;;  %v3178_v53 = vadd.f32 %v8456_v14, %v8454_v41  ;;  %v6754_v29 = vld [vmem:[#allocation8 + $0x2c] ss:$68 sps:$4 sm:$0xff]  }
 0x854   : > { %3179 = vadd.xlane.f32.xlu1 %v3178_v53  ;;  %3837 = vmatpush1.bf16.msra.mxu1 %v6740_v0  ;;  %v6752_v53 = vld [vmem:[#allocation8 + $0x28] ss:$68 sps:$4 sm:$0xff]  }
 0x855   : > { %3838 = vmatprep.subr.bf16.mxu1 %v6745_v3 }
 0x858   : > { %3839 = vmatpush1.bf16.msra.mxu1 %v6743_v30 }
 0x859   : > { %3840 = vmatprep.subr.bf16.mxu1 %v6748_v6 }
 0x85c   : > { %3841 = vmatpush1.bf16.msra.mxu1 %v6746_v35 }
 0x85d   : > { %3842 = vmatprep.subr.bf16.mxu1 %v6751_v39 }
 0x860   : > { %3843 = vmatpush1.bf16.msra.mxu1 %v6749_v9 }
 0x861   : > { %3844 = vmatprep.subr.bf16.mxu1 %v6754_v29 }
 0x864   : > { %3845 = vmatpush1.bf16.msra.mxu1 %v6752_v53 }
 0x8a5   : > { %v3159_v61 = vpop.xlane.xlu0 %3158 }
 0x8a6   : > { %v3181_v36 = vmul.f32 0.00390625, %v3159_v61 }
 0x8a8   : > { %v8463_v45 = vsub.f32 %v8395_v23, %v3181_v36  ;;  %v8466_v48 = vsub.f32 %v8397_v46, %v3181_v36 }
 0x8a9   : > { %v3162_v31 = vpop.xlane.xlu1 %3161 }
 0x8aa   : > { %v3182_v55 = vmul.f32 0.00390625, %v3162_v31  ;;  %v3205_v49 = vmul.f32 %v8463_v45, %v8463_v45  ;;  %v3206_v0 = vmul.f32 %v8466_v48, %v8466_v48  ;;  %v6757_v31 = vld [vmem:[#allocation8 + $0x824] ss:$68 sps:$4 sm:$0xff]  }
 0x8ab   : > { %3846 = vmatprep.subr.bf16.mxu1 %v6757_v31 }
 0x8ac   : > { %v8473_v3 = vsub.f32 %v8408_v32, %v3182_v55  ;;  %v8476_v30 = vsub.f32 %v8411_v42, %v3182_v55  ;;  %v3221_v6 = vadd.f32 %v3206_v0, %v3205_v49  ;;  %v6755_v55 = vld [vmem:[#allocation8 + $0x820] ss:$68 sps:$4 sm:$0xff]  }
 0x8ad   : > { %3847 = vmatpush2.bf16.msra.mxu1 %v6755_v55 }
 0x8ae   : > { %3222 = vadd.xlane.f32.xlu0 %v3221_v6  ;;  %v3207_v23 = vmul.f32 %v8473_v3, %v8473_v3  ;;  %v3208_v46 = vmul.f32 %v8476_v30, %v8476_v30 }
 0x8b0   : > { %v3224_v35 = vadd.f32 %v3208_v46, %v3207_v23  ;;  %v6760_v23 = vld [vmem:[#allocation8 + $0x79c] ss:$68 sps:$4 sm:$0xff]  }
 0x8b1   : > { %v6758_v46 = vld [vmem:[#allocation8 + $0x798] ss:$68 sps:$4 sm:$0xff]   ;;  %3848 = vmatprep.subr.bf16.mxu1 %v6760_v23 }
 0x8b2   : > { %3225 = vadd.xlane.f32.xlu1 %v3224_v35  ;;  %3849 = vmatpush2.bf16.msra.mxu1 %v6758_v46 }
 0x8b4   : > { %v3165_v39 = vpop.xlane.xlu0 %3164 }
 0x8b5   : > { %v3183_v9 = vmul.f32 0.00390625, %v3165_v39  ;;  %v6761_v39 = vld [vmem:[#allocation8 + $0x710] ss:$68 sps:$4 sm:$0xff]  }
 0x8b7   : > { %v8483_v29 = vsub.f32 %v8416_v27, %v3183_v9  ;;  %v8486_v32 = vsub.f32 %v8419_v8, %v3183_v9  ;;  %v6764_v9 = vld [vmem:[#allocation8 + $0x688] ss:$68 sps:$4 sm:$0xff]  }
 0x8b8   : > { %v3168_v42 = vpop.xlane.xlu1 %3167 }
 0x8b9   : > { %v3184_v53 = vmul.f32 0.00390625, %v3168_v42  ;;  %v3209_v61 = vmul.f32 %v8483_v29, %v8483_v29  ;;  %v3210_v36 = vmul.f32 %v8486_v32, %v8486_v32 }
 0x8bb   : > { %v8493_v49 = vsub.f32 %v8426_v24, %v3184_v53  ;;  %v8496_v0 = vsub.f32 %v8429_v38, %v3184_v53  ;;  %v3227_v27 = vadd.f32 %v3210_v36, %v3209_v61  ;;  %v6763_v24 = vld [vmem:[#allocation8 + $0x714] ss:$68 sps:$4 sm:$0xff]   ;;  %v6766_v38 = vld [vmem:[#allocation8 + $0x68c] ss:$68 sps:$4 sm:$0xff]   ;;  %v6769_v61 = vld [vmem:[#allocation8 + $0x604] ss:$68 sps:$4 sm:$0xff]  }
 0x8bc   : > { %3850 = vmatprep.subr.bf16.mxu1 %v6763_v24  ;;  %v6770_v24 = vld [vmem:[#allocation8 + $0x578] ss:$68 sps:$4 sm:$0xff]  }
 0x8bd   : > { %3228 = vadd.xlane.f32.xlu0 %v3227_v27  ;;  %v3211_v8 = vmul.f32 %v8493_v49, %v8493_v49  ;;  %v3212_v6 = vmul.f32 %v8496_v0, %v8496_v0  ;;  %3851 = vmatpush2.bf16.msra.mxu1 %v6761_v39  ;;  %v6767_v27 = vld [vmem:[#allocation8 + $0x600] ss:$68 sps:$4 sm:$0xff]  }
 0x8be   : > { %3852 = vmatprep.subr.bf16.mxu1 %v6766_v38 }
 0x8bf   : > { %v3230_v35 = vadd.f32 %v3212_v6, %v3211_v8 }
 0x8c1   : > { %3231 = vadd.xlane.f32.xlu1 %v3230_v35  ;;  %3853 = vmatpush2.bf16.msra.mxu1 %v6764_v9  ;;  %v6772_v35 = vld [vmem:[#allocation8 + $0x57c] ss:$68 sps:$4 sm:$0xff]   ;;  %v6773_v9 = vld [vmem:[#allocation8 + $0x4f0] ss:$68 sps:$4 sm:$0xff]  }
 0x8c2   : > { %3854 = vmatprep.subr.bf16.mxu1 %v6769_v61 }
 0x8c5   : > { %3855 = vmatpush2.bf16.msra.mxu1 %v6767_v27 }
 0x8c6   : > { %3856 = vmatprep.subr.bf16.mxu1 %v6772_v35 }
 0x8c7   : > { %v3171_v42 = vpop.xlane.xlu0 %3170 }
 0x8c8   : > { %v3185_v53 = vmul.f32 0.00390625, %v3171_v42  ;;  %v6775_v42 = vld [vmem:[#allocation8 + $0x4f4] ss:$68 sps:$4 sm:$0xff]  }
 0x8c9   : > { %3857 = vmatpush2.bf16.msra.mxu1 %v6770_v24 }
 0x8ca   : > { %v8503_v36 = vsub.f32 %v8436_v62, %v3185_v53  ;;  %v8506_v31 = vsub.f32 %v8439_v50, %v3185_v53  ;;  %v3174_v55 = vpop.xlane.xlu1 %3173  ;;  %3858 = vmatprep.subr.bf16.mxu1 %v6775_v42 }
 0x8cb   : > { %v3186_v8 = vmul.f32 0.00390625, %v3174_v55 }
 0x8cc   : > { %v3213_v6 = vmul.f32 %v8503_v36, %v8503_v36  ;;  %v3214_v23 = vmul.f32 %v8506_v31, %v8506_v31 }
 0x8cd   : > { %v8513_v46 = vsub.f32 %v8444_v54, %v3186_v8  ;;  %v8516_v62 = vsub.f32 %v8446_v37, %v3186_v8  ;;  %v6778_v54 = vld [vmem:[#allocation8 + $0x46c] ss:$68 sps:$4 sm:$0xff]   ;;  %3859 = vmatpush2.bf16.msra.mxu1 %v6773_v9 }
 0x8ce   : > { %v3233_v50 = vadd.f32 %v3214_v23, %v3213_v6  ;;  %v6776_v37 = vld [vmem:[#allocation8 + $0x468] ss:$68 sps:$4 sm:$0xff]   ;;  %3860 = vmatprep.subr.bf16.mxu1 %v6778_v54 }
 0x8cf   : > { %v3215_v39 = vmul.f32 %v8513_v46, %v8513_v46  ;;  %v3216_v38 = vmul.f32 %v8516_v62, %v8516_v62 }
 0x8d0   : > { %3234 = vadd.xlane.f32.xlu0 %v3233_v50 }
 0x8d1   : > { %v3236_v53 = vadd.f32 %v3216_v38, %v3215_v39  ;;  %3861 = vmatpush2.bf16.msra.mxu1 %v6776_v37 }
 0x8d3   : > { %3237 = vadd.xlane.f32.xlu1 %v3236_v53 }
 0x8db   : > { %v3177_v61 = vpop.xlane.xlu0 %3176 }
 0x8dc   : > { %v3187_v55 = vmul.f32 0.00390625, %v3177_v61  ;;  %v3285_v61 = vld [vmem:[#allocation10 + $0x18] sm:$0x3] }
 0x8dd   : > { %v3180_v27 = vpop.xlane.xlu1 %3179 }
 0x8de   : > { %v8523_v8 = vsub.f32 %v8450_v40, %v3187_v55  ;;  %v8526_v6 = vsub.f32 %v8452_v7, %v3187_v55  ;;  %v3188_v23 = vmul.f32 0.00390625, %v3180_v27 }
 0x8e0   : > { %v8529_v35 = vsub.f32 %v8454_v41, %v3188_v23  ;;  %v8532_v50 = vsub.f32 %v8456_v14, %v3188_v23  ;;  %v3217_v24 = vmul.f32 %v8523_v8, %v8523_v8  ;;  %v3218_v39 = vmul.f32 %v8526_v6, %v8526_v6 }
 0x8e1   : > { %v8543_v23 = vrot.slane %v3285_v61, %v7811_v44 }
 0x8e2   : > { %v3239_v38 = vadd.f32 %v3218_v39, %v3217_v24  ;;  %v3219_v40 = vmul.f32 %v8529_v35, %v8529_v35  ;;  %v3220_v7 = vmul.f32 %v8532_v50, %v8532_v50  ;;  %v8546_v24 = vrot.slane %v3285_v61, %v7963_v59 }
 0x8e4   : > { %3240 = vadd.xlane.f32.xlu0 %v3239_v38  ;;  %v3242_v9 = vadd.f32 %v3220_v7, %v3219_v40  ;;  %v933_v38 = vsub.s32 4, %v7808_v34  ;;  %v937_v40 = vsub.s32 5, %v7808_v34 }
 0x8e6   : > { %3243 = vadd.xlane.f32.xlu1 %v3242_v9  ;;  %v3313_v9 = vld [vmem:[#allocation10 + $0x21] sm:$0x3] }
 0x8e7   : > { %v8555_v61 = vrot.slane %v3313_v9, %v7811_v44 }
 0x937   : > { %v3223_v41 = vpop.xlane.xlu0 %3222 }
 0x938   : > { %v3245_v42 = vmul.f32 0.00390625, %v3223_v41 }
 0x93a   : > { %v3253_v14 = vadd.f32 1e-05, %v3245_v42 }
 0x93b   : > { %v3226_v53 = vpop.xlane.xlu1 %3225 }
 0x93c   : > { %7059 = vrsqrt.f32 %v3253_v14  ;;  %v3246_v54 = vmul.f32 0.00390625, %v3226_v53 }
 0x93e   : > { %v3254_v37 = vadd.f32 1e-05, %v3246_v54 }
 0x940   : > { %7061 = vrsqrt.f32 %v3254_v37 }
 0x946   : > { %v3229_v55 = vpop.xlane.xlu0 %3228 }
 0x947   : > { %v3247_v27 = vmul.f32 0.00390625, %v3229_v55  ;;  %v8558_v55 = vrot.slane %v3313_v9, %v7963_v59 }
 0x949   : > { %v7060_v39 = vpop.eup %7059  ;;  %v3255_v7 = vadd.f32 1e-05, %v3247_v27  ;;  %v8561_v27 = vrot.slane %v8256_v10, %v933_v38 }
 0x94a   : > { %v3269_v41 = vmul.f32 %v7060_v39, %v8463_v45  ;;  %v3232_v42 = vpop.xlane.xlu1 %3231  ;;  %v3270_v14 = vmul.f32 %v7060_v39, %v8466_v48  ;;  %v8564_v45 = vrot.slane %v8256_v10, %v937_v40 }
 0x94b   : > { %7063 = vrsqrt.f32 %v3255_v7  ;;  %v3248_v53 = vmul.f32 0.00390625, %v3232_v42  ;;  %v1776_v38 = vadd.f32 %v8020_v15, %v8561_v27 }
 0x94c   : > { %v3297_v54 = vmul.f32 %v8543_v23, %v3269_v41  ;;  %v3298_v37 = vmul.f32 %v8546_v24, %v3270_v14  ;;  %v1778_v10 = vadd.f32 %v8022_v16, %v8564_v45 }
 0x94d   : > { %v7062_v56 = vpop.eup %7061  ;;  %v3256_v48 = vadd.f32 1e-05, %v3248_v53 }
 0x94e   : > { %v3271_v39 = vmul.f32 %v7062_v56, %v8473_v3  ;;  %v3272_v7 = vmul.f32 %v7062_v56, %v8476_v30  ;;  %v3326_v9 = vadd.f32 %v8558_v55, %v3298_v37  ;;  %v3325_v14 = vadd.f32 %v8555_v61, %v3297_v54 }
 0x94f   : > { %7065 = vrsqrt.f32 %v3256_v48  ;;  %v1780_v3 = vadd.f32 %v8024_v43, %v8561_v27  ;;  %v1782_v56 = vadd.f32 %v8026_v51, %v8564_v45 }
 0x950   : > { %v3299_v41 = vmul.f32 %v8543_v23, %v3271_v39  ;;  %v3300_v42 = vmul.f32 %v8546_v24, %v3272_v7  ;;  %v3342_v53 = vadd.f32 %v3326_v9, %v1778_v10  ;;  %v3341_v48 = vadd.f32 %v3325_v14, %v1776_v38 }
 0x952   : > { %v3328_v30 = vadd.f32 %v8558_v55, %v3300_v42  ;;  %v3327_v40 = vadd.f32 %v8555_v61, %v3299_v41 }
 0x954   : > { %v3344_v37 = vadd.f32 %v3328_v30, %v1782_v56  ;;  %v3343_v54 = vadd.f32 %v3327_v40, %v1780_v3  ;;  %v1786_v40 = vadd.f32 %v8028_v18, %v8561_v27 }
 0x956   : > { %v3390_v39 = vpack.c.bf16 %v3344_v37, %v3342_v53  ;;  %v3389_v7 = vpack.c.bf16 %v3343_v54, %v3341_v48 }
 0x958   : > { %v7064_v15 = vpop.eup %7063  ;;  %3862 = vmatprep.mubr.bf16.mxu1 %v3390_v39 }
 0x959   : > { %v3235_v26 = vpop.xlane.xlu0 %3234  ;;  %3863 = vmatmul.mubr.bf16.vlgmr.msra.gmra.mxu1 %v3389_v7  ;;  %v3274_v16 = vmul.f32 %v7064_v15, %v8486_v32  ;;  %v3273_v43 = vmul.f32 %v7064_v15, %v8483_v29 }
 0x95a   : > { %v3249_v4 = vmul.f32 0.00390625, %v3235_v26 }
 0x95b   : > { %v3302_v51 = vmul.f32 %v8546_v24, %v3274_v16  ;;  %v3301_v42 = vmul.f32 %v8543_v23, %v3273_v43 }
 0x95c   : > { %v7066_v41 = vpop.eup %7065  ;;  %v3257_v9 = vadd.f32 1e-05, %v3249_v4  ;;  %v3238_v10 = vpop.xlane.xlu1 %3237  ;;  %v1788_v4 = vadd.f32 %v8030_v13, %v8564_v45 }
 0x95d   : > { %v3250_v14 = vmul.f32 0.00390625, %v3238_v10  ;;  %v3276_v38 = vmul.f32 %v7066_v41, %v8496_v0  ;;  %v3275_v3 = vmul.f32 %v7066_v41, %v8493_v49  ;;  %v3330_v56 = vadd.f32 %v8558_v55, %v3302_v51 }
 0x95e   : > { %7067 = vrsqrt.f32 %v3257_v9  ;;  %v3329_v29 = vadd.f32 %v8555_v61, %v3301_v42  ;;  %v1790_v0 = vadd.f32 %v8032_v2, %v8561_v27  ;;  %v1792_v49 = vadd.f32 %v8034_v58, %v8564_v45 }
 0x95f   : > { %v3258_v30 = vadd.f32 1e-05, %v3250_v14  ;;  %v3304_v32 = vmul.f32 %v8546_v24, %v3276_v38  ;;  %v3303_v26 = vmul.f32 %v8543_v23, %v3275_v3  ;;  %v3346_v48 = vadd.f32 %v3330_v56, %v1788_v4 }
 0x960   : > { %v3345_v39 = vadd.f32 %v3329_v29, %v1786_v40  ;;  %v1802_v29 = vadd.f32 %v8042_v57, %v8564_v45 }
 0x961   : > { %7069 = vrsqrt.f32 %v3258_v30  ;;  %v3332_v53 = vadd.f32 %v8558_v55, %v3304_v32  ;;  %v3331_v37 = vadd.f32 %v8555_v61, %v3303_v26  ;;  %v1796_v32 = vadd.f32 %v8036_v19, %v8561_v27 }
 0x962   : > { %v1798_v26 = vadd.f32 %v8038_v20, %v8564_v45 }
 0x963   : > { %v3348_v54 = vadd.f32 %v3332_v53, %v1792_v49  ;;  %v3347_v7 = vadd.f32 %v3331_v37, %v1790_v0 }
 0x965   : > { %v3392_v15 = vpack.c.bf16 %v3348_v54, %v3346_v48  ;;  %v3391_v18 = vpack.c.bf16 %v3347_v7, %v3345_v39 }
 0x967   : > { %3872 = vmatprep.mubr.bf16.mxu1 %v3392_v15 }
 0x968   : > { %3873 = vmatmul.mubr.bf16.gmra.mxu1 %v3391_v18 }
 0x96b   : > { %v7068_v13 = vpop.eup %7067 }
 0x96c   : > { %v3278_v16 = vmul.f32 %v7068_v13, %v8506_v31  ;;  %v3277_v2 = vmul.f32 %v7068_v13, %v8503_v36 }
 0x96d   : > { %v3241_v43 = vpop.xlane.xlu0 %3240 }
 0x96e   : > { %v7070_v58 = vpop.eup %7069  ;;  %v3251_v51 = vmul.f32 0.00390625, %v3241_v43  ;;  %v3306_v42 = vmul.f32 %v8546_v24, %v3278_v16  ;;  %v3305_v41 = vmul.f32 %v8543_v23, %v3277_v2 }
 0x96f   : > { %v3244_v9 = vpop.xlane.xlu1 %3243  ;;  %v3280_v10 = vmul.f32 %v7070_v58, %v8516_v62  ;;  %v3279_v14 = vmul.f32 %v7070_v58, %v8513_v46  ;;  %v1800_v46 = vadd.f32 %v8040_v52, %v8561_v27 }
 0x970   : > { %v3259_v38 = vadd.f32 1e-05, %v3251_v51  ;;  %v3252_v3 = vmul.f32 0.00390625, %v3244_v9  ;;  %v3334_v31 = vadd.f32 %v8558_v55, %v3306_v42  ;;  %v3333_v30 = vadd.f32 %v8555_v61, %v3305_v41 }
 0x971   : > { %v3308_v56 = vmul.f32 %v8546_v24, %v3280_v10  ;;  %v3307_v36 = vmul.f32 %v8543_v23, %v3279_v14 }
 0x972   : > { %7071 = vrsqrt.f32 %v3259_v38  ;;  %v3260_v62 = vadd.f32 1e-05, %v3252_v3  ;;  %v3350_v0 = vadd.f32 %v3334_v31, %v1798_v26  ;;  %v3349_v53 = vadd.f32 %v3333_v30, %v1796_v32 }
 0x973   : > { %v3336_v40 = vadd.f32 %v8558_v55, %v3308_v56  ;;  %v3335_v4 = vadd.f32 %v8555_v61, %v3307_v36 }
 0x974   : > { %7073 = vrsqrt.f32 %v3260_v62 }
 0x975   : > { %v3352_v49 = vadd.f32 %v3336_v40, %v1802_v29  ;;  %v3351_v19 = vadd.f32 %v3335_v4, %v1800_v46 }
 0x977   : > { %v3394_v37 = vpack.c.bf16 %v3352_v49, %v3350_v0  ;;  %v3393_v48 = vpack.c.bf16 %v3351_v19, %v3349_v53 }
 0x979   : > { %3882 = vmatprep.mubr.bf16.mxu1 %v3394_v37 }
 0x97a   : > { %3883 = vmatmul.mubr.bf16.gmra.mxu1 %v3393_v48 }
 0x97f   : > { %v7072_v20 = vpop.eup %7071 }
 0x980   : > { %v3282_v54 = vmul.f32 %v7072_v20, %v8526_v6  ;;  %v3281_v52 = vmul.f32 %v7072_v20, %v8523_v8  ;;  %v1806_v8 = vadd.f32 %v8044_v21, %v8561_v27  ;;  %v1808_v6 = vadd.f32 %v8046_v17, %v8564_v45  ;;  %v3631_v21 = vpop.f32.mrf.mxu0  ;;  %v3903_v17 = vld [vmem:[#allocation10 + $0xf] sm:$0x3] }
 0x981   : > { %v7074_v39 = vpop.eup %7073 }
 0x982   : > { %v3284_v57 = vmul.f32 %v7074_v39, %v8532_v50  ;;  %v3310_v7 = vmul.f32 %v8546_v24, %v3282_v54  ;;  %v3283_v15 = vmul.f32 %v7074_v39, %v8529_v35  ;;  %v3309_v18 = vmul.f32 %v8543_v23, %v3281_v52 }
 0x983   : > { %v1810_v50 = vadd.f32 %v8048_v5, %v8561_v27  ;;  %v1812_v35 = vadd.f32 %v8053_v25, %v8564_v45  ;;  %v3633_v5 = vpop.f32.mrf.mxu0  ;;  %v8644_v27 = vrot.slane %v3903_v17, %v7811_v44 }
 0x984   : > { %v3312_v13 = vmul.f32 %v8546_v24, %v3284_v57  ;;  %v3338_v16 = vadd.f32 %v8558_v55, %v3310_v7  ;;  %v3311_v2 = vmul.f32 %v8543_v23, %v3283_v15  ;;  %v3337_v43 = vadd.f32 %v8555_v61, %v3309_v18 }
 0x985   : > { %v3635_v45 = vpop.f32.mrf.mxu0 }
 0x986   : > { %v3340_v24 = vadd.f32 %v8558_v55, %v3312_v13  ;;  %v3339_v58 = vadd.f32 %v8555_v61, %v3311_v2  ;;  %v3354_v51 = vadd.f32 %v3338_v16, %v1808_v6  ;;  %v3353_v42 = vadd.f32 %v3337_v43, %v1806_v8 }
 0x987   : > { %v8647_v61 = vrot.slane %v3903_v17, %v7963_v59  ;;  %v3637_v32 = vpop.f32.mrf.mxu0 }
 0x988   : > { %v3356_v23 = vadd.f32 %v3340_v24, %v1812_v35  ;;  %v3355_v41 = vadd.f32 %v3339_v58, %v1810_v50 }
 0x989   : > { %v3641_v40 = vpop.f32.mrf.mxu0 }
 0x98a   : > { %v3396_v9 = vpack.c.bf16 %v3356_v23, %v3354_v51  ;;  %v3395_v10 = vpack.c.bf16 %v3355_v41, %v3353_v42 }
 0x98b   : > { %v3643_v53 = vpop.f32.mrf.mxu0 }
 0x98c   : > { %3892 = vmatprep.mubr.bf16.mxu1 %v3396_v9 }
 0x98d   : > { %3893 = vmatmul.mubr.bf16.gmra.mxu1 %v3395_v10  ;;  %v3645_v48 = vpop.f32.mrf.mxu0 }
 0x98e   : > { %5000 = vmatprep.mubr.bf16.mxu1 %v7980_v12 }
 0x98f   : > { %v3647_v13 = vpop.f32.mrf.mxu0 }
 0x991   : > { %v3651_v9 = vpop.f32.mrf.mxu0 }
 0xa19   : > { %v3864_v25 = vpop.f32.mrf.mxu1 }
 0xa1a   : > { %v3865_v55 = vadd.f32 %v3864_v25, %v3631_v21  ;;  %v3653_v21 = vpop.f32.mrf.mxu0 }
 0xa1b   : > { %v3866_v14 = vpop.f32.mrf.mxu1 }
 0xa1c   : > { %v8650_v38 = vadd.f32 %v8644_v27, %v3865_v55  ;;  %v3867_v3 = vadd.f32 %v3866_v14, %v3633_v5  ;;  %v3655_v55 = vpop.f32.mrf.mxu0 }
 0xa1d   : > { %v3868_v56 = vpop.f32.mrf.mxu1 }
 0xa1e   : > { %v5896_v31 = vmul.f32 -1.442695, %v8650_v38  ;;  %v8654_v36 = vadd.f32 %v8647_v61, %v3867_v3  ;;  %v3869_v30 = vadd.f32 %v3868_v56, %v3635_v45 }
 0xa1f   : > { %v3870_v26 = vpop.f32.mrf.mxu1 }
 0xa20   : > { %7075 = vpow2.f32 %v5896_v31  ;;  %v5897_v62 = vmul.f32 -1.442695, %v8654_v36  ;;  %v8658_v46 = vadd.f32 %v8644_v27, %v3869_v30  ;;  %v3871_v29 = vadd.f32 %v3870_v26, %v3637_v32 }
 0xa22   : > { %7077 = vpow2.f32 %v5897_v62  ;;  %v5898_v4 = vmul.f32 -1.442695, %v8658_v46  ;;  %v8662_v0 = vadd.f32 %v8647_v61, %v3871_v29 }
 0xa24   : > { %7079 = vpow2.f32 %v5898_v4  ;;  %v5899_v49 = vmul.f32 -1.442695, %v8662_v0 }
 0xa26   : > { %7081 = vpow2.f32 %v5899_v49  ;;  %v3657_v49 = vpop.f32.mrf.mxu0 }
 0xa28   : > { %v3874_v19 = vpop.f32.mrf.mxu1 }
 0xa29   : > { %v3875_v37 = vadd.f32 %v3874_v19, %v3641_v40 }
 0xa2a   : > { %v3876_v20 = vpop.f32.mrf.mxu1 }
 0xa2b   : > { %v8666_v54 = vadd.f32 %v8644_v27, %v3875_v37  ;;  %v3877_v52 = vadd.f32 %v3876_v20, %v3643_v53 }
 0xa2c   : > { %v3878_v39 = vpop.f32.mrf.mxu1 }
 0xa2d   : > { %v7076_v57 = vpop.eup %7075  ;;  %v5900_v7 = vmul.f32 -1.442695, %v8666_v54  ;;  %v8670_v15 = vadd.f32 %v8647_v61, %v3877_v52  ;;  %v3879_v18 = vadd.f32 %v3878_v39, %v3645_v48 }
 0xa2e   : > { %v3979_v16 = vadd.f32 1.0, %v7076_v57  ;;  %v3880_v2 = vpop.f32.mrf.mxu1 }
 0xa2f   : > { %v7078_v43 = vpop.eup %7077  ;;  %7083 = vpow2.f32 %v5900_v7  ;;  %v5901_v8 = vmul.f32 -1.442695, %v8670_v15  ;;  %v8674_v6 = vadd.f32 %v8644_v27, %v3879_v18  ;;  %v3881_v50 = vadd.f32 %v3880_v2, %v3647_v13 }
 0xa30   : > { %7085 = vrcp.f32 %v3979_v16  ;;  %v3980_v35 = vadd.f32 1.0, %v7078_v43 }
 0xa31   : > { %v7080_v24 = vpop.eup %7079  ;;  %7087 = vpow2.f32 %v5901_v8  ;;  %v5902_v58 = vmul.f32 -1.442695, %v8674_v6  ;;  %v8678_v51 = vadd.f32 %v8647_v61, %v3881_v50 }
 0xa32   : > { %7089 = vrcp.f32 %v3980_v35  ;;  %v3981_v23 = vadd.f32 1.0, %v7080_v24  ;;  %v3661_v24 = vpop.f32.mrf.mxu0 }
 0xa33   : > { %v7082_v42 = vpop.eup %7081  ;;  %7091 = vpow2.f32 %v5902_v58  ;;  %v5903_v41 = vmul.f32 -1.442695, %v8678_v51 }
 0xa34   : > { %7093 = vrcp.f32 %v3981_v23  ;;  %v3982_v10 = vadd.f32 1.0, %v7082_v42  ;;  %v3663_v58 = vpop.f32.mrf.mxu0 }
 0xa35   : > { %7095 = vpow2.f32 %v5903_v41 }
 0xa36   : > { %7097 = vrcp.f32 %v3982_v10  ;;  %v3665_v10 = vpop.f32.mrf.mxu0 }
 0xa3a   : > { %v3884_v17 = vpop.f32.mrf.mxu1 }
 0xa3b   : > { %v3885_v5 = vadd.f32 %v3884_v17, %v3651_v9 }
 0xa3c   : > { %v7084_v25 = vpop.eup %7083  ;;  %v3886_v45 = vpop.f32.mrf.mxu1 }
 0xa3d   : > { %v7086_v14 = vpop.eup %7085  ;;  %v3983_v3 = vadd.f32 1.0, %v7084_v25  ;;  %v8682_v56 = vadd.f32 %v8644_v27, %v3885_v5  ;;  %v3887_v31 = vadd.f32 %v3886_v45, %v3653_v21 }
 0xa3e   : > { %v7088_v30 = vpop.eup %7087  ;;  %v3888_v32 = vpop.f32.mrf.mxu1  ;;  %v8689_v37 = vmul.f32 %v7086_v14, %v8650_v38 }
 0xa3f   : > { %v7090_v26 = vpop.eup %7089  ;;  %7099 = vrcp.f32 %v3983_v3  ;;  %v3984_v62 = vadd.f32 1.0, %v7088_v30  ;;  %v5904_v29 = vmul.f32 -1.442695, %v8682_v56  ;;  %v8686_v40 = vadd.f32 %v8647_v61, %v3887_v31 }
 0xa40   : > { %v7092_v4 = vpop.eup %7091  ;;  %v3889_v53 = vadd.f32 %v3888_v32, %v3655_v55  ;;  %v3890_v19 = vpop.f32.mrf.mxu1  ;;  %v8692_v48 = vmul.f32 %v7090_v26, %v8654_v36 }
 0xa41   : > { %v7094_v20 = vpop.eup %7093  ;;  %7101 = vrcp.f32 %v3984_v62  ;;  %v3985_v52 = vadd.f32 1.0, %v7092_v4  ;;  %v5905_v39 = vmul.f32 -1.442695, %v8686_v40  ;;  %v3891_v57 = vadd.f32 %v3890_v19, %v3657_v49 }
 0xa42   : > { %v7096_v7 = vpop.eup %7095  ;;  %7103 = vpow2.f32 %v5904_v29  ;;  %v8696_v18 = vadd.f32 %v8644_v27, %v3889_v53  ;;  %v4043_v13 = vadd.f32 %v8692_v48, %v8689_v37  ;;  %v8705_v43 = vmul.f32 %v7094_v20, %v8658_v46  ;;  %v3667_v29 = vpop.f32.mrf.mxu0 }
 0xa43   : > { %v7098_v16 = vpop.eup %7097  ;;  %7105 = vrcp.f32 %v3985_v52  ;;  %v3986_v38 = vadd.f32 1.0, %v7096_v7  ;;  %v8701_v36 = vadd.f32 %v8647_v61, %v3891_v57 }
 0xa44   : > { %7107 = vpow2.f32 %v5905_v39  ;;  %v5906_v2 = vmul.f32 -1.442695, %v8696_v18  ;;  %4044 = vadd.xlane.f32.xlu0 %v4043_v13  ;;  %v8708_v8 = vmul.f32 %v7098_v16, %v8662_v0 }
 0xa45   : > { %7109 = vrcp.f32 %v3986_v38  ;;  %v5907_v50 = vmul.f32 -1.442695, %v8701_v36 }
 0xa46   : > { %7111 = vpow2.f32 %v5906_v2  ;;  %v4046_v35 = vadd.f32 %v8708_v8, %v8705_v43 }
 0xa47   : > { %7113 = vpow2.f32 %v5907_v50 }
 0xa48   : > { %4047 = vadd.xlane.f32.xlu1 %v4046_v35 }
 0xa4c   : > { %v7100_v23 = vpop.eup %7099 }
 0xa4d   : > { %v3894_v42 = vpop.f32.mrf.mxu1  ;;  %v8714_v0 = vmul.f32 %v7100_v23, %v8666_v54 }
 0xa4e   : > { %v7102_v41 = vpop.eup %7101  ;;  %v3895_v9 = vadd.f32 %v3894_v42, %v3661_v24 }
 0xa4f   : > { %v7104_v46 = vpop.eup %7103  ;;  %v3896_v21 = vpop.f32.mrf.mxu1  ;;  %v8717_v17 = vmul.f32 %v7102_v41, %v8670_v15 }
 0xa50   : > { %v7106_v5 = vpop.eup %7105  ;;  %v3987_v25 = vadd.f32 1.0, %v7104_v46  ;;  %v3927_v55 = vadd.f32 %v8644_v27, %v3895_v9  ;;  %v3897_v45 = vadd.f32 %v3896_v21, %v3663_v58 }
 0xa51   : > { %v7108_v14 = vpop.eup %7107  ;;  %v3898_v3 = vpop.f32.mrf.mxu1  ;;  %v4049_v31 = vadd.f32 %v8717_v17, %v8714_v0  ;;  %v8724_v49 = vmul.f32 %v7106_v5, %v8674_v6 }
 0xa52   : > { %v7110_v30 = vpop.eup %7109  ;;  %7115 = vrcp.f32 %v3987_v25  ;;  %v3988_v32 = vadd.f32 1.0, %v7108_v14  ;;  %v5908_v26 = vmul.f32 -1.442695, %v3927_v55  ;;  %v3928_v54 = vadd.f32 %v8647_v61, %v3897_v45 }
 0xa53   : > { %v7112_v62 = vpop.eup %7111  ;;  %v3899_v15 = vadd.f32 %v3898_v3, %v3665_v10  ;;  %4050 = vadd.xlane.f32.xlu0 %v4049_v31  ;;  %v3900_v4 = vpop.f32.mrf.mxu1  ;;  %v8727_v53 = vmul.f32 %v7110_v30, %v8678_v51 }
 0xa54   : > { %v7114_v19 = vpop.eup %7113  ;;  %7117 = vrcp.f32 %v3988_v32  ;;  %v3989_v20 = vadd.f32 1.0, %v7112_v62  ;;  %v5909_v52 = vmul.f32 -1.442695, %v3928_v54  ;;  %v3901_v39 = vadd.f32 %v3900_v4, %v3667_v29  ;;  %v6779_v62 = vld [vmem:[#allocation8 + $0x830] ss:$68 sps:$4 sm:$0xff]  }
 0xa55   : > { %v3990_v57 = vadd.f32 1.0, %v7114_v19  ;;  %7119 = vpow2.f32 %v5908_v26  ;;  %v3929_v7 = vadd.f32 %v8644_v27, %v3899_v15  ;;  %v4052_v13 = vadd.f32 %v8727_v53, %v8724_v49  ;;  %6063 = vmatprep.subr.bf16.mxu0 %v6779_v62  ;;  %v6789_v62 = vld [vmem:[#allocation8 + $0x588] ss:$68 sps:$4 sm:$0xff]  }
 0xa56   : > { %7121 = vrcp.f32 %v3989_v20  ;;  %v3930_v16 = vadd.f32 %v8647_v61, %v3901_v39 }
 0xa57   : > { %7123 = vrcp.f32 %v3990_v57  ;;  %v5910_v6 = vmul.f32 -1.442695, %v3929_v7  ;;  %4053 = vadd.xlane.f32.xlu1 %v4052_v13 }
 0xa58   : > { %7125 = vpow2.f32 %v5909_v52  ;;  %v5911_v51 = vmul.f32 -1.442695, %v3930_v16 }
 0xa59   : > { %7127 = vpow2.f32 %v5910_v6 }
 0xa5a   : > { %7129 = vpow2.f32 %v5911_v51 }
 0xa5f   : > { %v7116_v38 = vpop.eup %7115 }
 0xa60   : > { %v8734_v35 = vmul.f32 %v7116_v38, %v8682_v56  ;;  %v6780_v38 = vld [vmem:[#allocation8 + $0x3f0] ss:$68 sps:$4 sm:$0xff]  }
 0xa61   : > { %v7118_v2 = vpop.eup %7117  ;;  %6064 = vmatpush3.bf16.msra.mxu0 %v6780_v38 }
 0xa62   : > { %v7120_v50 = vpop.eup %7119  ;;  %v8737_v27 = vmul.f32 %v7118_v2, %v8686_v40 }
 0xa63   : > { %v7122_v24 = vpop.eup %7121  ;;  %v3991_v58 = vadd.f32 1.0, %v7120_v50 }
 0xa64   : > { %v7124_v23 = vpop.eup %7123  ;;  %v4055_v61 = vadd.f32 %v8737_v27, %v8734_v35  ;;  %v8742_v41 = vmul.f32 %v7122_v24, %v8696_v18 }
 0xa65   : > { %v7126_v42 = vpop.eup %7125  ;;  %v8745_v9 = vmul.f32 %v7124_v23, %v8701_v36  ;;  %7131 = vrcp.f32 %v3991_v58 }
 0xa66   : > { %v7128_v46 = vpop.eup %7127  ;;  %v3992_v56 = vadd.f32 1.0, %v7126_v42  ;;  %4056 = vadd.xlane.f32.xlu0 %v4055_v61  ;;  %v6781_v61 = vld [vmem:[#allocation8 + $0x7a8] ss:$68 sps:$4 sm:$0xff]  }
 0xa67   : > { %v7130_v10 = vpop.eup %7129  ;;  %v3993_v40 = vadd.f32 1.0, %v7128_v46  ;;  %v4058_v21 = vadd.f32 %v8745_v9, %v8742_v41  ;;  %6065 = vmatprep.subr.bf16.mxu0 %v6781_v61 }
 0xa68   : > { %7133 = vrcp.f32 %v3992_v56  ;;  %v3994_v5 = vadd.f32 1.0, %v7130_v10  ;;  %v6783_v10 = vld [vmem:[#allocation8 + $0x720] ss:$68 sps:$4 sm:$0xff]  }
 0xa69   : > { %7135 = vrcp.f32 %v3993_v40  ;;  %4059 = vadd.xlane.f32.xlu1 %v4058_v21  ;;  %v6784_v40 = vld [vmem:[#allocation8 + $0x2e0] ss:$68 sps:$4 sm:$0xff]  }
 0xa6a   : > { %7137 = vrcp.f32 %v3994_v5  ;;  %v6787_v5 = vld [vmem:[#allocation8 + $0x610] ss:$68 sps:$4 sm:$0xff]  }
 0xa72   : > { %v7132_v25 = vpop.eup %7131 }
 0xa73   : > { %v8749_v14 = vmul.f32 %v7132_v25, %v3927_v55 }
 0xa75   : > { %v7134_v18 = vpop.eup %7133 }
 0xa76   : > { %v7136_v45 = vpop.eup %7135  ;;  %v8751_v36 = vmul.f32 %v7134_v18, %v3928_v54  ;;  %v6788_v18 = vld [vmem:[#allocation8 + $0x1d0] ss:$68 sps:$4 sm:$0xff]  }
 0xa77   : > { %v7138_v3 = vpop.eup %7137  ;;  %v8755_v30 = vmul.f32 %v7136_v45, %v3929_v7 }
 0xa78   : > { %v4061_v31 = vadd.f32 %v8751_v36, %v8749_v14  ;;  %v8757_v32 = vmul.f32 %v7138_v3, %v3930_v16 }
 0xa7a   : > { %4062 = vadd.xlane.f32.xlu0 %v4061_v31  ;;  %v4064_v26 = vadd.f32 %v8757_v32, %v8755_v30 }
 0xa7c   : > { %4065 = vadd.xlane.f32.xlu1 %v4064_v26 }
 0xacd   : > { %v4045_v29 = vpop.xlane.xlu0 %4044 }
 0xace   : > { %v4067_v55 = vmul.f32 0.00390625, %v4045_v29 }
 0xad0   : > { %v8762_v54 = vsub.f32 %v8689_v37, %v4067_v55  ;;  %v8765_v15 = vsub.f32 %v8692_v48, %v4067_v55 }
 0xad1   : > { %v4048_v4 = vpop.xlane.xlu1 %4047 }
 0xad2   : > { %v4068_v19 = vmul.f32 0.00390625, %v4048_v4  ;;  %v4091_v20 = vmul.f32 %v8762_v54, %v8762_v54  ;;  %v4092_v52 = vmul.f32 %v8765_v15, %v8765_v15  ;;  %v6790_v4 = vld [vmem:[#allocation8 + $0x148] ss:$68 sps:$4 sm:$0xff]  }
 0xad4   : > { %v8772_v39 = vsub.f32 %v8705_v43, %v4068_v19  ;;  %v8775_v57 = vsub.f32 %v8708_v8, %v4068_v19  ;;  %v4107_v7 = vadd.f32 %v4092_v52, %v4091_v20 }
 0xad6   : > { %4108 = vadd.xlane.f32.xlu0 %v4107_v7  ;;  %v4093_v37 = vmul.f32 %v8772_v39, %v8772_v39  ;;  %v4094_v48 = vmul.f32 %v8775_v57, %v8775_v57  ;;  %v6791_v7 = vld [vmem:[#allocation8 + $0x500] ss:$68 sps:$4 sm:$0xff]  }
 0xad8   : > { %v4110_v13 = vadd.f32 %v4094_v48, %v4093_v37  ;;  %v6792_v37 = vld [vmem:[#allocation8 + $0xc0] ss:$68 sps:$4 sm:$0xff]   ;;  %v6793_v48 = vld [vmem:[#allocation8 + $0x478] ss:$68 sps:$4 sm:$0xff]  }
 0xada   : > { %4111 = vadd.xlane.f32.xlu1 %v4110_v13 }
 0xadc   : > { %v4051_v16 = vpop.xlane.xlu0 %4050 }
 0xadd   : > { %v4069_v6 = vmul.f32 0.00390625, %v4051_v16 }
 0xadf   : > { %v8782_v51 = vsub.f32 %v8714_v0, %v4069_v6  ;;  %v8785_v43 = vsub.f32 %v8717_v17, %v4069_v6  ;;  %v6782_v17 = vld [vmem:[#allocation8 + $0x368] ss:$68 sps:$4 sm:$0xff]  }
 0xae0   : > { %v4054_v8 = vpop.xlane.xlu1 %4053  ;;  %6066 = vmatpush3.bf16.msra.mxu0 %v6782_v17 }
 0xae1   : > { %v4070_v2 = vmul.f32 0.00390625, %v4054_v8  ;;  %v4095_v50 = vmul.f32 %v8782_v51, %v8782_v51  ;;  %v4096_v24 = vmul.f32 %v8785_v43, %v8785_v43  ;;  %6067 = vmatprep.subr.bf16.mxu0 %v6783_v10 }
 0xae3   : > { %v8792_v58 = vsub.f32 %v8724_v49, %v4070_v2  ;;  %v8795_v23 = vsub.f32 %v8727_v53, %v4070_v2  ;;  %v4113_v0 = vadd.f32 %v4096_v24, %v4095_v50  ;;  %v6785_v49 = vld [vmem:[#allocation8 + $0x698] ss:$68 sps:$4 sm:$0xff]  }
 0xae4   : > { %6068 = vmatpush3.bf16.msra.mxu0 %v6784_v40  ;;  %v6786_v53 = vld [vmem:[#allocation8 + $0x258] ss:$68 sps:$4 sm:$0xff]  }
 0xae5   : > { %4114 = vadd.xlane.f32.xlu0 %v4113_v0  ;;  %v4097_v42 = vmul.f32 %v8792_v58, %v8792_v58  ;;  %v4098_v46 = vmul.f32 %v8795_v23, %v8795_v23  ;;  %6069 = vmatprep.subr.bf16.mxu0 %v6785_v49 }
 0xae7   : > { %v4116_v56 = vadd.f32 %v4098_v46, %v4097_v42 }
 0xae8   : > { %6070 = vmatpush3.bf16.msra.mxu0 %v6786_v53 }
 0xae9   : > { %4117 = vadd.xlane.f32.xlu1 %v4116_v56  ;;  %6071 = vmatprep.subr.bf16.mxu0 %v6787_v5  ;;  %v4171_v5 = vld [vmem:[#allocation10 + $0x1a] sm:$0x3] }
 0xaec   : > { %6072 = vmatpush3.bf16.msra.mxu0 %v6788_v18 }
 0xaed   : > { %6073 = vmatprep.subr.bf16.mxu0 %v6789_v62 }
 0xaef   : > { %v4057_v21 = vpop.xlane.xlu0 %4056 }
 0xaf0   : > { %v4071_v25 = vmul.f32 0.00390625, %v4057_v21  ;;  %6074 = vmatpush3.bf16.msra.mxu0 %v6790_v4  ;;  %v4199_v4 = vld [vmem:[#allocation10 + $0x23] sm:$0x3] }
 0xaf1   : > { %6075 = vmatprep.subr.bf16.mxu0 %v6791_v7  ;;  %v8850_v7 = vrot.slane %v4199_v4, %v7811_v44 }
 0xaf2   : > { %v8802_v45 = vsub.f32 %v8734_v35, %v4071_v25  ;;  %v8805_v3 = vsub.f32 %v8737_v27, %v4071_v25  ;;  %v4060_v31 = vpop.xlane.xlu1 %4059 }
 0xaf3   : > { %v4072_v26 = vmul.f32 0.00390625, %v4060_v31 }
 0xaf4   : > { %v4099_v29 = vmul.f32 %v8802_v45, %v8802_v45  ;;  %v4100_v55 = vmul.f32 %v8805_v3, %v8805_v3  ;;  %6076 = vmatpush3.bf16.msra.mxu0 %v6792_v37  ;;  %v8853_v37 = vrot.slane %v4199_v4, %v7963_v59 }
 0xaf5   : > { %v8812_v19 = vsub.f32 %v8742_v41, %v4072_v26  ;;  %v8815_v35 = vsub.f32 %v8745_v9, %v4072_v26  ;;  %v6794_v41 = vld [vmem:[#allocation8 + $0x38] ss:$68 sps:$4 sm:$0xff]   ;;  %6077 = vmatprep.subr.bf16.mxu0 %v6793_v48 }
 0xaf6   : > { %v4119_v27 = vadd.f32 %v4100_v55, %v4099_v29  ;;  %v8844_v29 = vrot.slane %v4171_v5, %v7811_v44  ;;  %v8847_v55 = vrot.slane %v4171_v5, %v7963_v59 }
 0xaf7   : > { %v4101_v20 = vmul.f32 %v8812_v19, %v8812_v19  ;;  %v4102_v52 = vmul.f32 %v8815_v35, %v8815_v35 }
 0xaf8   : > { %4120 = vadd.xlane.f32.xlu0 %v4119_v27  ;;  %6078 = vmatpush3.bf16.msra.mxu0 %v6794_v41 }
 0xaf9   : > { %v4122_v13 = vadd.f32 %v4102_v52, %v4101_v20 }
 0xafb   : > { %4123 = vadd.xlane.f32.xlu1 %v4122_v13 }
 0xb03   : > { %v4063_v9 = vpop.xlane.xlu0 %4062 }
 0xb04   : > { %v4073_v16 = vmul.f32 0.00390625, %v4063_v9 }
 0xb05   : > { %v4066_v6 = vpop.xlane.xlu1 %4065 }
 0xb06   : > { %v8822_v8 = vsub.f32 %v8749_v14, %v4073_v16  ;;  %v8825_v38 = vsub.f32 %v8751_v36, %v4073_v16  ;;  %v4074_v2 = vmul.f32 0.00390625, %v4066_v6 }
 0xb08   : > { %v8828_v50 = vsub.f32 %v8755_v30, %v4074_v2  ;;  %v8831_v24 = vsub.f32 %v8757_v32, %v4074_v2  ;;  %v4103_v0 = vmul.f32 %v8822_v8, %v8822_v8  ;;  %v4104_v61 = vmul.f32 %v8825_v38, %v8825_v38  ;;  %v6795_v30 = vld [vmem:[#allocation8 + $0x834] ss:$68 sps:$4 sm:$0xff]  }
 0xb09   : > { %6103 = vmatprep.subr.bf16.mxu0 %v6795_v30  ;;  %v6799_v30 = vld [vmem:[#allocation8 + $0x724] ss:$68 sps:$4 sm:$0xff]  }
 0xb0a   : > { %v4125_v17 = vadd.f32 %v4104_v61, %v4103_v0  ;;  %v4105_v14 = vmul.f32 %v8828_v50, %v8828_v50  ;;  %v4106_v36 = vmul.f32 %v8831_v24, %v8831_v24  ;;  %v6797_v0 = vld [vmem:[#allocation8 + $0x7ac] ss:$68 sps:$4 sm:$0xff]  }
 0xb0c   : > { %4126 = vadd.xlane.f32.xlu0 %v4125_v17  ;;  %v4128_v42 = vadd.f32 %v4106_v36, %v4105_v14  ;;  %v6798_v17 = vld [vmem:[#allocation8 + $0x36c] ss:$68 sps:$4 sm:$0xff]  }
 0xb0e   : > { %4129 = vadd.xlane.f32.xlu1 %v4128_v42 }
 0xb5f   : > { %v4109_v32 = vpop.xlane.xlu0 %4108 }
 0xb60   : > { %v4131_v46 = vmul.f32 0.00390625, %v4109_v32 }
 0xb62   : > { %v4139_v56 = vadd.f32 1e-05, %v4131_v46 }
 0xb63   : > { %v4112_v10 = vpop.xlane.xlu1 %4111 }
 0xb64   : > { %7139 = vrsqrt.f32 %v4139_v56  ;;  %v4132_v40 = vmul.f32 0.00390625, %v4112_v10 }
 0xb66   : > { %v4140_v49 = vadd.f32 1e-05, %v4132_v40 }
 0xb68   : > { %7141 = vrsqrt.f32 %v4140_v49  ;;  %v6800_v49 = vld [vmem:[#allocation8 + $0x2e4] ss:$68 sps:$4 sm:$0xff]  }
 0xb6e   : > { %v4115_v53 = vpop.xlane.xlu0 %4114 }
 0xb6f   : > { %v4133_v21 = vmul.f32 0.00390625, %v4115_v53 }
 0xb71   : > { %v7140_v25 = vpop.eup %7139  ;;  %v4141_v18 = vadd.f32 1e-05, %v4133_v21 }
 0xb72   : > { %v4155_v31 = vmul.f32 %v7140_v25, %v8762_v54  ;;  %v4118_v26 = vpop.xlane.xlu1 %4117  ;;  %v4156_v62 = vmul.f32 %v7140_v25, %v8765_v15 }
 0xb73   : > { %7143 = vrsqrt.f32 %v4141_v18  ;;  %v4134_v27 = vmul.f32 0.00390625, %v4118_v26 }
 0xb74   : > { %v4184_v48 = vmul.f32 %v8847_v55, %v4156_v62  ;;  %v4183_v13 = vmul.f32 %v8844_v29, %v4155_v31  ;;  %v6802_v62 = vld [vmem:[#allocation8 + $0x25c] ss:$68 sps:$4 sm:$0xff]  }
 0xb75   : > { %v7142_v20 = vpop.eup %7141  ;;  %v4142_v52 = vadd.f32 1e-05, %v4134_v27  ;;  %v6803_v27 = vld [vmem:[#allocation8 + $0x614] ss:$68 sps:$4 sm:$0xff]  }
 0xb76   : > { %v4157_v54 = vmul.f32 %v7142_v20, %v8772_v39  ;;  %v4158_v15 = vmul.f32 %v7142_v20, %v8775_v57  ;;  %v4212_v16 = vadd.f32 %v8853_v37, %v4184_v48  ;;  %v4211_v59 = vadd.f32 %v8850_v7, %v4183_v13  ;;  %v6796_v57 = vld [vmem:[#allocation8 + $0x3f4] ss:$68 sps:$4 sm:$0xff]  }
 0xb77   : > { %7145 = vrsqrt.f32 %v4142_v52 }
 0xb78   : > { %v4186_v41 = vmul.f32 %v8847_v55, %v4158_v15  ;;  %v4185_v9 = vmul.f32 %v8844_v29, %v4157_v54 }
 0xb7a   : > { %v4214_v44 = vadd.f32 %v8853_v37, %v4186_v41  ;;  %v4213_v6 = vadd.f32 %v8850_v7, %v4185_v9 }
 0xb7c   : > { %v4260_v39 = vpack.c.bf16 %v4214_v44, %v4212_v16  ;;  %v4259_v2 = vpack.c.bf16 %v4213_v6, %v4211_v59 }
 0xb7e   : > { %4402 = vmatprep.mubr.bf16.mxu0 %v4260_v39 }
 0xb7f   : > { %4403 = vmatmul.mubr.bf16.vlgmr.msra.gmra.mxu0 %v4259_v2 }
 0xb80   : > { %v7144_v61 = vpop.eup %7143  ;;  %6104 = vmatpush3.bf16.msra.mxu0 %v6796_v57 }
 0xb81   : > { %v4121_v14 = vpop.xlane.xlu0 %4120  ;;  %v4160_v36 = vmul.f32 %v7144_v61, %v8785_v43  ;;  %v4159_v42 = vmul.f32 %v7144_v61, %v8782_v51  ;;  %6105 = vmatprep.subr.bf16.mxu0 %v6797_v0  ;;  %v6801_v43 = vld [vmem:[#allocation8 + $0x69c] ss:$68 sps:$4 sm:$0xff]  }
 0xb82   : > { %v4135_v32 = vmul.f32 0.00390625, %v4121_v14 }
 0xb83   : > { %v4188_v40 = vmul.f32 %v8847_v55, %v4160_v36  ;;  %v4187_v25 = vmul.f32 %v8844_v29, %v4159_v42 }
 0xb84   : > { %v7146_v46 = vpop.eup %7145  ;;  %v4143_v56 = vadd.f32 1e-05, %v4135_v32  ;;  %v4124_v10 = vpop.xlane.xlu1 %4123  ;;  %6106 = vmatpush3.bf16.msra.mxu0 %v6798_v17 }
 0xb85   : > { %v4136_v53 = vmul.f32 0.00390625, %v4124_v10  ;;  %v4162_v21 = vmul.f32 %v7146_v46, %v8795_v23  ;;  %v4161_v5 = vmul.f32 %v7146_v46, %v8792_v58  ;;  %6107 = vmatprep.subr.bf16.mxu0 %v6799_v30  ;;  %v4216_v26 = vadd.f32 %v8853_v37, %v4188_v40 }
 0xb86   : > { %7147 = vrsqrt.f32 %v4143_v56  ;;  %v4215_v23 = vadd.f32 %v8850_v7, %v4187_v25 }
 0xb87   : > { %v4144_v51 = vadd.f32 1e-05, %v4136_v53  ;;  %v4190_v18 = vmul.f32 %v8847_v55, %v4162_v21  ;;  %v4189_v31 = vmul.f32 %v8844_v29, %v4161_v5 }
 0xb88   : > { %6108 = vmatpush3.bf16.msra.mxu0 %v6800_v49 }
 0xb89   : > { %7149 = vrsqrt.f32 %v4144_v51  ;;  %v4218_v4 = vadd.f32 %v8853_v37, %v4190_v18  ;;  %v4217_v58 = vadd.f32 %v8850_v7, %v4189_v31  ;;  %6109 = vmatprep.subr.bf16.mxu0 %v6801_v43  ;;  %v6805_v51 = vld [vmem:[#allocation8 + $0x58c] ss:$68 sps:$4 sm:$0xff]   ;;  %v6808_v18 = vld [vmem:[#allocation8 + $0xc4] ss:$68 sps:$4 sm:$0xff]   ;;  %v6810_v31 = vld [vmem:[#allocation8 + $0x3c] ss:$68 sps:$4 sm:$0xff]  }
 0xb8b   : > { %v4262_v20 = vpack.c.bf16 %v4218_v4, %v4216_v26  ;;  %v4261_v52 = vpack.c.bf16 %v4217_v58, %v4215_v23  ;;  %v941_v26 = vsub.s32 6, %v7808_v34  ;;  %v8903_v58 = vld [vmem:[#allocation10] sm:$0xff] }
 0xb8c   : > { %6110 = vmatpush3.bf16.msra.mxu0 %v6802_v62 }
 0xb8d   : > { %4410 = vmatprep.mubr.bf16.mxu0 %v4262_v20  ;;  %6111 = vmatprep.subr.bf16.mxu0 %v6803_v27  ;;  %v942_v27 = vrot.slane %v8903_v58, %v941_v26 }
 0xb8e   : > { %4411 = vmatmul.mubr.bf16.gmra.mxu0 %v4261_v52 }
 0xb93   : > { %v7148_v54 = vpop.eup %7147 }
 0xb94   : > { %v4164_v15 = vmul.f32 %v7148_v54, %v8805_v3  ;;  %v4163_v48 = vmul.f32 %v7148_v54, %v8802_v45 }
 0xb95   : > { %v4127_v13 = vpop.xlane.xlu0 %4126 }
 0xb96   : > { %v7150_v41 = vpop.eup %7149  ;;  %v4137_v9 = vmul.f32 0.00390625, %v4127_v13  ;;  %v4192_v59 = vmul.f32 %v8847_v55, %v4164_v15  ;;  %v4191_v39 = vmul.f32 %v8844_v29, %v4163_v48  ;;  %v1849_v15 = vadd.f32 %v8324_v28, %v942_v27 }
 0xb97   : > { %v4130_v16 = vpop.xlane.xlu1 %4129  ;;  %v4166_v44 = vmul.f32 %v7150_v41, %v8815_v35  ;;  %v4165_v6 = vmul.f32 %v7150_v41, %v8812_v19  ;;  %v1853_v48 = vadd.f32 %v8328_v47, %v942_v27  ;;  %v1863_v28 = vadd.f32 %v8336_v63, %v942_v27 }
 0xb98   : > { %v4145_v2 = vadd.f32 1e-05, %v4137_v9  ;;  %v4138_v57 = vmul.f32 0.00390625, %v4130_v16  ;;  %v4220_v61 = vadd.f32 %v8853_v37, %v4192_v59  ;;  %v4219_v35 = vadd.f32 %v8850_v7, %v4191_v39 }
 0xb99   : > { %v4194_v0 = vmul.f32 %v8847_v55, %v4166_v44  ;;  %v4193_v3 = vmul.f32 %v8844_v29, %v4165_v6 }
 0xb9a   : > { %7151 = vrsqrt.f32 %v4145_v2  ;;  %v4146_v45 = vadd.f32 1e-05, %v4138_v57 }
 0xb9b   : > { %v4222_v17 = vadd.f32 %v8853_v37, %v4194_v0  ;;  %v4221_v14 = vadd.f32 %v8850_v7, %v4193_v3  ;;  %v1859_v3 = vadd.f32 %v8332_v22, %v942_v27  ;;  %v1873_v22 = vadd.f32 %v8344_v11, %v942_v27 }
 0xb9c   : > { %7153 = vrsqrt.f32 %v4146_v45 }
 0xb9d   : > { %v4264_v19 = vpack.c.bf16 %v4222_v17, %v4220_v61  ;;  %v4263_v36 = vpack.c.bf16 %v4221_v14, %v4219_v35 }
 0xb9f   : > { %4418 = vmatprep.mubr.bf16.mxu0 %v4264_v19 }
 0xba0   : > { %4419 = vmatmul.mubr.bf16.gmra.mxu0 %v4263_v36 }
 0xba7   : > { %v7152_v42 = vpop.eup %7151 }
 0xba8   : > { %v4168_v30 = vmul.f32 %v7152_v42, %v8825_v38  ;;  %v4167_v32 = vmul.f32 %v7152_v42, %v8822_v8 }
 0xba9   : > { %v7154_v46 = vpop.eup %7153 }
 0xbaa   : > { %v4170_v56 = vmul.f32 %v7154_v46, %v8831_v24  ;;  %v4196_v10 = vmul.f32 %v8847_v55, %v4168_v30  ;;  %v4169_v40 = vmul.f32 %v7154_v46, %v8828_v50  ;;  %v4195_v49 = vmul.f32 %v8844_v29, %v4167_v32  ;;  %v6804_v50 = vld [vmem:[#allocation8 + $0x1d4] ss:$68 sps:$4 sm:$0xff]  }
 0xbab   : > { %6112 = vmatpush3.bf16.msra.mxu0 %v6804_v50  ;;  %v1869_v46 = vadd.f32 %v8340_v1, %v942_v27 }
 0xbac   : > { %v4198_v53 = vmul.f32 %v8847_v55, %v4170_v56  ;;  %v4197_v21 = vmul.f32 %v8844_v29, %v4169_v40  ;;  %v4224_v5 = vadd.f32 %v8853_v37, %v4196_v10  ;;  %v4223_v38 = vadd.f32 %v8850_v7, %v4195_v49  ;;  %v6806_v55 = vld [vmem:[#allocation8 + $0x14c] ss:$68 sps:$4 sm:$0xff]   ;;  %6113 = vmatprep.subr.bf16.mxu0 %v6805_v51  ;;  %v6807_v29 = vld [vmem:[#allocation8 + $0x504] ss:$68 sps:$4 sm:$0xff]  }
 0xbad   : > { %v9188_v49 = vld [vmem:[#allocation17_spill] sm:$0xff]  ;;  %v9190_v51 = vld [vmem:[#allocation26_spill] sm:$0xff] }
 0xbae   : > { %v4226_v25 = vadd.f32 %v8853_v37, %v4198_v53  ;;  %v4225_v8 = vadd.f32 %v8850_v7, %v4197_v21  ;;  %v6809_v37 = vld [vmem:[#allocation8 + $0x47c] ss:$68 sps:$4 sm:$0xff]   ;;  %v1883_v1 = vadd.f32 %v9190_v51, %v942_v27 }
 0xbaf   : > { %6114 = vmatpush3.bf16.msra.mxu0 %v6806_v55 }
 0xbb0   : > { %v4266_v43 = vpack.c.bf16 %v4226_v25, %v4224_v5  ;;  %v4265_v24 = vpack.c.bf16 %v4225_v8, %v4223_v38  ;;  %6115 = vmatprep.subr.bf16.mxu0 %v6807_v29 }
 0xbb2   : > { %4426 = vmatprep.mubr.bf16.mxu0 %v4266_v43 }
 0xbb3   : > { %4427 = vmatmul.mubr.bf16.gmra.mxu0 %v4265_v24  ;;  %v9189_v24 = vld [vmem:[#allocation24_spill] sm:$0xff] }
 0xbb4   : > { %4614 = vmatprep.mubr.bf16.mxu0 %v7980_v12  ;;  %6116 = vmatpush3.bf16.msra.mxu0 %v6808_v18  ;;  %v5912_v12 = vld [vmem:[#allocation10 + $0x11] ss:$0 sm:$0xff]  ;;  %v1879_v50 = vadd.f32 %v9189_v24, %v942_v27 }
 0xbb5   : > { %6117 = vmatprep.subr.bf16.mxu0 %v6809_v37 }
 0xbb8   : > { %6118 = vmatpush3.bf16.msra.mxu0 %v6810_v31  ;;  %v8917_v31 = vld [vmem:[#allocation10 + $0x12] ss:$0 sm:$0xff] }
 0xc3f   : > { %v6079_v7 = vpop.f32.mrf.mxu0 }
 0xc41   : > { %v6080_v62 = vpop.f32.mrf.mxu0 }
 0xc42   : > { %v6081_v4 = vadd.f32 %v6080_v62, %v6079_v7 }
 0xc43   : > { %v6082_v23 = vpop.f32.mrf.mxu0 }
 0xc44   : > { %v4405_v52 = vadd.f32 %v6081_v4, %v5912_v12 }
 0xc45   : > { %v6083_v20 = vpop.f32.mrf.mxu0 }
 0xc46   : > { %v6084_v54 = vadd.f32 %v6083_v20, %v6082_v23  ;;  %v4435_v41 = vadd.f32 %v4405_v52, %v1849_v15 }
 0xc48   : > { %v4408_v13 = vadd.f32 %v6084_v54, %v5912_v12 }
 0xc4a   : > { %v4436_v9 = vadd.f32 %v4408_v13, %v1853_v48 }
 0xc4c   : > { %v4443_v16 = vpack.c.bf16 %v4436_v9, %v4435_v41 }
 0xc4e   : > { %v6085_v44 = vpop.f32.mrf.mxu0  ;;  %4615 = vmatmul.mubr.bf16.vlgmr.msra.gmra.mxu0 %v4443_v16 }
 0xc4f   : > { %4622 = vmatprep.mubr.bf16.mxu0 %v7993_v33 }
 0xc50   : > { %v6086_v59 = vpop.f32.mrf.mxu0 }
 0xc51   : > { %v6087_v6 = vadd.f32 %v6086_v59, %v6085_v44 }
 0xc52   : > { %v6088_v39 = vpop.f32.mrf.mxu0 }
 0xc53   : > { %v4413_v57 = vadd.f32 %v6087_v6, %v5912_v12 }
 0xc54   : > { %v6089_v2 = vpop.f32.mrf.mxu0 }
 0xc55   : > { %v6090_v0 = vadd.f32 %v6089_v2, %v6088_v39  ;;  %v4437_v47 = vadd.f32 %v4413_v57, %v1859_v3 }
 0xc57   : > { %v4416_v45 = vadd.f32 %v6090_v0, %v5912_v12 }
 0xc59   : > { %v4438_v61 = vadd.f32 %v4416_v45, %v1863_v28 }
 0xc5b   : > { %v4444_v17 = vpack.c.bf16 %v4438_v61, %v4437_v47 }
 0xc5d   : > { %4623 = vmatmul.mubr.bf16.gmra.mxu0 %v4444_v17 }
 0xc5e   : > { %4630 = vmatprep.mubr.bf16.mxu0 %v8006_v60 }
 0xc60   : > { %v6091_v35 = vpop.f32.mrf.mxu0 }
 0xc62   : > { %v6092_v14 = vpop.f32.mrf.mxu0 }
 0xc63   : > { %v6093_v19 = vadd.f32 %v6092_v14, %v6091_v35 }
 0xc64   : > { %v6094_v36 = vpop.f32.mrf.mxu0 }
 0xc65   : > { %v4421_v30 = vadd.f32 %v6093_v19, %v5912_v12 }
 0xc66   : > { %v6095_v42 = vpop.f32.mrf.mxu0 }
 0xc67   : > { %v6096_v32 = vadd.f32 %v6095_v42, %v6094_v36  ;;  %v4439_v63 = vadd.f32 %v4421_v30, %v1869_v46 }
 0xc69   : > { %v4424_v56 = vadd.f32 %v6096_v32, %v5912_v12 }
 0xc6b   : > { %v4440_v10 = vadd.f32 %v4424_v56, %v1873_v22 }
 0xc6d   : > { %v4445_v40 = vpack.c.bf16 %v4440_v10, %v4439_v63 }
 0xc6f   : > { %4631 = vmatmul.mubr.bf16.gmra.mxu0 %v4445_v40 }
 0xc70   : > { %4638 = vmatprep.mubr.bf16.mxu0 %v9188_v49 }
 0xc73   : > { %v6097_v53 = vpop.f32.mrf.mxu0 }
 0xc75   : > { %v6098_v21 = vpop.f32.mrf.mxu0 }
 0xc76   : > { %v6099_v5 = vadd.f32 %v6098_v21, %v6097_v53 }
 0xc77   : > { %v6100_v25 = vpop.f32.mrf.mxu0 }
 0xc78   : > { %v4429_v8 = vadd.f32 %v6099_v5, %v5912_v12 }
 0xc79   : > { %v6101_v38 = vpop.f32.mrf.mxu0 }
 0xc7a   : > { %v6102_v43 = vadd.f32 %v6101_v38, %v6100_v25  ;;  %v4441_v11 = vadd.f32 %v4429_v8, %v1879_v50 }
 0xc7c   : > { %v4432_v55 = vadd.f32 %v6102_v43, %v5912_v12 }
 0xc7e   : > { %v4442_v29 = vadd.f32 %v4432_v55, %v1883_v1 }
 0xc80   : > { %v4446_v18 = vpack.c.bf16 %v4442_v29, %v4441_v11 }
 0xc82   : > { %4639 = vmatmul.mubr.bf16.gmra.mxu0 %v4446_v18 }
 0xd0e   : > { %v6119_v37 = vpop.f32.mrf.mxu0 }
 0xd10   : > { %v6120_v7 = vpop.f32.mrf.mxu0 }
 0xd11   : > { %v6121_v26 = vadd.f32 %v6120_v7, %v6119_v37 }
 0xd12   : > { %v6122_v62 = vpop.f32.mrf.mxu0 }
 0xd13   : > { %v4617_v4 = vadd.f32 %v6121_v26, %v8917_v31 }
 0xd14   : > { %v6123_v23 = vpop.f32.mrf.mxu0 }
 0xd15   : > { %v5946_v20 = vmul.f32 -1.442695, %v4617_v4  ;;  %v6124_v52 = vadd.f32 %v6123_v23, %v6122_v62 }
 0xd17   : > { %7155 = vpow2.f32 %v5946_v20  ;;  %v4620_v54 = vadd.f32 %v6124_v52, %v8917_v31 }
 0xd19   : > { %v5947_v27 = vmul.f32 -1.442695, %v4620_v54 }
 0xd1b   : > { %7157 = vpow2.f32 %v5947_v27 }
 0xd1d   : > { %v6125_v12 = vpop.f32.mrf.mxu0 }
 0xd1f   : > { %v6126_v15 = vpop.f32.mrf.mxu0 }
 0xd20   : > { %v6127_v48 = vadd.f32 %v6126_v15, %v6125_v12 }
 0xd21   : > { %v6128_v13 = vpop.f32.mrf.mxu0 }
 0xd22   : > { %v4625_v41 = vadd.f32 %v6127_v48, %v8917_v31 }
 0xd23   : > { %v6129_v9 = vpop.f32.mrf.mxu0 }
 0xd24   : > { %v7156_v16 = vpop.eup %7155  ;;  %v5948_v44 = vmul.f32 -1.442695, %v4625_v41  ;;  %v6130_v59 = vadd.f32 %v6129_v9, %v6128_v13 }
 0xd25   : > { %v4671_v6 = vadd.f32 1.0, %v7156_v16 }
 0xd26   : > { %7159 = vpow2.f32 %v5948_v44  ;;  %v4628_v39 = vadd.f32 %v6130_v59, %v8917_v31 }
 0xd27   : > { %7161 = vrcp.f32 %v4671_v6 }
 0xd28   : > { %v7158_v2 = vpop.eup %7157  ;;  %v5949_v57 = vmul.f32 -1.442695, %v4628_v39 }
 0xd29   : > { %v4672_v0 = vadd.f32 1.0, %v7158_v2 }
 0xd2a   : > { %7163 = vpow2.f32 %v5949_v57 }
 0xd2b   : > { %7165 = vrcp.f32 %v4672_v0  ;;  %v6811_v0 = vld [vmem:[#allocation8 + $0x838] ss:$68 sps:$4 sm:$0xff]  }
 0xd2c   : > { %6143 = vmatprep.subr.bf16.mxu1 %v6811_v0 }
 0xd2f   : > { %v6131_v3 = vpop.f32.mrf.mxu0 }
 0xd31   : > { %v6132_v28 = vpop.f32.mrf.mxu0 }
 0xd32   : > { %v6133_v45 = vadd.f32 %v6132_v28, %v6131_v3  ;;  %v6812_v28 = vld [vmem:[#allocation8 + $0x3f8] ss:$68 sps:$4 sm:$0xff]  }
 0xd33   : > { %v7160_v47 = vpop.eup %7159  ;;  %v6134_v61 = vpop.f32.mrf.mxu0  ;;  %6144 = vmatpush3.bf16.msra.mxu1 %v6812_v28 }
 0xd34   : > { %v7162_v17 = vpop.eup %7161  ;;  %v4673_v35 = vadd.f32 1.0, %v7160_v47  ;;  %v4633_v14 = vadd.f32 %v6133_v45, %v8917_v31 }
 0xd35   : > { %v6135_v19 = vpop.f32.mrf.mxu0  ;;  %v4695_v36 = vmul.f32 %v7162_v17, %v4617_v4  ;;  %v6813_v17 = vld [vmem:[#allocation8 + $0x7b0] ss:$68 sps:$4 sm:$0xff]  }
 0xd36   : > { %7167 = vrcp.f32 %v4673_v35  ;;  %v5950_v42 = vmul.f32 -1.442695, %v4633_v14  ;;  %v6136_v30 = vadd.f32 %v6135_v19, %v6134_v61  ;;  %6145 = vmatprep.subr.bf16.mxu1 %v6813_v17 }
 0xd37   : > { %v7164_v32 = vpop.eup %7163  ;;  %4703 = vadd.xlane.f32.xlu0 %v4695_v36 }
 0xd38   : > { %v7166_v46 = vpop.eup %7165  ;;  %v4674_v22 = vadd.f32 1.0, %v7164_v32  ;;  %7169 = vpow2.f32 %v5950_v42  ;;  %v4636_v56 = vadd.f32 %v6136_v30, %v8917_v31  ;;  %v6816_v42 = vld [vmem:[#allocation8 + $0x2e8] ss:$68 sps:$4 sm:$0xff]   ;;  %v6817_v30 = vld [vmem:[#allocation8 + $0x6a0] ss:$68 sps:$4 sm:$0xff]  }
 0xd39   : > { %v4696_v63 = vmul.f32 %v7166_v46, %v4620_v54  ;;  %v6818_v32 = vld [vmem:[#allocation8 + $0x260] ss:$68 sps:$4 sm:$0xff]  }
 0xd3a   : > { %7171 = vrcp.f32 %v4674_v22  ;;  %v5951_v10 = vmul.f32 -1.442695, %v4636_v56  ;;  %v6819_v22 = vld [vmem:[#allocation8 + $0x618] ss:$68 sps:$4 sm:$0xff]  }
 0xd3b   : > { %4705 = vadd.xlane.f32.xlu1 %v4696_v63 }
 0xd3c   : > { %7173 = vpow2.f32 %v5951_v10 }
 0xd42   : > { %v6137_v40 = vpop.f32.mrf.mxu0 }
 0xd43   : > { %v7168_v53 = vpop.eup %7167 }
 0xd44   : > { %v6138_v21 = vpop.f32.mrf.mxu0  ;;  %v4697_v5 = vmul.f32 %v7168_v53, %v4625_v41  ;;  %v6821_v53 = vld [vmem:[#allocation8 + $0x590] ss:$68 sps:$4 sm:$0xff]  }
 0xd45   : > { %v7170_v25 = vpop.eup %7169  ;;  %v6139_v38 = vadd.f32 %v6138_v21, %v6137_v40 }
 0xd46   : > { %v4675_v8 = vadd.f32 1.0, %v7170_v25  ;;  %4707 = vadd.xlane.f32.xlu0 %v4697_v5  ;;  %v6140_v43 = vpop.f32.mrf.mxu0  ;;  %v6822_v25 = vld [vmem:[#allocation8 + $0x150] ss:$68 sps:$4 sm:$0xff]  }
 0xd47   : > { %v7172_v24 = vpop.eup %7171  ;;  %v4641_v50 = vadd.f32 %v6139_v38, %v8917_v31 }
 0xd48   : > { %7175 = vrcp.f32 %v4675_v8  ;;  %v6141_v51 = vpop.f32.mrf.mxu0  ;;  %v4698_v1 = vmul.f32 %v7172_v24, %v4628_v39  ;;  %v6823_v8 = vld [vmem:[#allocation8 + $0x508] ss:$68 sps:$4 sm:$0xff]   ;;  %v6825_v24 = vld [vmem:[#allocation8 + $0x480] ss:$68 sps:$4 sm:$0xff]  }
 0xd49   : > { %v7174_v55 = vpop.eup %7173  ;;  %v5952_v11 = vmul.f32 -1.442695, %v4641_v50  ;;  %v6142_v29 = vadd.f32 %v6141_v51, %v6140_v43  ;;  %v6824_v43 = vld [vmem:[#allocation8 + $0xc8] ss:$68 sps:$4 sm:$0xff]   ;;  %v6826_v51 = vld [vmem:[#allocation8 + $0x40] ss:$68 sps:$4 sm:$0xff]  }
 0xd4a   : > { %v4676_v18 = vadd.f32 1.0, %v7174_v55  ;;  %4709 = vadd.xlane.f32.xlu1 %v4698_v1 }
 0xd4b   : > { %7177 = vpow2.f32 %v5952_v11  ;;  %v4644_v37 = vadd.f32 %v6142_v29, %v8917_v31 }
 0xd4c   : > { %7179 = vrcp.f32 %v4676_v18 }
 0xd4d   : > { %v5953_v7 = vmul.f32 -1.442695, %v4644_v37 }
 0xd4f   : > { %7181 = vpow2.f32 %v5953_v7 }
 0xd55   : > { %v7176_v26 = vpop.eup %7175 }
 0xd56   : > { %v4699_v62 = vmul.f32 %v7176_v26, %v4633_v14  ;;  %v6814_v14 = vld [vmem:[#allocation8 + $0x370] ss:$68 sps:$4 sm:$0xff]  }
 0xd57   : > { %6146 = vmatpush3.bf16.msra.mxu1 %v6814_v14 }
 0xd58   : > { %v7178_v4 = vpop.eup %7177  ;;  %4711 = vadd.xlane.f32.xlu0 %v4699_v62 }
 0xd59   : > { %v7180_v23 = vpop.eup %7179  ;;  %v4677_v20 = vadd.f32 1.0, %v7178_v4 }
 0xd5a   : > { %v4700_v52 = vmul.f32 %v7180_v23, %v4636_v56 }
 0xd5b   : > { %7183 = vrcp.f32 %v4677_v20 }
 0xd5c   : > { %v7182_v54 = vpop.eup %7181  ;;  %4713 = vadd.xlane.f32.xlu1 %v4700_v52 }
 0xd5d   : > { %v4678_v27 = vadd.f32 1.0, %v7182_v54 }
 0xd5f   : > { %7185 = vrcp.f32 %v4678_v27 }
 0xd68   : > { %v7184_v12 = vpop.eup %7183 }
 0xd69   : > { %v8927_v15 = vmul.f32 %v7184_v12, %v4641_v50 }
 0xd6b   : > { %4715 = vadd.xlane.f32.xlu0 %v8927_v15 }
 0xd6c   : > { %v7186_v31 = vpop.eup %7185 }
 0xd6d   : > { %v8930_v48 = vmul.f32 %v7186_v31, %v4644_v37  ;;  %v8967_v31 = vld [vmem:[#allocation10 + $0x1c] ss:$0 sm:$0xff] }
 0xd6f   : > { %4717 = vadd.xlane.f32.xlu1 %v8930_v48 }
 0xdc0   : > { %v4704_v13 = vpop.xlane.xlu0 %4703 }
 0xdc1   : > { %v4719_v41 = vmul.f32 0.0078125, %v4704_v13  ;;  %v945_v13 = vsub.s32 7, %v7808_v34 }
 0xdc3   : > { %v8933_v9 = vsub.f32 %v4695_v36, %v4719_v41  ;;  %v6815_v36 = vld [vmem:[#allocation8 + $0x728] ss:$68 sps:$4 sm:$0xff]   ;;  %v8975_v0 = vrot.slane %v8903_v58, %v945_v13 }
 0xdc4   : > { %v4706_v16 = vpop.xlane.xlu1 %4705  ;;  %6147 = vmatprep.subr.bf16.mxu1 %v6815_v36 }
 0xdc5   : > { %v4720_v44 = vmul.f32 0.0078125, %v4706_v16  ;;  %v4735_v59 = vmul.f32 %v8933_v9, %v8933_v9  ;;  %6148 = vmatpush3.bf16.msra.mxu1 %v6816_v42 }
 0xdc6   : > { %6149 = vmatprep.subr.bf16.mxu1 %v6817_v30 }
 0xdc7   : > { %v8937_v6 = vsub.f32 %v4696_v63, %v4720_v44  ;;  %4743 = vadd.xlane.f32.xlu0 %v4735_v59  ;;  %v6820_v63 = vld [vmem:[#allocation8 + $0x1d8] ss:$68 sps:$4 sm:$0xff]  }
 0xdc9   : > { %v4736_v39 = vmul.f32 %v8937_v6, %v8937_v6  ;;  %6150 = vmatpush3.bf16.msra.mxu1 %v6818_v32 }
 0xdca   : > { %6151 = vmatprep.subr.bf16.mxu1 %v6819_v22 }
 0xdcb   : > { %4745 = vadd.xlane.f32.xlu1 %v4736_v39 }
 0xdcd   : > { %6152 = vmatpush3.bf16.msra.mxu1 %v6820_v63 }
 0xdce   : > { %6153 = vmatprep.subr.bf16.mxu1 %v6821_v53 }
 0xdcf   : > { %v4708_v2 = vpop.xlane.xlu0 %4707 }
 0xdd0   : > { %v4721_v57 = vmul.f32 0.0078125, %v4708_v2 }
 0xdd1   : > { %6154 = vmatpush3.bf16.msra.mxu1 %v6822_v25 }
 0xdd2   : > { %v8941_v3 = vsub.f32 %v4697_v5, %v4721_v57  ;;  %6155 = vmatprep.subr.bf16.mxu1 %v6823_v8  ;;  %v8972_v57 = vld [vmem:[#allocation10 + $0x25] ss:$0 sm:$0xff] }
 0xdd3   : > { %v4710_v45 = vpop.xlane.xlu1 %4709  ;;  %v9193_v8 = vld [vmem:[#allocation20_spill] sm:$0xff] }
 0xdd4   : > { %v4722_v47 = vmul.f32 0.0078125, %v4710_v45  ;;  %v4737_v61 = vmul.f32 %v8941_v3, %v8941_v3 }
 0xdd5   : > { %6156 = vmatpush3.bf16.msra.mxu1 %v6824_v43  ;;  %v1861_v43 = vadd.f32 %v9193_v8, %v8975_v0 }
 0xdd6   : > { %v8945_v35 = vsub.f32 %v4698_v1, %v4722_v47  ;;  %4747 = vadd.xlane.f32.xlu0 %v4737_v61  ;;  %6157 = vmatprep.subr.bf16.mxu1 %v6825_v24  ;;  %v9192_v61 = vld [vmem:[#allocation19_spill] sm:$0xff] }
 0xdd7   : > { %v1855_v17 = vadd.f32 %v9192_v61, %v8975_v0 }
 0xdd8   : > { %v4738_v19 = vmul.f32 %v8945_v35, %v8945_v35 }
 0xdd9   : > { %6158 = vmatpush3.bf16.msra.mxu1 %v6826_v51 }
 0xdda   : > { %4749 = vadd.xlane.f32.xlu1 %v4738_v19 }
 0xde1   : > { %v4712_v46 = vpop.xlane.xlu0 %4711 }
 0xde2   : > { %v4723_v56 = vmul.f32 0.0078125, %v4712_v46 }
 0xde4   : > { %v8949_v10 = vsub.f32 %v4699_v62, %v4723_v56 }
 0xde5   : > { %v4714_v40 = vpop.xlane.xlu1 %4713 }
 0xde6   : > { %v4724_v21 = vmul.f32 0.0078125, %v4714_v40  ;;  %v4739_v5 = vmul.f32 %v8949_v10, %v8949_v10 }
 0xde8   : > { %v8953_v38 = vsub.f32 %v4700_v52, %v4724_v21  ;;  %4751 = vadd.xlane.f32.xlu0 %v4739_v5 }
 0xdea   : > { %v4740_v50 = vmul.f32 %v8953_v38, %v8953_v38 }
 0xdec   : > { %4753 = vadd.xlane.f32.xlu1 %v4740_v50 }
 0xdf4   : > { %v4716_v1 = vpop.xlane.xlu0 %4715 }
 0xdf5   : > { %v4725_v55 = vmul.f32 0.0078125, %v4716_v1 }
 0xdf7   : > { %v8958_v11 = vsub.f32 %v8927_v15, %v4725_v55 }
 0xdf8   : > { %v4718_v29 = vpop.xlane.xlu1 %4717 }
 0xdf9   : > { %v4726_v18 = vmul.f32 0.0078125, %v4718_v29  ;;  %v4741_v37 = vmul.f32 %v8958_v11, %v8958_v11 }
 0xdfb   : > { %v8963_v7 = vsub.f32 %v8930_v48, %v4726_v18  ;;  %4755 = vadd.xlane.f32.xlu0 %v4741_v37 }
 0xdfd   : > { %v4742_v26 = vmul.f32 %v8963_v7, %v8963_v7 }
 0xdff   : > { %4757 = vadd.xlane.f32.xlu1 %v4742_v26 }
 0xe50   : > { %v4744_v62 = vpop.xlane.xlu0 %4743 }
 0xe51   : > { %v4759_v4 = vmul.f32 0.0078125, %v4744_v62 }
 0xe53   : > { %v4767_v23 = vadd.f32 1e-05, %v4759_v4 }
 0xe54   : > { %v4746_v20 = vpop.xlane.xlu1 %4745 }
 0xe55   : > { %7187 = vrsqrt.f32 %v4767_v23  ;;  %v4760_v52 = vmul.f32 0.0078125, %v4746_v20 }
 0xe57   : > { %v4768_v54 = vadd.f32 1e-05, %v4760_v52 }
 0xe59   : > { %7189 = vrsqrt.f32 %v4768_v54 }
 0xe5f   : > { %v4748_v27 = vpop.xlane.xlu0 %4747 }
 0xe60   : > { %v4761_v12 = vmul.f32 0.0078125, %v4748_v27 }
 0xe62   : > { %v7188_v15 = vpop.eup %7187  ;;  %v4769_v48 = vadd.f32 1e-05, %v4761_v12 }
 0xe63   : > { %v4783_v41 = vmul.f32 %v7188_v15, %v8933_v9  ;;  %v4750_v16 = vpop.xlane.xlu1 %4749  ;;  %v9191_v9 = vld [vmem:[#allocation18_spill] sm:$0xff] }
 0xe64   : > { %7191 = vrsqrt.f32 %v4769_v48  ;;  %v4762_v44 = vmul.f32 0.0078125, %v4750_v16  ;;  %v1851_v47 = vadd.f32 %v9191_v9, %v8975_v0 }
 0xe65   : > { %v4798_v59 = vmul.f32 %v8967_v31, %v4783_v41 }
 0xe66   : > { %v7190_v39 = vpop.eup %7189  ;;  %v4770_v2 = vadd.f32 1e-05, %v4762_v44 }
 0xe67   : > { %v4784_v28 = vmul.f32 %v7190_v39, %v8937_v6  ;;  %v4813_v34 = vadd.f32 %v8972_v57, %v4798_v59 }
 0xe68   : > { %7193 = vrsqrt.f32 %v4770_v2 }
 0xe69   : > { %v4799_v45 = vmul.f32 %v8967_v31, %v4784_v28  ;;  %v4821_v19 = vadd.f32 %v4813_v34, %v1851_v47  ;;  %v9197_v34 = vld [vmem:[#allocation25_spill] sm:$0xff]  ;;  %v9198_v47 = vld [vmem:[#allocation27_spill] sm:$0xff] }
 0xe6a   : > { %v1881_v9 = vadd.f32 %v9197_v34, %v8975_v0  ;;  %v1885_v61 = vadd.f32 %v9198_v47, %v8975_v0 }
 0xe6b   : > { %v4814_v14 = vadd.f32 %v8972_v57, %v4799_v45 }
 0xe6d   : > { %v4822_v36 = vadd.f32 %v4814_v14, %v1855_v17 }
 0xe6f   : > { %v4829_v42 = vpack.c.bf16 %v4822_v36, %v4821_v19  ;;  %v9018_v36 = vld [vmem:[#allocation10 + $0x13] ss:$0 sm:$0xff] }
 0xe71   : > { %v7192_v58 = vpop.eup %7191  ;;  %5001 = vmatmul.mubr.bf16.vlgmr.msra.gmra.mxu1 %v4829_v42  ;;  %v4752_v30 = vpop.xlane.xlu0 %4751 }
 0xe72   : > { %v4763_v6 = vmul.f32 0.0078125, %v4752_v30  ;;  %5008 = vmatprep.mubr.bf16.mxu1 %v7993_v33  ;;  %v4785_v32 = vmul.f32 %v7192_v58, %v8941_v3  ;;  %v9194_v33 = vld [vmem:[#allocation21_spill] sm:$0xff] }
 0xe73   : > { %v1865_v3 = vadd.f32 %v9194_v33, %v8975_v0 }
 0xe74   : > { %v4771_v46 = vadd.f32 1e-05, %v4763_v6  ;;  %v4800_v22 = vmul.f32 %v8967_v31, %v4785_v32 }
 0xe75   : > { %v7194_v56 = vpop.eup %7193  ;;  %v4754_v63 = vpop.xlane.xlu1 %4753 }
 0xe76   : > { %7195 = vrsqrt.f32 %v4771_v46  ;;  %v4764_v40 = vmul.f32 0.0078125, %v4754_v63  ;;  %v4786_v53 = vmul.f32 %v7194_v56, %v8945_v35  ;;  %v4815_v25 = vadd.f32 %v8972_v57, %v4800_v22 }
 0xe78   : > { %v4772_v21 = vadd.f32 1e-05, %v4764_v40  ;;  %v4801_v5 = vmul.f32 %v8967_v31, %v4786_v53  ;;  %v4823_v50 = vadd.f32 %v4815_v25, %v1861_v43 }
 0xe7a   : > { %7197 = vrsqrt.f32 %v4772_v21  ;;  %v4816_v24 = vadd.f32 %v8972_v57, %v4801_v5 }
 0xe7c   : > { %v4824_v51 = vadd.f32 %v4816_v24, %v1865_v3 }
 0xe7e   : > { %v4830_v1 = vpack.c.bf16 %v4824_v51, %v4823_v50 }
 0xe80   : > { %5009 = vmatmul.mubr.bf16.gmra.mxu1 %v4830_v1 }
 0xe81   : > { %5016 = vmatprep.mubr.bf16.mxu1 %v8006_v60  ;;  %v9195_v60 = vld [vmem:[#allocation22_spill] sm:$0xff] }
 0xe82   : > { %v1871_v12 = vadd.f32 %v9195_v60, %v8975_v0 }
 0xe83   : > { %v7196_v35 = vpop.eup %7195 }
 0xe84   : > { %v4756_v55 = vpop.xlane.xlu0 %4755  ;;  %v4787_v29 = vmul.f32 %v7196_v35, %v8949_v10  ;;  %v9196_v10 = vld [vmem:[#allocation23_spill] sm:$0xff] }
 0xe85   : > { %v4765_v18 = vmul.f32 0.0078125, %v4756_v55  ;;  %v1875_v15 = vadd.f32 %v9196_v10, %v8975_v0 }
 0xe86   : > { %v4802_v37 = vmul.f32 %v8967_v31, %v4787_v29 }
 0xe87   : > { %v7198_v26 = vpop.eup %7197  ;;  %v4773_v62 = vadd.f32 1e-05, %v4765_v18 }
 0xe88   : > { %v4758_v4 = vpop.xlane.xlu1 %4757  ;;  %v4788_v23 = vmul.f32 %v7198_v26, %v8953_v38  ;;  %v4817_v54 = vadd.f32 %v8972_v57, %v4802_v37 }
 0xe89   : > { %7199 = vrsqrt.f32 %v4773_v62  ;;  %v4766_v20 = vmul.f32 0.0078125, %v4758_v4 }
 0xe8a   : > { %v4803_v52 = vmul.f32 %v8967_v31, %v4788_v23  ;;  %v4825_v13 = vadd.f32 %v4817_v54, %v1871_v12 }
 0xe8b   : > { %v4774_v27 = vadd.f32 1e-05, %v4766_v20 }
 0xe8c   : > { %v4818_v48 = vadd.f32 %v8972_v57, %v4803_v52 }
 0xe8d   : > { %7201 = vrsqrt.f32 %v4774_v27 }
 0xe8e   : > { %v4826_v41 = vadd.f32 %v4818_v48, %v1875_v15 }
 0xe90   : > { %v4831_v16 = vpack.c.bf16 %v4826_v41, %v4825_v13 }
 0xe92   : > { %5017 = vmatmul.mubr.bf16.gmra.mxu1 %v4831_v16 }
 0xe93   : > { %5024 = vmatprep.mubr.bf16.mxu1 %v9188_v49 }
 0xe96   : > { %v7200_v38 = vpop.eup %7199 }
 0xe97   : > { %v4789_v44 = vmul.f32 %v7200_v38, %v8958_v11 }
 0xe99   : > { %v4804_v59 = vmul.f32 %v8967_v31, %v4789_v44 }
 0xe9a   : > { %v7202_v39 = vpop.eup %7201 }
 0xe9b   : > { %v4790_v2 = vmul.f32 %v7202_v39, %v8963_v7  ;;  %v4819_v45 = vadd.f32 %v8972_v57, %v4804_v59 }
 0xe9d   : > { %v4805_v28 = vmul.f32 %v8967_v31, %v4790_v2  ;;  %v4827_v17 = vadd.f32 %v4819_v45, %v1881_v9 }
 0xe9f   : > { %v4820_v49 = vadd.f32 %v8972_v57, %v4805_v28 }
 0xea1   : > { %v4828_v14 = vadd.f32 %v4820_v49, %v1885_v61 }
 0xea3   : > { %v4832_v11 = vpack.c.bf16 %v4828_v14, %v4827_v17 }
 0xea5   : > { %5025 = vmatmul.mubr.bf16.gmra.mxu1 %v4832_v11 }
 0xf31   : > { %v6159_v19 = vpop.f32.mrf.mxu1 }
 0xf33   : > { %v6160_v7 = vpop.f32.mrf.mxu1 }
 0xf34   : > { %v6161_v42 = vadd.f32 %v6160_v7, %v6159_v19 }
 0xf35   : > { %v6162_v31 = vpop.f32.mrf.mxu1 }
 0xf36   : > { %v5003_v58 = vadd.f32 %v6161_v42, %v9018_v36 }
 0xf37   : > { %v6163_v30 = vpop.f32.mrf.mxu1 }
 0xf38   : > { %v5973_v6 = vmul.f32 -1.442695, %v5003_v58  ;;  %v6164_v32 = vadd.f32 %v6163_v30, %v6162_v31 }
 0xf3a   : > { %7203 = vpow2.f32 %v5973_v6  ;;  %v5006_v0 = vadd.f32 %v6164_v32, %v9018_v36 }
 0xf3c   : > { %v5974_v46 = vmul.f32 -1.442695, %v5006_v0 }
 0xf3e   : > { %7205 = vpow2.f32 %v5974_v46 }
 0xf40   : > { %v6165_v57 = vpop.f32.mrf.mxu1 }
 0xf42   : > { %v6166_v22 = vpop.f32.mrf.mxu1 }
 0xf43   : > { %v6167_v56 = vadd.f32 %v6166_v22, %v6165_v57 }
 0xf44   : > { %v6168_v63 = vpop.f32.mrf.mxu1 }
 0xf45   : > { %v5011_v40 = vadd.f32 %v6167_v56, %v9018_v36 }
 0xf46   : > { %v6169_v53 = vpop.f32.mrf.mxu1 }
 0xf47   : > { %v7204_v21 = vpop.eup %7203  ;;  %v5975_v5 = vmul.f32 -1.442695, %v5011_v40  ;;  %v6170_v25 = vadd.f32 %v6169_v53, %v6168_v63 }
 0xf48   : > { %v5057_v8 = vadd.f32 1.0, %v7204_v21 }
 0xf49   : > { %7207 = vpow2.f32 %v5975_v5  ;;  %v5014_v43 = vadd.f32 %v6170_v25, %v9018_v36 }
 0xf4a   : > { %7209 = vrcp.f32 %v5057_v8 }
 0xf4b   : > { %v7206_v33 = vpop.eup %7205  ;;  %v5976_v3 = vmul.f32 -1.442695, %v5014_v43 }
 0xf4c   : > { %v5058_v24 = vadd.f32 1.0, %v7206_v33 }
 0xf4d   : > { %7211 = vpow2.f32 %v5976_v3 }
 0xf4e   : > { %7213 = vrcp.f32 %v5058_v24 }
 0xf52   : > { %v6171_v50 = vpop.f32.mrf.mxu1 }
 0xf54   : > { %v6172_v51 = vpop.f32.mrf.mxu1 }
 0xf55   : > { %v6173_v1 = vadd.f32 %v6172_v51, %v6171_v50 }
 0xf56   : > { %v7208_v35 = vpop.eup %7207  ;;  %v6174_v55 = vpop.f32.mrf.mxu1 }
 0xf57   : > { %v7210_v29 = vpop.eup %7209  ;;  %v5059_v18 = vadd.f32 1.0, %v7208_v35  ;;  %v5019_v37 = vadd.f32 %v6173_v1, %v9018_v36 }
 0xf58   : > { %v6175_v26 = vpop.f32.mrf.mxu1  ;;  %v9025_v62 = vmul.f32 %v7210_v29, %v5003_v58 }
 0xf59   : > { %7215 = vrcp.f32 %v5059_v18  ;;  %v5977_v4 = vmul.f32 -1.442695, %v5019_v37  ;;  %v6176_v23 = vadd.f32 %v6175_v26, %v6174_v55 }
 0xf5a   : > { %v7212_v20 = vpop.eup %7211  ;;  %v5090_v52 = vsel %vm5089_vm0, %v9025_v62, 0.0 }
 0xf5b   : > { %v7214_v54 = vpop.eup %7213  ;;  %v5060_v27 = vadd.f32 1.0, %v7212_v20  ;;  %7217 = vpow2.f32 %v5977_v4  ;;  %v5022_v60 = vadd.f32 %v6176_v23, %v9018_v36  ;;  %5091 = vadd.xlane.f32.xlu0 %v5090_v52  ;;  %v6827_v20 = vld [vmem:[#allocation7 + $0x128] ss:$20 sps:$4 sm:$0xff]  }
 0xf5c   : > { %v5082_v12 = vmul.f32 %v7214_v54, %v5006_v0  ;;  %6243 = vmatprep.subr.bf16.mxu0 %v6827_v20  ;;  %6267 = vmatprep.subr.bf16.mxu1 %v6827_v20 }
 0xf5d   : > { %7219 = vrcp.f32 %v5060_v27  ;;  %v5978_v10 = vmul.f32 -1.442695, %v5022_v60  ;;  %6244 = vmatpush3.bf16.msra.mxu0 %v6827_v20  ;;  %6275 = vmatpush3.bf16.msra.mxu1 %v6827_v20  ;;  %v6828_v27 = vld [vmem:[#allocation7 + $0x100] ss:$20 sps:$4 sm:$0xff]  }
 0xf5e   : > { %v5093_v15 = vsel %vm5089_vm0, %v5082_v12, 0.0  ;;  %6245 = vmatprep.subr.bf16.mxu0 %v6828_v27  ;;  %6268 = vmatprep.subr.bf16.mxu1 %v6828_v27 }
 0xf5f   : > { %7221 = vpow2.f32 %v5978_v10  ;;  %5094 = vadd.xlane.f32.xlu1 %v5093_v15 }
 0xf61   : > { %6246 = vmatpush3.bf16.msra.mxu0 %v6828_v27  ;;  %6276 = vmatpush3.bf16.msra.mxu1 %v6828_v27 }
 0xf65   : > { %v6177_v48 = vpop.f32.mrf.mxu1 }
 0xf66   : > { %v7216_v13 = vpop.eup %7215 }
 0xf67   : > { %v6178_v41 = vpop.f32.mrf.mxu1  ;;  %v5083_v16 = vmul.f32 %v7216_v13, %v5011_v40 }
 0xf68   : > { %v7218_v38 = vpop.eup %7217  ;;  %v6179_v44 = vadd.f32 %v6178_v41, %v6177_v48  ;;  %v6829_v48 = vld [vmem:[#allocation7 + $0xd8] ss:$20 sps:$4 sm:$0xff]  }
 0xf69   : > { %v5061_v59 = vadd.f32 1.0, %v7218_v38  ;;  %v5096_v39 = vsel %vm5089_vm0, %v5083_v16, 0.0  ;;  %v6180_v2 = vpop.f32.mrf.mxu1  ;;  %6247 = vmatprep.subr.bf16.mxu0 %v6829_v48  ;;  %6269 = vmatprep.subr.bf16.mxu1 %v6829_v48  ;;  %v6830_v38 = vld [vmem:[#allocation7 + $0xb0] ss:$20 sps:$4 sm:$0xff]  }
 0xf6a   : > { %v7220_v28 = vpop.eup %7219  ;;  %v5027_v45 = vadd.f32 %v6179_v44, %v9018_v36  ;;  %5097 = vadd.xlane.f32.xlu0 %v5096_v39  ;;  %6248 = vmatpush3.bf16.msra.mxu0 %v6829_v48  ;;  %v6832_v39 = vld [vmem:[#allocation7 + $0x60] ss:$20 sps:$4 sm:$0xff]  }
 0xf6b   : > { %7223 = vrcp.f32 %v5061_v59  ;;  %v6181_v34 = vpop.f32.mrf.mxu1  ;;  %v5084_v9 = vmul.f32 %v7220_v28, %v5014_v43  ;;  %6277 = vmatpush3.bf16.msra.mxu1 %v6829_v48  ;;  %6249 = vmatprep.subr.bf16.mxu0 %v6830_v38  ;;  %v6831_v59 = vld [vmem:[#allocation7 + $0x88] ss:$20 sps:$4 sm:$0xff]  }
 0xf6c   : > { %v7222_v47 = vpop.eup %7221  ;;  %v5979_v61 = vmul.f32 -1.442695, %v5027_v45  ;;  %v6182_v49 = vadd.f32 %v6181_v34, %v6180_v2  ;;  %6270 = vmatprep.subr.bf16.mxu1 %v6830_v38 }
 0xf6d   : > { %v5062_v17 = vadd.f32 1.0, %v7222_v47  ;;  %v5099_v14 = vsel %vm5089_vm0, %v5084_v9, 0.0 }
 0xf6e   : > { %7225 = vpow2.f32 %v5979_v61  ;;  %v5030_v11 = vadd.f32 %v6182_v49, %v9018_v36  ;;  %5100 = vadd.xlane.f32.xlu1 %v5099_v14  ;;  %6250 = vmatpush3.bf16.msra.mxu0 %v6830_v38  ;;  %v6834_v49 = vld [vmem:[#allocation7 + $0x10] ss:$20 sps:$4 sm:$0xff]  }
 0xf6f   : > { %7227 = vrcp.f32 %v5062_v17  ;;  %6278 = vmatpush3.bf16.msra.mxu1 %v6830_v38  ;;  %6251 = vmatprep.subr.bf16.mxu0 %v6831_v59 }
 0xf70   : > { %v5980_v19 = vmul.f32 -1.442695, %v5030_v11  ;;  %6271 = vmatprep.subr.bf16.mxu1 %v6831_v59 }
 0xf72   : > { %7229 = vpow2.f32 %v5980_v19  ;;  %6252 = vmatpush3.bf16.msra.mxu0 %v6831_v59 }
 0xf73   : > { %6279 = vmatpush3.bf16.msra.mxu1 %v6831_v59  ;;  %6253 = vmatprep.subr.bf16.mxu0 %v6832_v39 }
 0xf74   : > { %6272 = vmatprep.subr.bf16.mxu1 %v6832_v39 }
 0xf76   : > { %6254 = vmatpush3.bf16.msra.mxu0 %v6832_v39 }
 0xf77   : > { %6280 = vmatpush3.bf16.msra.mxu1 %v6832_v39 }
 0xf78   : > { %v7224_v7 = vpop.eup %7223 }
 0xf79   : > { %v5085_v42 = vmul.f32 %v7224_v7, %v5019_v37 }
 0xf7b   : > { %v7226_v31 = vpop.eup %7225  ;;  %v5102_v58 = vsel %vm5089_vm0, %v5085_v42, 0.0 }
 0xf7c   : > { %v7228_v30 = vpop.eup %7227  ;;  %v5063_v6 = vadd.f32 1.0, %v7226_v31  ;;  %5103 = vadd.xlane.f32.xlu0 %v5102_v58 }
 0xf7d   : > { %v5086_v32 = vmul.f32 %v7228_v30, %v5022_v60 }
 0xf7e   : > { %7231 = vrcp.f32 %v5063_v6 }
 0xf7f   : > { %v7230_v0 = vpop.eup %7229  ;;  %v5105_v46 = vsel %vm5089_vm0, %v5086_v32, 0.0 }
 0xf80   : > { %v5064_v57 = vadd.f32 1.0, %v7230_v0  ;;  %5106 = vadd.xlane.f32.xlu1 %v5105_v46 }
 0xf82   : > { %7233 = vrcp.f32 %v5064_v57 }
 0xf8b   : > { %v7232_v36 = vpop.eup %7231 }
 0xf8c   : > { %v9037_v22 = vmul.f32 %v7232_v36, %v5027_v45  ;;  %v6833_v45 = vld [vmem:[#allocation7 + $0x38] ss:$20 sps:$4 sm:$0xff]  }
 0xf8d   : > { %6255 = vmatprep.subr.bf16.mxu0 %v6833_v45  ;;  %6273 = vmatprep.subr.bf16.mxu1 %v6833_v45 }
 0xf8e   : > { %v5108_v56 = vsel %vm5089_vm0, %v9037_v22, 0.0  ;;  %6256 = vmatpush3.bf16.msra.mxu0 %v6833_v45  ;;  %6281 = vmatpush3.bf16.msra.mxu1 %v6833_v45 }
 0xf8f   : > { %v7234_v63 = vpop.eup %7233  ;;  %5109 = vadd.xlane.f32.xlu0 %v5108_v56  ;;  %6257 = vmatprep.subr.bf16.mxu0 %v6834_v49 }
 0xf90   : > { %v9041_v40 = vmul.f32 %v7234_v63, %v5030_v11  ;;  %6274 = vmatprep.subr.bf16.mxu1 %v6834_v49  ;;  %v5981_v63 = vld [vmem:[#allocation10 + $0x1d] ss:$0 sm:$0xff] }
 0xf92   : > { %v5111_v53 = vsel %vm5089_vm0, %v9041_v40, 0.0  ;;  %6258 = vmatpush3.bf16.msra.mxu0 %v6834_v49  ;;  %6282 = vmatpush3.bf16.msra.mxu1 %v6834_v49 }
 0xf93   : > { %5112 = vadd.xlane.f32.xlu1 %v5111_v53 }
 0xfe4   : > { %v5092_v21 = vpop.xlane.xlu0 %5091 }
 0xfe5   : > { %v5115_v5 = vmul.f32 0.015625, %v5092_v21 }
 0xfe7   : > { %v9046_v25 = vsub.f32 %v9025_v62, %v5115_v5 }
 0xfe8   : > { %v5095_v8 = vpop.xlane.xlu1 %5094 }
 0xfe9   : > { %v5116_v43 = vmul.f32 0.015625, %v5095_v8  ;;  %v5131_v33 = vmul.f32 %v9046_v25, %v9046_v25  ;;  %v5982_v8 = vld [vmem:[#allocation10 + $0x26] ss:$0 sm:$0xff] }
 0xfeb   : > { %v9050_v3 = vsub.f32 %v5082_v12, %v5116_v43  ;;  %v5139_v24 = vsel %vm5089_vm0, %v5131_v33, 0.0 }
 0xfec   : > { %5140 = vadd.xlane.f32.xlu0 %v5139_v24 }
 0xfed   : > { %v5132_v50 = vmul.f32 %v9050_v3, %v9050_v3 }
 0xfef   : > { %v5142_v51 = vsel %vm5089_vm0, %v5132_v50, 0.0 }
 0xff0   : > { %5143 = vadd.xlane.f32.xlu1 %v5142_v51 }
 0xff3   : > { %v5098_v1 = vpop.xlane.xlu0 %5097 }
 0xff4   : > { %v5117_v35 = vmul.f32 0.015625, %v5098_v1 }
 0xff6   : > { %v9056_v55 = vsub.f32 %v5083_v16, %v5117_v35 }
 0xff7   : > { %v5101_v29 = vpop.xlane.xlu1 %5100 }
 0xff8   : > { %v5118_v18 = vmul.f32 0.015625, %v5101_v29  ;;  %v5133_v37 = vmul.f32 %v9056_v55, %v9056_v55 }
 0xffa   : > { %v9060_v26 = vsub.f32 %v5084_v9, %v5118_v18  ;;  %v5145_v62 = vsel %vm5089_vm0, %v5133_v37, 0.0 }
 0xffb   : > { %5146 = vadd.xlane.f32.xlu0 %v5145_v62 }
 0xffc   : > { %v5134_v4 = vmul.f32 %v9060_v26, %v9060_v26 }
 0xffe   : > { %v5148_v23 = vsel %vm5089_vm0, %v5134_v4, 0.0 }
 0xfff   : > { %5149 = vadd.xlane.f32.xlu1 %v5148_v23 }
0x1005   : > { %v5104_v52 = vpop.xlane.xlu0 %5103 }
0x1006   : > { %v5119_v54 = vmul.f32 0.015625, %v5104_v52 }
0x1008   : > { %v9066_v60 = vsub.f32 %v5085_v42, %v5119_v54 }
0x1009   : > { %v5107_v12 = vpop.xlane.xlu1 %5106 }
0x100a   : > { %v5120_v10 = vmul.f32 0.015625, %v5107_v12  ;;  %v5135_v15 = vmul.f32 %v9066_v60, %v9066_v60 }
0x100c   : > { %v9070_v13 = vsub.f32 %v5086_v32, %v5120_v10  ;;  %v5151_v41 = vsel %vm5089_vm0, %v5135_v15, 0.0 }
0x100d   : > { %5152 = vadd.xlane.f32.xlu0 %v5151_v41 }
0x100e   : > { %v5136_v16 = vmul.f32 %v9070_v13, %v9070_v13 }
0x1010   : > { %v5154_v44 = vsel %vm5089_vm0, %v5136_v16, 0.0 }
0x1011   : > { %5155 = vadd.xlane.f32.xlu1 %v5154_v44 }
0x1018   : > { %v5110_v2 = vpop.xlane.xlu0 %5109 }
0x1019   : > { %v5121_v28 = vmul.f32 0.015625, %v5110_v2 }
0x101b   : > { %v9077_v34 = vsub.f32 %v9037_v22, %v5121_v28 }
0x101c   : > { %v5113_v9 = vpop.xlane.xlu1 %5112 }
0x101d   : > { %v5122_v47 = vmul.f32 0.015625, %v5113_v9  ;;  %v5137_v61 = vmul.f32 %v9077_v34, %v9077_v34 }
0x101f   : > { %v9082_v17 = vsub.f32 %v9041_v40, %v5122_v47  ;;  %v5157_v14 = vsel %vm5089_vm0, %v5137_v61, 0.0 }
0x1020   : > { %5158 = vadd.xlane.f32.xlu0 %v5157_v14 }
0x1021   : > { %v5138_v11 = vmul.f32 %v9082_v17, %v9082_v17 }
0x1023   : > { %v5160_v19 = vsel %vm5089_vm0, %v5138_v11, 0.0 }
0x1024   : > { %5161 = vadd.xlane.f32.xlu1 %v5160_v19 }
0x1075   : > { %v5141_v7 = vpop.xlane.xlu0 %5140 }
0x1076   : > { %v5163_v42 = vmul.f32 0.015625, %v5141_v7 }
0x1078   : > { %v5171_v31 = vadd.f32 1e-05, %v5163_v42  ;;  %v5983_v42 = vld [vmem:[#allocation10 + $0x14] ss:$0 sm:$0xff] }
0x1079   : > { %v5144_v58 = vpop.xlane.xlu1 %5143 }
0x107a   : > { %7235 = vrsqrt.f32 %v5171_v31  ;;  %v5164_v30 = vmul.f32 0.015625, %v5144_v58 }
0x107c   : > { %v5172_v6 = vadd.f32 1e-05, %v5164_v30 }
0x107e   : > { %7237 = vrsqrt.f32 %v5172_v6 }
0x1084   : > { %v5147_v32 = vpop.xlane.xlu0 %5146 }
0x1085   : > { %v5165_v0 = vmul.f32 0.015625, %v5147_v32 }
0x1087   : > { %v7236_v46 = vpop.eup %7235  ;;  %v5173_v57 = vadd.f32 1e-05, %v5165_v0 }
0x1088   : > { %v5150_v36 = vpop.xlane.xlu1 %5149  ;;  %v5187_v22 = vmul.f32 %v7236_v46, %v9046_v25 }
0x1089   : > { %7239 = vrsqrt.f32 %v5173_v57  ;;  %v5166_v56 = vmul.f32 0.015625, %v5150_v36 }
0x108a   : > { %v5202_v5 = vmul.f32 %v5981_v63, %v5187_v22 }
0x108b   : > { %v7238_v40 = vpop.eup %7237  ;;  %v5174_v53 = vadd.f32 1e-05, %v5166_v56 }
0x108c   : > { %v5188_v21 = vmul.f32 %v7238_v40, %v9050_v3  ;;  %v5217_v33 = vadd.f32 %v5982_v8, %v5202_v5 }
0x108d   : > { %7241 = vrsqrt.f32 %v5174_v53 }
0x108e   : > { %v5203_v43 = vmul.f32 %v5981_v63, %v5188_v21 }
0x1090   : > { %v5218_v24 = vadd.f32 %v5982_v8, %v5203_v43 }
0x1092   : > { %v5241_v50 = vpack.c.bf16 %v5218_v24, %v5217_v33 }
0x1094   : > { %6259 = vmatprep.mubr.bf16.mxu0 %v5241_v50 }
0x1096   : > { %v7240_v51 = vpop.eup %7239  ;;  %v5153_v1 = vpop.xlane.xlu0 %5152 }
0x1097   : > { %v5189_v35 = vmul.f32 %v7240_v51, %v9056_v55  ;;  %v5167_v25 = vmul.f32 0.015625, %v5153_v1 }
0x1099   : > { %v5175_v29 = vadd.f32 1e-05, %v5167_v25  ;;  %v5204_v4 = vmul.f32 %v5981_v63, %v5189_v35 }
0x109a   : > { %v7242_v18 = vpop.eup %7241  ;;  %v5156_v37 = vpop.xlane.xlu1 %5155 }
0x109b   : > { %v5190_v62 = vmul.f32 %v7242_v18, %v9060_v26  ;;  %7243 = vrsqrt.f32 %v5175_v29  ;;  %v5168_v3 = vmul.f32 0.015625, %v5156_v37  ;;  %v5219_v52 = vadd.f32 %v5982_v8, %v5204_v4 }
0x109d   : > { %v5176_v23 = vadd.f32 1e-05, %v5168_v3  ;;  %v5205_v20 = vmul.f32 %v5981_v63, %v5190_v62 }
0x109f   : > { %7245 = vrsqrt.f32 %v5176_v23  ;;  %v5220_v54 = vadd.f32 %v5982_v8, %v5205_v20 }
0x10a1   : > { %v5242_v27 = vpack.c.bf16 %v5220_v54, %v5219_v52 }
0x10a3   : > { %6260 = vmatmul.mubr.bf16.vlgmr.msra.gmra.mxu0 %v5242_v27 }
0x10a8   : > { %v7244_v12 = vpop.eup %7243 }
0x10a9   : > { %v5159_v10 = vpop.xlane.xlu0 %5158  ;;  %v5191_v55 = vmul.f32 %v7244_v12, %v9066_v60 }
0x10aa   : > { %v5169_v15 = vmul.f32 0.015625, %v5159_v10 }
0x10ab   : > { %v5206_v38 = vmul.f32 %v5981_v63, %v5191_v55 }
0x10ac   : > { %v7246_v48 = vpop.eup %7245  ;;  %v5177_v41 = vadd.f32 1e-05, %v5169_v15 }
0x10ad   : > { %v5162_v16 = vpop.xlane.xlu1 %5161  ;;  %v5192_v26 = vmul.f32 %v7246_v48, %v9070_v13  ;;  %v5221_v2 = vadd.f32 %v5982_v8, %v5206_v38 }
0x10ae   : > { %7247 = vrsqrt.f32 %v5177_v41  ;;  %v5170_v44 = vmul.f32 0.015625, %v5162_v16 }
0x10af   : > { %v5207_v59 = vmul.f32 %v5981_v63, %v5192_v26 }
0x10b0   : > { %v5178_v39 = vadd.f32 1e-05, %v5170_v44 }
0x10b1   : > { %v5222_v28 = vadd.f32 %v5982_v8, %v5207_v59 }
0x10b2   : > { %7249 = vrsqrt.f32 %v5178_v39 }
0x10b3   : > { %v5243_v45 = vpack.c.bf16 %v5222_v28, %v5221_v2 }
0x10b5   : > { %6263 = vmatprep.mubr.bf16.mxu1 %v5243_v45 }
0x10bb   : > { %v7248_v9 = vpop.eup %7247 }
0x10bc   : > { %v5193_v47 = vmul.f32 %v7248_v9, %v9077_v34 }
0x10be   : > { %v5208_v49 = vmul.f32 %v5981_v63, %v5193_v47 }
0x10bf   : > { %v7250_v60 = vpop.eup %7249 }
0x10c0   : > { %v5194_v61 = vmul.f32 %v7250_v60, %v9082_v17  ;;  %v5223_v13 = vadd.f32 %v5982_v8, %v5208_v49 }
0x10c2   : > { %v5209_v14 = vmul.f32 %v5981_v63, %v5194_v61 }
0x10c4   : > { %v5224_v11 = vadd.f32 %v5982_v8, %v5209_v14 }
0x10c6   : > { %v5244_v19 = vpack.c.bf16 %v5224_v11, %v5223_v13 }
0x10c8   : > { %6264 = vmatmul.mubr.bf16.vlgmr.msra.gmra.mxu1 %v5244_v19 }
0x1163   : > { %v6261_v7 = vpop.f32.mrf.mxu0 }
0x1164   : > { %v5343_v30 = vadd.f32 %v6261_v7, %v5983_v42 }
0x1165   : > { %v5334_v31 = vpop.f32.mrf.mxu0 }
0x1166   : > { %v5335_v0 = vadd.f32 %v5983_v42, %v5334_v31 }
0x1167   : > { %v6262_v58 = vpop.f32.mrf.mxu0 }
0x1168   : > { %v5346_v6 = vadd.f32 %v6262_v58, %v5983_v42 }
0x1169   : > { %v5337_v32 = vpop.f32.mrf.mxu0 }
0x116a   : > { %v6024_v34 = vpack.c.bf16 %v5346_v6, %v5343_v30  ;;  %v5338_v46 = vadd.f32 %v5983_v42, %v5337_v32 }
0x116c   : > { %6036 = vst [vmem:[%s366_s19 + $0x8] sm:$0xff] %v6024_v34   ;;  %v6019_v17 = vpack.c.bf16 %v5338_v46, %v5335_v0 }
0x116e   : > { %6020 = vst [vmem:[%s366_s19] sm:$0xff] %v6019_v17  }
0x1188   : > { %v6265_v57 = vpop.f32.mrf.mxu1 }
0x1189   : > { %v5359_v56 = vadd.f32 %v6265_v57, %v5983_v42 }
0x118a   : > { %v5350_v36 = vpop.f32.mrf.mxu1 }
0x118b   : > { %v5351_v53 = vadd.f32 %v5983_v42, %v5350_v36 }
0x118c   : > { %v6266_v22 = vpop.f32.mrf.mxu1 }
0x118d   : > { %v5362_v63 = vadd.f32 %v6266_v22, %v5983_v42 }
0x118e   : > { %v5353_v40 = vpop.f32.mrf.mxu1 }
0x118f   : > { %v6034_v21 = vpack.c.bf16 %v5362_v63, %v5359_v56  ;;  %v5354_v5 = vadd.f32 %v5983_v42, %v5353_v40 }
0x1191   : > { %6038 = vst [vmem:[%s366_s19 + $0x18] sm:$0xff] %v6034_v21   ;;  %v6029_v8 = vpack.c.bf16 %v5354_v5, %v5351_v53 }
0x1193   : > { %6037 = vst [vmem:[%s366_s19 + $0x10] sm:$0xff] %v6029_v8  }
0x1194   : > { %7400 = shalt.err (!%p7397_p0)
}
0x1195   : > { %s7401_s29 = scalar_lea.hbm %s9103_s12, 512  ;;  %s7405_s18 = scalar_lea.hbm %s9152_s6, 1024 }
0x1196   : > { %p7402_p7 = scmp.ne.s32.totalorder %s9103_s12, %s7401_s29  ;;  %p7406_p13 = scmp.lt.s32.totalorder %s9103_s12, %s9152_s6 }
0x1197   : > { %p7407_p5 = scmp.lt.s32.totalorder %s7405_s18, %s7401_s29 }
0x1198   : > { %p7403_p8 = pnand %p7402_p7, %p9199_p2 }
0x1199   : > { %p7408_p10 = por %p7407_p5, %p7406_p13 }
0x119a   : > { %p7404_p11 = pneg %p7403_p8 }
0x119c   : > { %p7409_p1 = pnand %p7408_p10, %p7404_p11 }
0x119e   : > { %7412 = shalt.err (!%p7409_p1)
}
0x119f   : > { %s7480_s11 = smov 64   ;;  %s7481_s19 = smov 4  }
0x11a0   : > { %6299 = dma.vmem_to_hbm [thread:$0]  (%p9199_p2), %s9098_s16, 512, %s9103_s12, %s5406_s20, %s7480_s11, %s7480_s11, %s7481_s19  }
0x11a1 PF: > { %s5434_s1 = sand.u32 1, %s7451_s21   ;;  %p9200_p3 = scmp.ne.s32.totalorder %s9162_s28, 0 }
0x11a2   : > { %p9201_p9 = scmp.ge.s32.totalorder %s7463_s24, 2  ;;  %s5435_s17 = scalar_lea.sflag [#allocation4], %s5434_s1 }
0x11a4   : > { %p6319_p12 = pnand %p9201_p9, %p9200_p3 }
0x11a6   : > { %p6320_p4 = pneg %p6319_p12 }
0x11a8   : > { %7446 = dma.done.wait (%p6320_p4), %s5435_s17, 512  }
0x11a9   : > { %7448 = vsyncadd (%p6320_p4), %s5435_s17, 4294966784  ;;  %p23_p6 = scmp.ge.s32.totalorder %s7589_s7, 4   ;;  %s9202_s21 = smov %s7455_s22 }
0x11aa   : > { %s9203_s22 = smov %s7459_s23  ;;  %s9204_s23 = smov %s7607_s8 }
0x11ab   : > { %s9205_s24 = smov %s7589_s7  ;;  %25 = sbr.rel (!%p23_p6) target bundleno = 12 (0xc), region = 117 }
0x11b0   :  { %5440 = vsyncpa [#allocation3], 1 }
0x11b1   :  { %5442 = vsyncpa [#allocation3 + $0x1], 1 }
0x11b2   :  { %5443 = vsyncpa [#allocation6], 1 }
0x11b3   :  { %5445 = vsyncpa [#allocation6 + $0x1], 1 }
0x11b4   :  { %5446 = vsyncpa [#allocation9], 1 }
0x11b5   :  { %5447 = vsyncpa [#allocation4], 1 }
0x11b6   :  { %5449 = vsyncpa [#allocation4 + $0x1], 1 }

</bundles_post_ra>
